<compile_context>
chip_gen: v5e
topology: v5e:2x2
jax: 0.10.0
libtpu: 0.0.40
codegen_flags: <defaults>
</compile_context>

<pallas_src>
import functools

import jax
import jax.numpy as jnp
from jax.experimental import pallas as pl
from jax.experimental.pallas import tpu as pltpu

IN_FEATURES = 3072        # 3 * 32 * 32
HIDDEN = 1000             # logical hidden width (torch module)
HIDDEN_PAD = 1024         # padded to 8 * 128 for clean lane layout (exact: zero pad)
OUT_FEATURES = 10
TILE_B = 512              # batch tile for the large-batch (weight-resident) path
TILE_K = 1024             # K slab for the small-batch (w1-streaming) path; 3072/1024 = 3
SMALL_BATCH_MAX = 256     # <= this: single batch tile + K-streaming (hide w1 DMA)


def _round_up(x, m):
    return (x + m - 1) // m * m


# ---------------------------------------------------------------------------
# Kernels
# ---------------------------------------------------------------------------

def _ffn_kernel_resident(x_ref, w1_ref, b1_ref, w2_ref, b2_ref, o_ref):
    """Large-batch path: full w1 resident in VMEM, grid tiles only the batch."""
    # fc1: (tb, 3072) @ (3072, 1024) on the MXU -- bf16 operands, f32 accumulation.
    xb = x_ref[...].astype(jnp.bfloat16)
    h1 = jnp.dot(xb, w1_ref[...], preferred_element_type=jnp.float32)
    h1 = jnp.maximum(h1 + b1_ref[...], 0.0)            # bias + ReLU in f32 (VPU)
    # fc2: (tb, 1024) @ (1024, 10) -- tiny; single f32 store of the (tb, 10) result.
    h2 = jnp.dot(h1.astype(jnp.bfloat16), w2_ref[...],
                 preferred_element_type=jnp.float32)
    o_ref[...] = (h2 + b2_ref[...]).astype(o_ref.dtype)


def _ffn_kernel_ksplit(x_ref, w1_ref, b1_ref, w2_ref, b2_ref, o_ref, acc_ref):
    """Small-batch path: stream w1 over an inner K axis, accumulate fc1 in f32."""
    k = pl.program_id(1)

    @pl.when(k == 0)
    def _():
        acc_ref[...] = jnp.zeros_like(acc_ref)

    xb = x_ref[...].astype(jnp.bfloat16)
    acc_ref[...] += jnp.dot(xb, w1_ref[...], preferred_element_type=jnp.float32)

    @pl.when(k == pl.num_programs(1) - 1)
    def _():
        h1 = jnp.maximum(acc_ref[...] + b1_ref[...], 0.0)
        h2 = jnp.dot(h1.astype(jnp.bfloat16), w2_ref[...],
                     preferred_element_type=jnp.float32)
        o_ref[...] = (h2 + b2_ref[...]).astype(o_ref.dtype)


# ---------------------------------------------------------------------------
# Parameters
# ---------------------------------------------------------------------------

def init_params(key):
    """torch.nn.Linear-style init (uniform +-1/sqrt(fan_in)), logical f32 shapes.

    Weights are stored pre-transposed as (in_features, out_features)."""
    k1, k2, k3, k4 = jax.random.split(key, 4)
    bound1 = 1.0 / jnp.sqrt(IN_FEATURES)
    bound2 = 1.0 / jnp.sqrt(HIDDEN)
    w1 = jax.random.uniform(k1, (IN_FEATURES, HIDDEN), jnp.float32, -bound1, bound1)
    b1 = jax.random.uniform(k2, (HIDDEN,), jnp.float32, -bound1, bound1)
    w2 = jax.random.uniform(k3, (HIDDEN, OUT_FEATURES), jnp.float32, -bound2, bound2)
    b2 = jax.random.uniform(k4, (OUT_FEATURES,), jnp.float32, -bound2, bound2)
    return w1, b1, w2, b2


def pack_params(w1, b1, w2, b2):
    """Pad HIDDEN 1000 -> 1024 (zeros, exact) and cast weights to bf16 for the kernel."""
    w1p = jnp.zeros((IN_FEATURES, HIDDEN_PAD), jnp.bfloat16)
    w1p = w1p.at[:, :HIDDEN].set(w1.astype(jnp.bfloat16))
    b1p = jnp.zeros((1, HIDDEN_PAD), jnp.float32).at[:, :HIDDEN].set(b1.reshape(1, -1))
    w2p = jnp.zeros((HIDDEN_PAD, OUT_FEATURES), jnp.bfloat16)
    w2p = w2p.at[:HIDDEN, :].set(w2.astype(jnp.bfloat16))
    b2p = b2.reshape(1, OUT_FEATURES).astype(jnp.float32)
    return w1p, b1p, w2p, b2p


# ---------------------------------------------------------------------------
# Forward
# ---------------------------------------------------------------------------

@functools.partial(jax.jit, static_argnames=("tile_b",))
def feedforward(x_nchw, w1p, b1p, w2p, b2p, *, tile_b=TILE_B):
    """x_nchw: (B, 3, 32, 32) float32 (or bfloat16).  Returns (B, 10) float32."""
    B = x_nchw.shape[0]
    x = x_nchw.reshape(B, IN_FEATURES)                 # torch .view(batch, -1)
    if x.dtype not in (jnp.dtype(jnp.float32), jnp.dtype(jnp.bfloat16)):
        x = x.astype(jnp.float32)

    tile_b = max(8, _round_up(int(tile_b), 8))         # enforce (8,128) sublane rule

    if B <= SMALL_BATCH_MAX:
        # ---- Small batch: latency is dominated by the 6 MiB w1 fetch. Stream w1
        # in (TILE_K, HIDDEN_PAD) slabs along an inner "arbitrary" K axis so the
        # MXU starts as soon as the first slab lands (w1 DMA overlaps compute).
        tb = _round_up(B, 8)
        b_pad = tb
        if b_pad != B:
            # Padding forces an HBM copy anyway -> fold the bf16 downcast into it
            # (halves the x DMA; fc1 consumes bf16 regardless).
            x = jnp.pad(x.astype(jnp.bfloat16), ((0, b_pad - B), (0, 0)))
        grid = (1, IN_FEATURES // TILE_K)
        out = pl.pallas_call(
            _ffn_kernel_ksplit,
            out_shape=jax.ShapeDtypeStruct((b_pad, OUT_FEATURES), jnp.float32),
            grid=grid,
            in_specs=[
                pl.BlockSpec((tb, TILE_K), lambda i, k: (i, k)),             # x slab
                pl.BlockSpec((TILE_K, HIDDEN_PAD), lambda i, k: (k, 0)),     # w1 slab
                pl.BlockSpec((1, HIDDEN_PAD), lambda i, k: (0, 0),
                             pipeline_mode=pl.Buffered(1)),                  # b1 resident
                pl.BlockSpec((HIDDEN_PAD, OUT_FEATURES), lambda i, k: (0, 0),
                             pipeline_mode=pl.Buffered(1)),                  # w2 resident
                pl.BlockSpec((1, OUT_FEATURES), lambda i, k: (0, 0),
                             pipeline_mode=pl.Buffered(1)),                  # b2 resident
            ],
            out_specs=pl.BlockSpec((tb, OUT_FEATURES), lambda i, k: (i, 0)),
            scratch_shapes=[pltpu.VMEM((tb, HIDDEN_PAD), jnp.float32)],      # fc1 acc
            compiler_params=pltpu.CompilerParams(
                dimension_semantics=("parallel", "arbitrary"),
                vmem_limit_bytes=32 << 20,
            ),
        )(x, w1p, b1p, w2p, b2p)
        return out[:B]

    # ---- Large batch: keep w1 resident in VMEM (fetched exactly once), tile only
    # the batch.  Force >= 2 batch tiles so both v7x TensorCores get work.
    tb = min(tile_b, max(8, _round_up(-(-B // 2), 8)))
    b_pad = _round_up(B, tb)
    if b_pad != B:
        # Pad forces a copy anyway -> take bf16 x at the pallas_call boundary.
        x = jnp.pad(x.astype(jnp.bfloat16), ((0, b_pad - B), (0, 0)))
    grid = (b_pad // tb,)
    out = pl.pallas_call(
        _ffn_kernel_resident,
        out_shape=jax.ShapeDtypeStruct((b_pad, OUT_FEATURES), jnp.float32),
        grid=grid,
        in_specs=[
            pl.BlockSpec((tb, IN_FEATURES), lambda i: (i, 0)),               # x tile
            pl.BlockSpec((IN_FEATURES, HIDDEN_PAD), lambda i: (0, 0),
                         pipeline_mode=pl.Buffered(1)),   # w1 resident, single-buffered
            pl.BlockSpec((1, HIDDEN_PAD), lambda i: (0, 0),
                         pipeline_mode=pl.Buffered(1)),                      # b1 resident
            pl.BlockSpec((HIDDEN_PAD, OUT_FEATURES), lambda i: (0, 0),
                         pipeline_mode=pl.Buffered(1)),                      # w2 resident
            pl.BlockSpec((1, OUT_FEATURES), lambda i: (0, 0),
                         pipeline_mode=pl.Buffered(1)),                      # b2 resident
        ],
        out_specs=pl.BlockSpec((tb, OUT_FEATURES), lambda i: (i, 0)),
        compiler_params=pltpu.CompilerParams(
            dimension_semantics=("parallel",),     # shard batch tiles across TCs on v7x
            vmem_limit_bytes=48 << 20,             # w1 (1x) + 2x x-tiles + temps
        ),
    )(x, w1p, b1p, w2p, b2p)
    return out[:B]


def _reference(x_nchw, w1, b1, w2, b2, *, x_bf16):
    """Plain JAX/f32 reference using the bf16-rounded weights the kernel consumes."""
    xf = x_nchw.reshape(x_nchw.shape[0], -1).astype(jnp.float32)
    if x_bf16:
        xf = xf.astype(jnp.bfloat16).astype(jnp.float32)
    w1r = w1.astype(jnp.bfloat16).astype(jnp.float32)
    w2r = w2.astype(jnp.bfloat16).astype(jnp.float32)
    h1 = jnp.maximum(xf @ w1r + b1, 0.0)
    return h1 @ w2r + b2


if __name__ == "__main__":
    key = jax.random.PRNGKey(0)
    k_x1, k_x2, k_p = jax.random.split(key, 3)

    w1, b1, w2, b2 = init_params(k_p)
    w1p, b1p, w2p, b2p = pack_params(w1, b1, w2, b2)

    # Small batch -> K-streaming path (grid (1, 3)); batch pad folds a bf16 cast of x.
    B_small = 4
    x_small = jax.random.normal(k_x1, (B_small, 3, 32, 32), jnp.float32)
    out_small = jax.block_until_ready(feedforward(x_small, w1p, b1p, w2p, b2p))
    assert out_small.shape == (B_small, OUT_FEATURES)
    ref_small = _reference(x_small, w1, b1, w2, b2, x_bf16=True)
    err_s = float(jnp.max(jnp.abs(out_small - ref_small)))
    assert jnp.allclose(out_small, ref_small, atol=5e-2, rtol=5e-2), err_s

    # Larger batch -> weight-resident path with 2 batch tiles (v7x megacore), f32 x.
    B_large = 272
    x_large = jax.random.normal(k_x2, (B_large, 3, 32, 32), jnp.float32)
    out_large = jax.block_until_ready(feedforward(x_large, w1p, b1p, w2p, b2p))
    assert out_large.shape == (B_large, OUT_FEATURES)
    ref_large = _reference(x_large, w1, b1, w2, b2, x_bf16=False)
    err_l = float(jnp.max(jnp.abs(out_large - ref_large)))
    assert jnp.allclose(out_large, ref_large, atol=5e-2, rtol=5e-2), err_l

    print("KERNEL_OK")
</pallas_src>

<mosaic_0001>
module attributes {stable_mosaic.version = 11 : i64} {
  func.func @_ffn_kernel_ksplit(%arg0: i32, %arg1: i32, %arg2: memref<8x1024xbf16, #tpu.memory_space<vmem>>, %arg3: memref<1024x1024xbf16, #tpu.memory_space<vmem>>, %arg4: memref<1x1024xf32, #tpu.memory_space<vmem>>, %arg5: memref<1024x10xbf16, #tpu.memory_space<vmem>>, %arg6: memref<1x10xf32, #tpu.memory_space<vmem>>, %arg7: memref<8x10xf32, #tpu.memory_space<vmem>>, %arg8: memref<8x1024xf32, #tpu.memory_space<vmem>>) attributes {dimension_semantics = [#tpu.dimension_semantics<parallel>, #tpu.dimension_semantics<arbitrary>], iteration_bounds = array<i64: 1, 3>, scalar_prefetch = 0 : i64, scratch_operands = 1 : i64, tpu.core_type = #tpu.core_type<tc>, window_params = [{transform_indices = @transform_0, window_bounds = array<i64: 8, 1024>}, {transform_indices = @transform_1, window_bounds = array<i64: 1024, 1024>}, {pipeline_mode = #tpu.pipeline_mode<synchronous>, transform_indices = @transform_2, window_bounds = array<i64: 1, 1024>}, {pipeline_mode = #tpu.pipeline_mode<synchronous>, transform_indices = @transform_3, window_bounds = array<i64: 1024, 10>}, {pipeline_mode = #tpu.pipeline_mode<synchronous>, transform_indices = @transform_4, window_bounds = array<i64: 1, 10>}, {transform_indices = @transform_5, window_bounds = array<i64: 8, 10>}]} {
    %c0_i32 = arith.constant 0 : i32
    %0 = arith.cmpi eq, %arg1, %c0_i32 : i32
    %1 = arith.extui %0 : i1 to i32
    %c0_i32_0 = arith.constant 0 : i32
    %2 = arith.cmpi ne, %1, %c0_i32_0 : i32
    scf.if %2 {
      %cst_9 = arith.constant 0.000000e+00 : f32
      %12 = vector.broadcast %cst_9 : f32 to vector<8x1024xf32>
      %c0_10 = arith.constant 0 : index
      %c0_11 = arith.constant 0 : index
      %13 = vector.load %arg8[%c0_10, %c0_11] : memref<8x1024xf32, #tpu.memory_space<vmem>>, vector<8x1024xf32>
      tpu.vector_store %arg8[%c0_10, %c0_11], %12 {strides = array<i32>} : memref<8x1024xf32, #tpu.memory_space<vmem>>, vector<8x1024xf32>,
    } else {
    }
    %c0 = arith.constant 0 : index
    %c0_1 = arith.constant 0 : index
    %3 = vector.load %arg2[%c0, %c0_1] : memref<8x1024xbf16, #tpu.memory_space<vmem>>, vector<8x1024xbf16>
    %c0_2 = arith.constant 0 : index
    %c0_3 = arith.constant 0 : index
    %4 = vector.load %arg8[%c0_2, %c0_3] : memref<8x1024xf32, #tpu.memory_space<vmem>>, vector<8x1024xf32>
    %c0_4 = arith.constant 0 : index
    %c0_5 = arith.constant 0 : index
    %5 = vector.load %arg3[%c0_4, %c0_5] : memref<1024x1024xbf16, #tpu.memory_space<vmem>>, vector<1024x1024xbf16>
    %cst = arith.constant dense<0.000000e+00> : vector<8x1024xf32>
    %6 = tpu.matmul %3, %5, %cst {dimension_numbers = #tpu.dot_dimension_numbers<[1], [0], [0], [1], [0, 0, 1, 1], [], []>} : vector<8x1024xbf16>, vector<1024x1024xbf16>, vector<8x1024xf32> -> vector<8x1024xf32>
    %7 = arith.addf %4, %6 : vector<8x1024xf32>
    %c0_6 = arith.constant 0 : index
    %c0_7 = arith.constant 0 : index
    %8 = vector.load %arg8[%c0_6, %c0_7] : memref<8x1024xf32, #tpu.memory_space<vmem>>, vector<8x1024xf32>
    tpu.vector_store %arg8[%c0_6, %c0_7], %7 {strides = array<i32>} : memref<8x1024xf32, #tpu.memory_space<vmem>>, vector<8x1024xf32>,
    %c2_i32 = arith.constant 2 : i32
    %9 = arith.cmpi eq, %arg1, %c2_i32 : i32
    %10 = arith.extui %9 : i1 to i32
    %c0_i32_8 = arith.constant 0 : i32
    %11 = arith.cmpi ne, %10, %c0_i32_8 : i32
    scf.if %11 {
      %c0_9 = arith.constant 0 : index
      %c0_10 = arith.constant 0 : index
      %12 = vector.load %arg8[%c0_9, %c0_10] : memref<8x1024xf32, #tpu.memory_space<vmem>>, vector<8x1024xf32>
      %c0_11 = arith.constant 0 : index
      %c0_12 = arith.constant 0 : index
      %13 = vector.load %arg4[%c0_11, %c0_12] : memref<1x1024xf32, #tpu.memory_space<vmem>>, vector<1x1024xf32>
      %14 = vector.broadcast %13 : vector<1x1024xf32> to vector<8x1024xf32>
      %15 = arith.addf %12, %14 : vector<8x1024xf32>
      %cst_13 = arith.constant 0.000000e+00 : f32
      %16 = vector.broadcast %cst_13 : f32 to vector<8x1024xf32>
      %17 = arith.maximumf %15, %16 : vector<8x1024xf32>
      %18 = arith.truncf %17 : vector<8x1024xf32> to vector<8x1024xbf16>
      %c0_14 = arith.constant 0 : index
      %c0_15 = arith.constant 0 : index
      %19 = vector.load %arg5[%c0_14, %c0_15] : memref<1024x10xbf16, #tpu.memory_space<vmem>>, vector<1024x10xbf16>
      %cst_16 = arith.constant dense<0.000000e+00> : vector<8x10xf32>
      %20 = tpu.matmul %18, %19, %cst_16 {dimension_numbers = #tpu.dot_dimension_numbers<[1], [0], [0], [1], [0, 0, 1, 1], [], []>} : vector<8x1024xbf16>, vector<1024x10xbf16>, vector<8x10xf32> -> vector<8x10xf32>
      %c0_17 = arith.constant 0 : index
      %c0_18 = arith.constant 0 : index
      %21 = vector.load %arg6[%c0_17, %c0_18] : memref<1x10xf32, #tpu.memory_space<vmem>>, vector<1x10xf32>
      %22 = vector.broadcast %21 : vector<1x10xf32> to vector<8x10xf32>
      %23 = arith.addf %20, %22 : vector<8x10xf32>
      %c0_19 = arith.constant 0 : index
      %c0_20 = arith.constant 0 : index
      %24 = vector.load %arg7[%c0_19, %c0_20] : memref<8x10xf32, #tpu.memory_space<vmem>>, vector<8x10xf32>
      tpu.vector_store %arg7[%c0_19, %c0_20], %23 {strides = array<i32>} : memref<8x10xf32, #tpu.memory_space<vmem>>, vector<8x10xf32>,
    } else {
    }
    return
  }
  func.func @transform_0(%arg0: i32, %arg1: i32) -> (i32, i32) {
    %c0_i32 = arith.constant 0 : i32
    return %arg0, %arg1 : i32, i32
  }
  func.func @transform_1(%arg0: i32, %arg1: i32) -> (i32, i32) {
    %c0_i32 = arith.constant 0 : i32
    %c0_i32_0 = arith.constant 0 : i32
    return %arg1, %c0_i32 : i32, i32
  }
  func.func @transform_2(%arg0: i32, %arg1: i32) -> (i32, i32) {
    %c0_i32 = arith.constant 0 : i32
    %c0_i32_0 = arith.constant 0 : i32
    %c0_i32_1 = arith.constant 0 : i32
    return %c0_i32, %c0_i32_0 : i32, i32
  }
  func.func @transform_3(%arg0: i32, %arg1: i32) -> (i32, i32) {
    %c0_i32 = arith.constant 0 : i32
    %c0_i32_0 = arith.constant 0 : i32
    %c0_i32_1 = arith.constant 0 : i32
    return %c0_i32, %c0_i32_0 : i32, i32
  }
  func.func @transform_4(%arg0: i32, %arg1: i32) -> (i32, i32) {
    %c0_i32 = arith.constant 0 : i32
    %c0_i32_0 = arith.constant 0 : i32
    %c0_i32_1 = arith.constant 0 : i32
    return %c0_i32, %c0_i32_0 : i32, i32
  }
  func.func @transform_5(%arg0: i32, %arg1: i32) -> (i32, i32) {
    %c0_i32 = arith.constant 0 : i32
    %c0_i32_0 = arith.constant 0 : i32
    return %arg0, %c0_i32 : i32, i32
  }
}

</mosaic_0001>

<bundles_post_ra>
// kernel: feedforward.1
= control target key start
LH: loop header
LB: loop body
LE: loop exit
PB: predicated region body
PF: predicated region fallthrough
CT: control target
= control target key end

     0   :  { %10 = vsyncpa [#allocation4], 0  ;;  %s9742_s0 = inlined_call_operand.vmem [shape: bf16[8,3072], index: 0, kind: input, shape index: {}]   ;;  %s9743_s1 = inlined_call_operand.hbm [shape: bf16[3072,1024], index: 1, kind: input, shape index: {}]   ;;  %s9744_s2 = inlined_call_operand.hbm [shape: f32[1,1024], index: 2, kind: input, shape index: {}]   ;;  %s9745_s3 = inlined_call_operand.vmem [shape: bf16[1024,10], index: 3, kind: input, shape index: {}]   ;;  %s9746_s4 = inlined_call_operand.hbm [shape: f32[1,10], index: 4, kind: input, shape index: {}]   ;;  %s9747_s5 = inlined_call_operand.vmem [shape: f32[8,10], index: 5, kind: output, shape index: {}]  }
   0x1   :  { %12 = vsyncpa [#allocation4 + $0x1], 0 }
   0x2   :  { %13 = vsyncpa [#allocation6], 0  ;;  %s8242_s18 = smov 0   ;;  %s8244_s19 = smov 0  }
   0x3   :  { %s8246_s20 = smov 0   ;;  %s8248_s21 = smov 0  }
   0x4   :  { %s8250_s22 = smov 0   ;;  %s8252_s23 = smov 0  }
   0x5 LB: > { %s5079_s24 = sadd.s32 4294967295, %s8205_s23   ;;  %s66_s25 = sadd.s32 1, %s8193_s20  ;;  %s8205_s23 = sphi %s8252_s23, %s19_s23   ;;  %s8201_s22 = sphi %s8250_s22, %s9757_s22   ;;  %s8197_s21 = sphi %s8248_s21, %s9756_s21   ;;  %s8193_s20 = sphi %s8246_s20, %s9755_s20   ;;  %s8189_s19 = sphi %s8244_s19, %s9754_s19   ;;  %s8185_s18 = sphi %s8242_s18, %s9753_s18  }
   0x6   : > { %p73_p0 = scmp.ne.s32.totalorder %s8193_s20, %s8189_s19  ;;  %p74_p1 = scmp.eq.s32.totalorder %s8205_s23, 0 }
   0x7   : > { %p79_p2 = scmp.ne.s32.totalorder %s8189_s19, %s8185_s18  ;;  %p8276_p3 = scmp.eq.s32.totalorder %s5079_s24, 0 }
   0x8   : > { %p8280_p4 = por %p74_p1, %p73_p0  ;;  %p5080_p5 = scmp.ge.s32.totalorder %s8205_s23, 1 }
   0x9   : > { %p8287_p6 = por %p8276_p3, %p79_p2  ;;  %p179_p7 = scmp.lt.s32.totalorder %s8205_s23, 4 }
   0xa   : > { %s191_s6 = sshll.u32 %s9744_s2, 4  ;;  %s8207_s8 = smov [#allocation5]   ;;  %s192_s6 = int_to_ptr.hbm [resolvable:$true] %s191_s6 }
   0xb   : > { %p8295_p8 = pnand %p5080_p5, %p179_p7  ;;  %s193_s9 = sshll.u32 %s8207_s8, 4  ;;  %s194_s9 = int_to_ptr.vmem [resolvable:$true] %s193_s9 }
   0xc   : > { %p8004_p10 = scmp.lt.s32.totalorder %s8205_s23, 3  ;;  %s206_s12 = sshll.u32 %s9746_s4, 4  ;;  %s207_s12 = int_to_ptr.hbm [resolvable:$true] %s206_s12 }
   0xd   : > { %p7991_p9 = pneg %p8295_p8  ;;  %s8208_s14 = smov [#allocation7]  }
   0xe   : > { %p8309_p12 = pnand %p8004_p10, %p8280_p4  ;;  %s208_s15 = sshll.u32 %s8208_s14, 4  ;;  %s209_s15 = int_to_ptr.vmem [resolvable:$true] %s208_s15 }
   0xf   : > { %p7992_p11 = pnand %p7991_p9, %p8276_p3  ;;  %s232_s16 = sand.u32 1, %s8193_s20  }
  0x10   : > { %s28_s17 = sadd.s32 1, %s8201_s22  ;;  %s5084_s18 = sshll.u32 %s232_s16, 12 }
  0x11   : > { %7994 = dma.hbm_to_vmem [thread:$0]  (!%p7992_p11), %s192_s6, 128, %s194_s9, [#allocation6]  }
  0x12   : > { %7997 = dma.hbm_to_vmem [thread:$0]  (!%p7992_p11), %s207_s12, 16, %s209_s15, [#allocation6]  }
  0x13   : > { %p29_p13 = scmp.ge.s32.totalorder %s28_s17, 3  ;;  %s7404_s24 = sshll.u32 %s8201_s22, 12 }
  0x14   : > { %s242_s30 = scalar_lea.hbm %s9743_s1, %s7404_s24  ;;  %s236_s6 = scalar_lea.vmem [#allocation3], %s5084_s18 }
  0x15   : > { %s9759_s17 = smov (%p29_p13, %s28_s17), 0  ;;  %s245_s8 = sshll.u32 %s236_s6, 4  ;;  %s246_s8 = int_to_ptr.vmem [resolvable:$true] %s245_s8 }
  0x16   : > { %s63_s9 = ssub.s32 %s8201_s22, %s9759_s17  ;;  %s243_s10 = sshll.u32 %s242_s30, 4  ;;  %s244_s10 = int_to_ptr.hbm [resolvable:$true] %s243_s10 }
  0x17   : > { %p64_p0 = scmp.eq.s32.totalorder %s63_s9, 0  ;;  %s233_s12 = scalar_lea.sflag [#allocation4], %s232_s16 }
  0x18   : > { %s8209_s14 = smov 512   ;;  %s8210_s15 = smov 32  }
  0x19   : > { %s8326_s11 = scalar_select %p64_p0, %s8193_s20, %s66_s25  }
  0x1a   : > { %8001 = dma.hbm_to_vmem [thread:$0]  (!%p8309_p12), %s244_s10, 65536, %s246_s8, %s233_s12, %s8209_s14, %s8209_s14, %s8210_s15  }
  0x1b   : > { %257 = sbr.rel (%p8295_p8) target bundleno = 1176 (0x498), region = 40  ;;  %s259_s18 = sand.u32 (!%p8295_p8), 1, %s8189_s19  }
  0x1c   : > { %s5089_s24 = sshll.u32 (!%p8295_p8), %s259_s18, 12  ;;  %s260_s27 = scalar_lea.sflag (!%p8295_p8), [#allocation4], %s259_s18 }
  0x1d   : > { %s8333_s29 = scalar_lea.vmem (!%p8295_p8), [#allocation3], %s5089_s24 }
  0x20   : > { %8176 = dma.done.wait (%p8287_p6), %s260_s27, 65536  }
  0x21   : > { %8178 = vsyncadd (%p8287_p6), %s260_s27, 4294901760 }
  0x22   : > { %8180 = dma.done.wait (%p8276_p3), [#allocation6], 144  }
  0x23   : > { %8182 = vsyncadd (%p8276_p3), [#allocation6], 4294967152  ;;  %s5092_s25 = sshll.u32 %s8197_s21, 3  ;;  %p5094_p2 = scmp.ne.s32.totalorder %s8197_s21, 0 }
  0x24   : > { %p312_p1 = scmp.lt.s32.totalorder %s5092_s25, 23 }
  0x25   : > { %327 = sbr.rel (%p5094_p2) target bundleno = 51 (0x33), region = 56 }
  0x26   : > { %s9761_s25 = smov (!%p312_p1, %s5092_s25), 23 }
  0x27   : > { %s5093_s7 = sshll.u32 %s9761_s25, 2 }
  0x28   : > { %s8347_s30 = scalar_lea.vmem %s9742_s0, %s5093_s7 }
  0x2a   : > { %v8211_v0 = vmov 0.0  }
  0x2b   : > { %328 = vst [vmem:[#allocation2 + $0x30] sm:$0xff] %v8211_v0 }
  0x2c   : > { %329 = vst [vmem:[#allocation2] sm:$0xff] %v8211_v0 }
  0x2d   : > { %330 = vst [vmem:[#allocation2 + $0x18] sm:$0xff] %v8211_v0 }
  0x2e   : > { %331 = vst [vmem:[#allocation2 + $0x10] sm:$0xff] %v8211_v0 }
  0x2f   : > { %332 = vst [vmem:[#allocation2 + $0x8] sm:$0xff] %v8211_v0 }
  0x30   : > { %333 = vst [vmem:[#allocation2 + $0x20] sm:$0xff] %v8211_v0 }
  0x31   : > { %334 = vst [vmem:[#allocation2 + $0x28] sm:$0xff] %v8211_v0 }
  0x32   : > { %335 = vst [vmem:[#allocation2 + $0x38] sm:$0xff] %v8211_v0 }
  0x33 PF: > { %v5321_v1 = vld [vmem:[%s8333_s29 + $0x1c0] sm:$0xf]  ;;  %p7143_p3 = scmp.ne.s32.totalorder %s8197_s21, 2 }
  0x34   : > { %v7465_v2 = vld [vmem:[%s8333_s29 + $0x1dc] sm:$0xf0] }
  0x35   : > { %v5577_v3 = vld [vmem:[%s8333_s29 + $0x3c0] sm:$0xf]  ;;  %v5322_v4 = vor.u32 %v7465_v2, %v5321_v1 }
  0x36   : > { %v7529_v5 = vld [vmem:[%s8333_s29 + $0x3dc] sm:$0xf0] }
  0x37   : > { %v5833_v6 = vld [vmem:[%s8333_s29 + $0x5c0] sm:$0xf]  ;;  %v5578_v8 = vor.u32 %v7529_v5, %v5577_v3  ;;  %3448 = vmatpush.bf16.msra.mxu0 %v5322_v4 }
  0x38   : > { %v7593_v7 = vld [vmem:[%s8333_s29 + $0x5dc] sm:$0xf0] }
  0x39   : > { %v5834_v9 = vor.u32 %v7593_v7, %v5833_v6  ;;  %v6089_v10 = vld [vmem:[%s8333_s29 + $0x7c0] sm:$0xf]  ;;  %3461 = vmatpush.bf16.msra.mxu1 %v5578_v8 }
  0x3a   : > { %v7657_v11 = vld [vmem:[%s8333_s29 + $0x7dc] sm:$0xf0] }
  0x3b   : > { %v5289_v12 = vld [vmem:[%s8333_s29 + $0x180] sm:$0xf]  ;;  %v6090_v13 = vor.u32 %v7657_v11, %v6089_v10  ;;  %3474 = vmatpush.bf16.msra.mxu2 %v5834_v9 }
  0x3c   : > { %v7457_v14 = vld [vmem:[%s8333_s29 + $0x19c] sm:$0xf0] }
  0x3d   : > { %v5545_v15 = vld [vmem:[%s8333_s29 + $0x380] sm:$0xf]  ;;  %v5290_v17 = vor.u32 %v7457_v14, %v5289_v12  ;;  %3487 = vmatpush.bf16.msra.mxu3 %v6090_v13 }
  0x3e   : > { %v7521_v16 = vld [vmem:[%s8333_s29 + $0x39c] sm:$0xf0] }
  0x3f   : > { %v5546_v18 = vor.u32 %v7521_v16, %v5545_v15  ;;  %v5801_v19 = vld [vmem:[%s8333_s29 + $0x580] sm:$0xf]  ;;  %3449 = vmatpush.bf16.msra.mxu0 %v5290_v17 }
  0x40   : > { %v7585_v20 = vld [vmem:[%s8333_s29 + $0x59c] sm:$0xf0] }
  0x41   : > { %v6057_v21 = vld [vmem:[%s8333_s29 + $0x780] sm:$0xf]  ;;  %v5802_v22 = vor.u32 %v7585_v20, %v5801_v19  ;;  %3462 = vmatpush.bf16.msra.mxu1 %v5546_v18 }
  0x42   : > { %v7649_v23 = vld [vmem:[%s8333_s29 + $0x79c] sm:$0xf0] }
  0x43   : > { %v5257_v24 = vld [vmem:[%s8333_s29 + $0x140] sm:$0xf]  ;;  %v6058_v26 = vor.u32 %v7649_v23, %v6057_v21  ;;  %3475 = vmatpush.bf16.msra.mxu2 %v5802_v22 }
  0x44   : > { %v7449_v25 = vld [vmem:[%s8333_s29 + $0x15c] sm:$0xf0] }
  0x45   : > { %v5513_v27 = vld [vmem:[%s8333_s29 + $0x340] sm:$0xf]  ;;  %v5258_v30 = vor.u32 %v7449_v25, %v5257_v24  ;;  %3488 = vmatpush.bf16.msra.mxu3 %v6058_v26 }
  0x46   : > { %v7513_v28 = vld [vmem:[%s8333_s29 + $0x35c] sm:$0xf0] }
  0x47   : > { %v5769_v29 = vld [vmem:[%s8333_s29 + $0x540] sm:$0xf]  ;;  %v5514_v34 = vor.u32 %v7513_v28, %v5513_v27  ;;  %3450 = vmatpush.bf16.msra.mxu0 %v5258_v30 }
  0x48   : > { %v7577_v31 = vld [vmem:[%s8333_s29 + $0x55c] sm:$0xf0] }
  0x49   : > { %v6025_v32 = vld [vmem:[%s8333_s29 + $0x740] sm:$0xf]  ;;  %v5770_v35 = vor.u32 %v7577_v31, %v5769_v29  ;;  %3463 = vmatpush.bf16.msra.mxu1 %v5514_v34 }
  0x4a   : > { %v7641_v33 = vld [vmem:[%s8333_s29 + $0x75c] sm:$0xf0] }
  0x4b   : > { %v5225_v36 = vld [vmem:[%s8333_s29 + $0x100] sm:$0xf]  ;;  %v6026_v39 = vor.u32 %v7641_v33, %v6025_v32  ;;  %3476 = vmatpush.bf16.msra.mxu2 %v5770_v35 }
  0x4c   : > { %v7441_v37 = vld [vmem:[%s8333_s29 + $0x11c] sm:$0xf0] }
  0x4d   : > { %v5481_v38 = vld [vmem:[%s8333_s29 + $0x300] sm:$0xf]  ;;  %v5226_v45 = vor.u32 %v7441_v37, %v5225_v36  ;;  %3489 = vmatpush.bf16.msra.mxu3 %v6026_v39 }
  0x4e   : > { %v7505_v40 = vld [vmem:[%s8333_s29 + $0x31c] sm:$0xf0] }
  0x4f   : > { %v5737_v41 = vld [vmem:[%s8333_s29 + $0x500] sm:$0xf]  ;;  %v5482_v46 = vor.u32 %v7505_v40, %v5481_v38  ;;  %3451 = vmatpush.bf16.msra.mxu0 %v5226_v45 }
  0x50   : > { %v7569_v42 = vld [vmem:[%s8333_s29 + $0x51c] sm:$0xf0] }
  0x51   : > { %v5993_v43 = vld [vmem:[%s8333_s29 + $0x700] sm:$0xf]  ;;  %v5738_v47 = vor.u32 %v7569_v42, %v5737_v41  ;;  %3464 = vmatpush.bf16.msra.mxu1 %v5482_v46 }
  0x52   : > { %v7633_v44 = vld [vmem:[%s8333_s29 + $0x71c] sm:$0xf0] }
  0x53   : > { %v5193_v48 = vld [vmem:[%s8333_s29 + $0xc0] sm:$0xf]  ;;  %v5994_v51 = vor.u32 %v7633_v44, %v5993_v43  ;;  %3477 = vmatpush.bf16.msra.mxu2 %v5738_v47 }
  0x54   : > { %v7433_v49 = vld [vmem:[%s8333_s29 + $0xdc] sm:$0xf0] }
  0x55   : > { %v5449_v50 = vld [vmem:[%s8333_s29 + $0x2c0] sm:$0xf]  ;;  %v5194_v57 = vor.u32 %v7433_v49, %v5193_v48  ;;  %3490 = vmatpush.bf16.msra.mxu3 %v5994_v51 }
  0x56   : > { %v7497_v52 = vld [vmem:[%s8333_s29 + $0x2dc] sm:$0xf0] }
  0x57   : > { %v5705_v53 = vld [vmem:[%s8333_s29 + $0x4c0] sm:$0xf]  ;;  %v5450_v58 = vor.u32 %v7497_v52, %v5449_v50  ;;  %3452 = vmatpush.bf16.msra.mxu0 %v5194_v57 }
  0x58   : > { %v7561_v54 = vld [vmem:[%s8333_s29 + $0x4dc] sm:$0xf0] }
  0x59   : > { %v5961_v55 = vld [vmem:[%s8333_s29 + $0x6c0] sm:$0xf]  ;;  %v5706_v59 = vor.u32 %v7561_v54, %v5705_v53  ;;  %3465 = vmatpush.bf16.msra.mxu1 %v5450_v58 }
  0x5a   : > { %v7625_v56 = vld [vmem:[%s8333_s29 + $0x6dc] sm:$0xf0] }
  0x5b   : > { %v5161_v60 = vld [vmem:[%s8333_s29 + $0x80] sm:$0xf]  ;;  %v5962_v63 = vor.u32 %v7625_v56, %v5961_v55  ;;  %3478 = vmatpush.bf16.msra.mxu2 %v5706_v59  ;;  %v337_v59 = vld [vmem:[%s8347_s30 + $0x8] sm:$0xff] }
  0x5c   : > { %v7425_v61 = vld [vmem:[%s8333_s29 + $0x9c] sm:$0xf0] }
  0x5d   : > { %v5417_v62 = vld [vmem:[%s8333_s29 + $0x280] sm:$0xf]  ;;  %v5162_v5 = vor.u32 %v7425_v61, %v5161_v60  ;;  %3491 = vmatpush.bf16.msra.mxu3 %v5962_v63 }
  0x5e   : > { %v7489_v0 = vld [vmem:[%s8333_s29 + $0x29c] sm:$0xf0] }
  0x5f   : > { %v5673_v1 = vld [vmem:[%s8333_s29 + $0x480] sm:$0xf]  ;;  %v5418_v6 = vor.u32 %v7489_v0, %v5417_v62  ;;  %3453 = vmatpush.bf16.msra.mxu0 %v5162_v5  ;;  %v866_v0 = vunpack.c.l.b16 %v337_v59 }
  0x60   : > { %v7553_v2 = vld [vmem:[%s8333_s29 + $0x49c] sm:$0xf0] }
  0x61   : > { %v5929_v3 = vld [vmem:[%s8333_s29 + $0x680] sm:$0xf]  ;;  %v5674_v7 = vor.u32 %v7553_v2, %v5673_v1  ;;  %3466 = vmatpush.bf16.msra.mxu1 %v5418_v6  ;;  %v867_v1 = vunpack.c.h.b16 %v337_v59  ;;  %v8439_v5 = vpack.c.b16 %v866_v0, %v866_v0 }
  0x62   : > { %v7617_v4 = vld [vmem:[%s8333_s29 + $0x69c] sm:$0xf0] }
  0x63   : > { %v5129_v8 = vld [vmem:[%s8333_s29 + $0x40] sm:$0xf]  ;;  %v5930_v11 = vor.u32 %v7617_v4, %v5929_v3  ;;  %3479 = vmatpush.bf16.msra.mxu2 %v5674_v7  ;;  %v8442_v7 = vpack.c.b16 %v867_v1, %v867_v1 }
  0x64   : > { %v7417_v9 = vld [vmem:[%s8333_s29 + $0x5c] sm:$0xf0] }
  0x65   : > { %v5385_v10 = vld [vmem:[%s8333_s29 + $0x240] sm:$0xf]  ;;  %v5130_v17 = vor.u32 %v7417_v9, %v5129_v8  ;;  %3492 = vmatpush.bf16.msra.mxu3 %v5930_v11 }
  0x66   : > { %v7481_v12 = vld [vmem:[%s8333_s29 + $0x25c] sm:$0xf0] }
  0x67   : > { %v5641_v13 = vld [vmem:[%s8333_s29 + $0x440] sm:$0xf]  ;;  %v5386_v20 = vor.u32 %v7481_v12, %v5385_v10  ;;  %3454 = vmatpush.bf16.msra.mxu0 %v5130_v17 }
  0x68   : > { %v7545_v14 = vld [vmem:[%s8333_s29 + $0x45c] sm:$0xf0] }
  0x69   : > { %v5897_v15 = vld [vmem:[%s8333_s29 + $0x640] sm:$0xf]  ;;  %v5642_v21 = vor.u32 %v7545_v14, %v5641_v13  ;;  %3467 = vmatpush.bf16.msra.mxu1 %v5386_v20 }
  0x6a   : > { %v7609_v16 = vld [vmem:[%s8333_s29 + $0x65c] sm:$0xf0] }
  0x6b   : > { %v5097_v18 = vld [vmem:[%s8333_s29] sm:$0xf]  ;;  %v5898_v25 = vor.u32 %v7609_v16, %v5897_v15  ;;  %3480 = vmatpush.bf16.msra.mxu2 %v5642_v21 }
  0x6c   : > { %v7409_v19 = vld [vmem:[%s8333_s29 + $0x1c] sm:$0xf0] }
  0x6d   : > { %v5353_v22 = vld [vmem:[%s8333_s29 + $0x200] sm:$0xf]  ;;  %v5098_v32 = vor.u32 %v7409_v19, %v5097_v18  ;;  %3493 = vmatpush.bf16.msra.mxu3 %v5898_v25 }
  0x6e   : > { %v7473_v23 = vld [vmem:[%s8333_s29 + $0x21c] sm:$0xf0] }
  0x6f   : > { %v5609_v24 = vld [vmem:[%s8333_s29 + $0x400] sm:$0xf]  ;;  %v5354_v36 = vor.u32 %v7473_v23, %v5353_v22  ;;  %3455 = vmatpush.bf16.msra.mxu0 %v5098_v32 }
  0x70   : > { %v7537_v26 = vld [vmem:[%s8333_s29 + $0x41c] sm:$0xf0] }
  0x71   : > { %v5865_v27 = vld [vmem:[%s8333_s29 + $0x600] sm:$0xf]  ;;  %v5610_v37 = vor.u32 %v7537_v26, %v5609_v24  ;;  %3468 = vmatpush.bf16.msra.mxu1 %v5354_v36 }
  0x72   : > { %v7601_v28 = vld [vmem:[%s8333_s29 + $0x61c] sm:$0xf0] }
  0x73   : > { %v6345_v29 = vld [vmem:[%s8333_s29 + $0x9c0] sm:$0xf]  ;;  %v5866_v40 = vor.u32 %v7601_v28, %v5865_v27  ;;  %3481 = vmatpush.bf16.msra.mxu2 %v5610_v37 }
  0x74   : > { %v7721_v30 = vld [vmem:[%s8333_s29 + $0x9dc] sm:$0xf0] }
  0x75   : > { %v6601_v31 = vld [vmem:[%s8333_s29 + $0xbc0] sm:$0xf]  ;;  %v6346_v41 = vor.u32 %v7721_v30, %v6345_v29  ;;  %3494 = vmatpush.bf16.msra.mxu3 %v5866_v40 }
  0x76   : > { %v7785_v33 = vld [vmem:[%s8333_s29 + $0xbdc] sm:$0xf0]  ;;  %3482 = vmatmul.bf16.vlgmr.msra.gmra.mxu2 %v8439_v5 }
  0x77   : > { %v6857_v34 = vld [vmem:[%s8333_s29 + $0xdc0] sm:$0xf]  ;;  %v6602_v42 = vor.u32 %v7785_v33, %v6601_v31  ;;  %3500 = vmatpush.bf16.msrb.mxu0 %v6346_v41 }
  0x78   : > { %v7849_v35 = vld [vmem:[%s8333_s29 + $0xddc] sm:$0xf0]  ;;  %3495 = vmatmul.bf16.vlgmr.msra.gmra.mxu3 %v8442_v7 }
  0x79   : > { %v7113_v38 = vld [vmem:[%s8333_s29 + $0xfc0] sm:$0xf]  ;;  %v6858_v43 = vor.u32 %v7849_v35, %v6857_v34  ;;  %3513 = vmatpush.bf16.msrb.mxu1 %v6602_v42 }
  0x7a   : > { %v7913_v39 = vld [vmem:[%s8333_s29 + $0xfdc] sm:$0xf0] }
  0x7b   : > { %v6313_v44 = vld [vmem:[%s8333_s29 + $0x980] sm:$0xf]  ;;  %v7114_v47 = vor.u32 %v7913_v39, %v7113_v38  ;;  %3526 = vmatpush.bf16.msrb.mxu2 %v6858_v43 }
  0x7c   : > { %v7713_v45 = vld [vmem:[%s8333_s29 + $0x99c] sm:$0xf0] }
  0x7d   : > { %v6569_v46 = vld [vmem:[%s8333_s29 + $0xb80] sm:$0xf]  ;;  %v6314_v53 = vor.u32 %v7713_v45, %v6313_v44  ;;  %3539 = vmatpush.bf16.msrb.mxu3 %v7114_v47 }
  0x7e   : > { %v7777_v48 = vld [vmem:[%s8333_s29 + $0xb9c] sm:$0xf0] }
  0x7f   : > { %v6825_v49 = vld [vmem:[%s8333_s29 + $0xd80] sm:$0xf]  ;;  %v6570_v55 = vor.u32 %v7777_v48, %v6569_v46  ;;  %3501 = vmatpush.bf16.msrb.mxu0 %v6314_v53 }
  0x80   : > { %v7841_v50 = vld [vmem:[%s8333_s29 + $0xd9c] sm:$0xf0] }
  0x81   : > { %v7081_v51 = vld [vmem:[%s8333_s29 + $0xf80] sm:$0xf]  ;;  %v6826_v56 = vor.u32 %v7841_v50, %v6825_v49  ;;  %3514 = vmatpush.bf16.msrb.mxu1 %v6570_v55 }
  0x82   : > { %v7905_v52 = vld [vmem:[%s8333_s29 + $0xf9c] sm:$0xf0] }
  0x83   : > { %v6281_v54 = vld [vmem:[%s8333_s29 + $0x940] sm:$0xf]  ;;  %v7082_v60 = vor.u32 %v7905_v52, %v7081_v51  ;;  %3527 = vmatpush.bf16.msrb.mxu2 %v6826_v56 }
  0x84   : > { %v7705_v57 = vld [vmem:[%s8333_s29 + $0x95c] sm:$0xf0] }
  0x85   : > { %v6537_v58 = vld [vmem:[%s8333_s29 + $0xb40] sm:$0xf]  ;;  %v6282_v4 = vor.u32 %v7705_v57, %v6281_v54  ;;  %3540 = vmatpush.bf16.msrb.mxu3 %v7082_v60 }
  0x86   : > { %v7769_v61 = vld [vmem:[%s8333_s29 + $0xb5c] sm:$0xf0] }
  0x87   : > { %v6793_v62 = vld [vmem:[%s8333_s29 + $0xd40] sm:$0xf]  ;;  %v6538_v8 = vor.u32 %v7769_v61, %v6537_v58  ;;  %3502 = vmatpush.bf16.msrb.mxu0 %v6282_v4  ;;  %v339_v4 = vld [vmem:[%s8347_s30 + $0x18] sm:$0xff] }
  0x88   : > { %v7833_v63 = vld [vmem:[%s8333_s29 + $0xd5c] sm:$0xf0] }
  0x89   : > { %v7049_v2 = vld [vmem:[%s8333_s29 + $0xf40] sm:$0xf]  ;;  %v6794_v9 = vor.u32 %v7833_v63, %v6793_v62  ;;  %3515 = vmatpush.bf16.msrb.mxu1 %v6538_v8 }
  0x8a   : > { %v7897_v3 = vld [vmem:[%s8333_s29 + $0xf5c] sm:$0xf0] }
  0x8b   : > { %v336_v6 = vld [vmem:[%s8347_s30] sm:$0xff]  ;;  %v7050_v15 = vor.u32 %v7897_v3, %v7049_v2  ;;  %3528 = vmatpush.bf16.msrb.mxu2 %v6794_v9 }
  0x8c   : > { %v6249_v10 = vld [vmem:[%s8333_s29 + $0x900] sm:$0xf]  ;;  %v864_v13 = vunpack.c.l.b16 %v336_v6  ;;  %v865_v14 = vunpack.c.h.b16 %v336_v6 }
  0x8d   : > { %v7697_v11 = vld [vmem:[%s8333_s29 + $0x91c] sm:$0xf0]  ;;  %3541 = vmatpush.bf16.msrb.mxu3 %v7050_v15  ;;  %v5579_v15 = vld [vmem:[%s8333_s29 + $0x3e0] sm:$0xf0] }
  0x8e   : > { %v6505_v12 = vld [vmem:[%s8333_s29 + $0xb00] sm:$0xf]  ;;  %v8453_v21 = vpack.c.b16 %v864_v13, %v864_v13  ;;  %v8456_v22 = vpack.c.b16 %v865_v14, %v865_v14  ;;  %v6250_v23 = vor.u32 %v7697_v11, %v6249_v10  ;;  %v338_v10 = vld [vmem:[%s8347_s30 + $0x10] sm:$0xff]  ;;  %v7461_v11 = vld [vmem:[%s8333_s29 + $0x1c4] sm:$0xf] }
  0x8f   : > { %v7761_v16 = vld [vmem:[%s8333_s29 + $0xb1c] sm:$0xf0]  ;;  %v7525_v13 = vld [vmem:[%s8333_s29 + $0x3c4] sm:$0xf] }
  0x90   : > { %v6761_v17 = vld [vmem:[%s8333_s29 + $0xd00] sm:$0xf]  ;;  %v6506_v24 = vor.u32 %v7761_v16, %v6505_v12  ;;  %3456 = vmatmul.bf16.vlgmr.msra.gmra.mxu0 %v8453_v21  ;;  %3469 = vmatmul.bf16.vlgmr.msra.gmra.mxu1 %v8456_v22  ;;  %v5323_v12 = vld [vmem:[%s8333_s29 + $0x1e0] sm:$0xf0] }
  0x91   : > { %v7825_v18 = vld [vmem:[%s8333_s29 + $0xd1c] sm:$0xf0]  ;;  %3503 = vmatpush.bf16.msrb.mxu0 %v6250_v23  ;;  %v7589_v16 = vld [vmem:[%s8333_s29 + $0x5c4] sm:$0xf] }
  0x92   : > { %v7017_v19 = vld [vmem:[%s8333_s29 + $0xf00] sm:$0xf]  ;;  %v6762_v25 = vor.u32 %v7825_v18, %v6761_v17  ;;  %3516 = vmatpush.bf16.msrb.mxu1 %v6506_v24  ;;  %v5835_v17 = vld [vmem:[%s8333_s29 + $0x5e0] sm:$0xf0]  ;;  %v870_v18 = vunpack.c.l.b16 %v339_v4 }
  0x93   : > { %v7889_v20 = vld [vmem:[%s8333_s29 + $0xf1c] sm:$0xf0]  ;;  %v7653_v23 = vld [vmem:[%s8333_s29 + $0x7c4] sm:$0xf] }
  0x94   : > { %v6217_v26 = vld [vmem:[%s8333_s29 + $0x8c0] sm:$0xf]  ;;  %v7018_v29 = vor.u32 %v7889_v20, %v7017_v19  ;;  %3529 = vmatpush.bf16.msrb.mxu2 %v6762_v25  ;;  %v6091_v24 = vld [vmem:[%s8333_s29 + $0x7e0] sm:$0xf0]  ;;  %v868_v25 = vunpack.c.l.b16 %v338_v10 }
  0x95   : > { %v7689_v27 = vld [vmem:[%s8333_s29 + $0x8dc] sm:$0xf0] }
  0x96   : > { %v6473_v28 = vld [vmem:[%s8333_s29 + $0xac0] sm:$0xf]  ;;  %v6218_v35 = vor.u32 %v7689_v27, %v6217_v26  ;;  %3542 = vmatpush.bf16.msrb.mxu3 %v7018_v29  ;;  %v871_v26 = vunpack.c.h.b16 %v339_v4  ;;  %v869_v29 = vunpack.c.h.b16 %v338_v10  ;;  %v5995_v4 = vld [vmem:[%s8333_s29 + $0x720] sm:$0xf0] }
  0x97   : > { %v7753_v30 = vld [vmem:[%s8333_s29 + $0xadc] sm:$0xf0]  ;;  %v7429_v10 = vld [vmem:[%s8333_s29 + $0xc4] sm:$0xf] }
  0x98   : > { %v6729_v31 = vld [vmem:[%s8333_s29 + $0xcc0] sm:$0xf]  ;;  %v6474_v36 = vor.u32 %v7753_v30, %v6473_v28  ;;  %3504 = vmatpush.bf16.msrb.mxu0 %v6218_v35  ;;  %v5326_v28 = vor.u32 %v7461_v11, %v5323_v12  ;;  %v5582_v30 = vor.u32 %v7525_v13, %v5579_v15  ;;  %v6094_v35 = vor.u32 %v7653_v23, %v6091_v24  ;;  %v5195_v11 = vld [vmem:[%s8333_s29 + $0xe0] sm:$0xf0] }
  0x99   : > { %v7817_v32 = vld [vmem:[%s8333_s29 + $0xcdc] sm:$0xf0]  ;;  %v7493_v12 = vld [vmem:[%s8333_s29 + $0x2c4] sm:$0xf] }
  0x9a   : > { %v6985_v33 = vld [vmem:[%s8333_s29 + $0xec0] sm:$0xf]  ;;  %v6730_v37 = vor.u32 %v7817_v32, %v6729_v31  ;;  %3517 = vmatpush.bf16.msrb.mxu1 %v6474_v36  ;;  %v5838_v31 = vor.u32 %v7589_v16, %v5835_v17  ;;  %v7453_v32 = vld [vmem:[%s8333_s29 + $0x184] sm:$0xf] }
  0x9b   : > { %v7881_v34 = vld [vmem:[%s8333_s29 + $0xedc] sm:$0xf0]  ;;  %v5547_v36 = vld [vmem:[%s8333_s29 + $0x3a0] sm:$0xf0] }
  0x9c   : > { %v6185_v38 = vld [vmem:[%s8333_s29 + $0x880] sm:$0xf]  ;;  %v6986_v41 = vor.u32 %v7881_v34, %v6985_v33  ;;  %3530 = vmatpush.bf16.msrb.mxu2 %v6730_v37  ;;  %v5291_v33 = vld [vmem:[%s8333_s29 + $0x1a0] sm:$0xf0] }
  0x9d   : > { %v7681_v39 = vld [vmem:[%s8333_s29 + $0x89c] sm:$0xf0]  ;;  %v7517_v34 = vld [vmem:[%s8333_s29 + $0x384] sm:$0xf] }
  0x9e   : > { %v6441_v40 = vld [vmem:[%s8333_s29 + $0xa80] sm:$0xf]  ;;  %v6186_v47 = vor.u32 %v7681_v39, %v6185_v38  ;;  %3543 = vmatpush.bf16.msrb.mxu3 %v6986_v41  ;;  %v7581_v37 = vld [vmem:[%s8333_s29 + $0x584] sm:$0xf]  ;;  %v8508_v39 = vpack.c.b16 %v870_v18, %v870_v18 }
  0x9f   : > { %v7745_v42 = vld [vmem:[%s8333_s29 + $0xa9c] sm:$0xf0]  ;;  %v5803_v38 = vld [vmem:[%s8333_s29 + $0x5a0] sm:$0xf0] }
  0xa0   : > { %v6697_v43 = vld [vmem:[%s8333_s29 + $0xc80] sm:$0xf]  ;;  %v6442_v48 = vor.u32 %v7745_v42, %v6441_v40  ;;  %3505 = vmatpush.bf16.msrb.mxu0 %v6186_v47  ;;  %v7645_v40 = vld [vmem:[%s8333_s29 + $0x784] sm:$0xf]  ;;  %v8512_v42 = vpack.c.b16 %v868_v25, %v868_v25  ;;  %v5806_v47 = vor.u32 %v7581_v37, %v5803_v38 }
  0xa1   : > { %v7809_v44 = vld [vmem:[%s8333_s29 + $0xc9c] sm:$0xf0]  ;;  %v6059_v41 = vld [vmem:[%s8333_s29 + $0x7a0] sm:$0xf0] }
  0xa2   : > { %v6953_v45 = vld [vmem:[%s8333_s29 + $0xe80] sm:$0xf]  ;;  %v6698_v49 = vor.u32 %v7809_v44, %v6697_v43  ;;  %3518 = vmatpush.bf16.msrb.mxu1 %v6442_v48  ;;  %v8514_v43 = vpack.c.b16 %v871_v26, %v871_v26  ;;  %v5294_v44 = vor.u32 %v7453_v32, %v5291_v33  ;;  %v7445_v48 = vld [vmem:[%s8333_s29 + $0x144] sm:$0xf] }
  0xa3   : > { %v7873_v46 = vld [vmem:[%s8333_s29 + $0xe9c] sm:$0xf0]  ;;  %v7557_v15 = vld [vmem:[%s8333_s29 + $0x4c4] sm:$0xf] }
  0xa4   : > { %v6153_v50 = vld [vmem:[%s8333_s29 + $0x840] sm:$0xf]  ;;  %v6954_v53 = vor.u32 %v7873_v46, %v6953_v45  ;;  %3531 = vmatpush.bf16.msrb.mxu2 %v6698_v49  ;;  %v8516_v45 = vpack.c.b16 %v869_v29, %v869_v29  ;;  %v5550_v46 = vor.u32 %v7517_v34, %v5547_v36  ;;  %v5259_v49 = vld [vmem:[%s8333_s29 + $0x160] sm:$0xf0] }
  0xa5   : > { %v7673_v51 = vld [vmem:[%s8333_s29 + $0x85c] sm:$0xf0]  ;;  %v5707_v16 = vld [vmem:[%s8333_s29 + $0x4e0] sm:$0xf0] }
  0xa6   : > { %v6409_v52 = vld [vmem:[%s8333_s29 + $0xa40] sm:$0xf]  ;;  %v6154_v60 = vor.u32 %v7673_v51, %v6153_v50  ;;  %3544 = vmatpush.bf16.msrb.mxu3 %v6954_v53  ;;  %v7509_v50 = vld [vmem:[%s8333_s29 + $0x344] sm:$0xf]  ;;  %v6062_v51 = vor.u32 %v7645_v40, %v6059_v41  ;;  %v5710_v23 = vor.u32 %v7557_v15, %v5707_v16 }
  0xa7   : > { %v7737_v54 = vld [vmem:[%s8333_s29 + $0xa5c] sm:$0xf0]  ;;  %v7573_v53 = vld [vmem:[%s8333_s29 + $0x544] sm:$0xf] }
  0xa8   : > { %v6665_v55 = vld [vmem:[%s8333_s29 + $0xc40] sm:$0xf]  ;;  %v6410_v0 = vor.u32 %v7737_v54, %v6409_v52  ;;  %3506 = vmatpush.bf16.msrb.mxu0 %v6154_v60  ;;  %v5515_v52 = vld [vmem:[%s8333_s29 + $0x360] sm:$0xf0] }
  0xa9   : > { %v7801_v56 = vld [vmem:[%s8333_s29 + $0xc5c] sm:$0xf0]  ;;  %v5771_v54 = vld [vmem:[%s8333_s29 + $0x560] sm:$0xf0] }
  0xaa   : > { %v6921_v57 = vld [vmem:[%s8333_s29 + $0xe40] sm:$0xf]  ;;  %v6666_v1 = vor.u32 %v7801_v56, %v6665_v55  ;;  %3519 = vmatpush.bf16.msrb.mxu1 %v6410_v0  ;;  %v7637_v55 = vld [vmem:[%s8333_s29 + $0x744] sm:$0xf] }
  0xab   : > { %v7865_v58 = vld [vmem:[%s8333_s29 + $0xe5c] sm:$0xf0]  ;;  %v6027_v56 = vld [vmem:[%s8333_s29 + $0x760] sm:$0xf0] }
  0xac   : > { %v6121_v59 = vld [vmem:[%s8333_s29 + $0x800] sm:$0xf]  ;;  %v6922_v6 = vor.u32 %v7865_v58, %v6921_v57  ;;  %3532 = vmatpush.bf16.msrb.mxu2 %v6666_v1  ;;  %v5262_v57 = vor.u32 %v7445_v48, %v5259_v49  ;;  %v5518_v58 = vor.u32 %v7509_v50, %v5515_v52  ;;  %v7437_v60 = vld [vmem:[%s8333_s29 + $0x104] sm:$0xf] }
  0xad   : > { %v7665_v61 = vld [vmem:[%s8333_s29 + $0x81c] sm:$0xf0]  ;;  %v5483_v0 = vld [vmem:[%s8333_s29 + $0x320] sm:$0xf0] }
  0xae   : > { %v6377_v62 = vld [vmem:[%s8333_s29 + $0xa00] sm:$0xf]  ;;  %v6122_v14 = vor.u32 %v7665_v61, %v6121_v59  ;;  %3545 = vmatpush.bf16.msrb.mxu3 %v6922_v6  ;;  %v5774_v59 = vor.u32 %v7573_v53, %v5771_v54  ;;  %v5227_v61 = vld [vmem:[%s8333_s29 + $0x120] sm:$0xf0] }
  0xaf   : > { %v7729_v63 = vld [vmem:[%s8333_s29 + $0xa1c] sm:$0xf0]  ;;  %v7565_v1 = vld [vmem:[%s8333_s29 + $0x504] sm:$0xf]  ;;  %v5230_v6 = vor.u32 %v7437_v60, %v5227_v61 }
  0xb0   : > { %v6633_v2 = vld [vmem:[%s8333_s29 + $0xc00] sm:$0xf]  ;;  %v6378_v19 = vor.u32 %v7729_v63, %v6377_v62  ;;  %3507 = vmatpush.bf16.msrb.mxu0 %v6122_v14  ;;  %v7501_v62 = vld [vmem:[%s8333_s29 + $0x304] sm:$0xf]  ;;  %v6030_v63 = vor.u32 %v7637_v55, %v6027_v56 }
  0xb1   : > { %v7793_v3 = vld [vmem:[%s8333_s29 + $0xc1c] sm:$0xf0]  ;;  %v5451_v14 = vld [vmem:[%s8333_s29 + $0x2e0] sm:$0xf0] }
  0xb2   : > { %v6889_v8 = vld [vmem:[%s8333_s29 + $0xe00] sm:$0xf]  ;;  %v6634_v20 = vor.u32 %v7793_v3, %v6633_v2  ;;  %3520 = vmatpush.bf16.msrb.mxu1 %v6378_v19  ;;  %v5739_v2 = vld [vmem:[%s8333_s29 + $0x520] sm:$0xf0]  ;;  %v5198_v19 = vor.u32 %v7429_v10, %v5195_v11 }
  0xb3   : > { %v7857_v9 = vld [vmem:[%s8333_s29 + $0xe1c] sm:$0xf0]  ;;  %3508 = vmatmul.bf16.vlgmr.msrb.gmra.mxu0 %v8512_v42  ;;  %v7629_v3 = vld [vmem:[%s8333_s29 + $0x704] sm:$0xf] }
  0xb4   : > { %v6890_v27 = vor.u32 %v7857_v9, %v6889_v8  ;;  %3533 = vmatpush.bf16.msrb.mxu2 %v6634_v20  ;;  %3552 = vmatpush.bf16.msra.mxu0 %v5326_v28  ;;  %v5486_v8 = vor.u32 %v7501_v62, %v5483_v0  ;;  %v5742_v9 = vor.u32 %v7565_v1, %v5739_v2  ;;  %v7621_v17 = vld [vmem:[%s8333_s29 + $0x6c4] sm:$0xf] }
  0xb5   : > { %3521 = vmatmul.bf16.vlgmr.msrb.gmra.mxu1 %v8516_v45  ;;  %v5998_v13 = vor.u32 %v7629_v3, %v5995_v4  ;;  %v5963_v18 = vld [vmem:[%s8333_s29 + $0x6e0] sm:$0xf0]  ;;  %v5454_v20 = vor.u32 %v7493_v12, %v5451_v14 }
  0xb6   : > { %3546 = vmatpush.bf16.msrb.mxu3 %v6890_v27  ;;  %3565 = vmatpush.bf16.msra.mxu1 %v5582_v30  ;;  %v7421_v24 = vld [vmem:[%s8333_s29 + $0x84] sm:$0xf]  ;;  %v5966_v27 = vor.u32 %v7621_v17, %v5963_v18 }
  0xb7   : > { %3534 = vmatmul.bf16.vlgmr.msrb.gmra.mxu2 %v8508_v39  ;;  %v5163_v25 = vld [vmem:[%s8333_s29 + $0xa0] sm:$0xf0] }
  0xb8   : > { %3578 = vmatpush.bf16.msra.mxu2 %v5838_v31  ;;  %3553 = vmatpush.bf16.msra.mxu0 %v5294_v44  ;;  %v7485_v26 = vld [vmem:[%s8333_s29 + $0x284] sm:$0xf]  ;;  %v5166_v33 = vor.u32 %v7421_v24, %v5163_v25 }
  0xb9   : > { %3547 = vmatmul.bf16.vlgmr.msrb.gmra.mxu3 %v8514_v43  ;;  %v5419_v28 = vld [vmem:[%s8333_s29 + $0x2a0] sm:$0xf0] }
  0xba   : > { %3591 = vmatpush.bf16.msra.mxu3 %v6094_v35  ;;  %3566 = vmatpush.bf16.msra.mxu1 %v5550_v46  ;;  %v7549_v29 = vld [vmem:[%s8333_s29 + $0x484] sm:$0xf]  ;;  %v5422_v34 = vor.u32 %v7485_v26, %v5419_v28 }
  0xbb   : > { %v5675_v30 = vld [vmem:[%s8333_s29 + $0x4a0] sm:$0xf0] }
  0xbc   : > { %3579 = vmatpush.bf16.msra.mxu2 %v5806_v47  ;;  %3554 = vmatpush.bf16.msra.mxu0 %v5262_v57  ;;  %v7613_v31 = vld [vmem:[%s8333_s29 + $0x684] sm:$0xf]  ;;  %v5678_v35 = vor.u32 %v7549_v29, %v5675_v30 }
  0xbd   : > { %v5931_v32 = vld [vmem:[%s8333_s29 + $0x6a0] sm:$0xf0] }
  0xbe   : > { %3592 = vmatpush.bf16.msra.mxu3 %v6062_v51  ;;  %3567 = vmatpush.bf16.msra.mxu1 %v5518_v58  ;;  %v7413_v36 = vld [vmem:[%s8333_s29 + $0x44] sm:$0xf]  ;;  %v5934_v40 = vor.u32 %v7613_v31, %v5931_v32 }
  0xbf   : > { %v5131_v37 = vld [vmem:[%s8333_s29 + $0x60] sm:$0xf0] }
  0xc0   : > { %3580 = vmatpush.bf16.msra.mxu2 %v5774_v59  ;;  %3555 = vmatpush.bf16.msra.mxu0 %v5230_v6  ;;  %v7477_v38 = vld [vmem:[%s8333_s29 + $0x244] sm:$0xf]  ;;  %v5134_v49 = vor.u32 %v7413_v36, %v5131_v37 }
  0xc1   : > { %v5387_v41 = vld [vmem:[%s8333_s29 + $0x260] sm:$0xf0] }
  0xc2   : > { %3593 = vmatpush.bf16.msra.mxu3 %v6030_v63  ;;  %3568 = vmatpush.bf16.msra.mxu1 %v5486_v8  ;;  %v7541_v44 = vld [vmem:[%s8333_s29 + $0x444] sm:$0xf]  ;;  %v5390_v52 = vor.u32 %v7477_v38, %v5387_v41 }
  0xc3   : > { %v5643_v46 = vld [vmem:[%s8333_s29 + $0x460] sm:$0xf0] }
  0xc4   : > { %3581 = vmatpush.bf16.msra.mxu2 %v5742_v9  ;;  %3556 = vmatpush.bf16.msra.mxu0 %v5198_v19  ;;  %v7605_v47 = vld [vmem:[%s8333_s29 + $0x644] sm:$0xf]  ;;  %v5646_v53 = vor.u32 %v7541_v44, %v5643_v46 }
  0xc5   : > { %v5899_v48 = vld [vmem:[%s8333_s29 + $0x660] sm:$0xf0] }
  0xc6   : > { %3594 = vmatpush.bf16.msra.mxu3 %v5998_v13  ;;  %3569 = vmatpush.bf16.msra.mxu1 %v5454_v20  ;;  %v7405_v50 = vld [vmem:[%s8333_s29 + $0x4] sm:$0xf]  ;;  %v5902_v57 = vor.u32 %v7605_v47, %v5899_v48 }
  0xc7   : > { %v5099_v51 = vld [vmem:[%s8333_s29 + $0x20] sm:$0xf0] }
  0xc8   : > { %3582 = vmatpush.bf16.msra.mxu2 %v5710_v23  ;;  %3557 = vmatpush.bf16.msra.mxu0 %v5166_v33  ;;  %v7469_v54 = vld [vmem:[%s8333_s29 + $0x204] sm:$0xf]  ;;  %v5102_v0 = vor.u32 %v7405_v50, %v5099_v51 }
  0xc9   : > { %v5355_v55 = vld [vmem:[%s8333_s29 + $0x220] sm:$0xf0] }
  0xca   : > { %3595 = vmatpush.bf16.msra.mxu3 %v5966_v27  ;;  %3570 = vmatpush.bf16.msra.mxu1 %v5422_v34  ;;  %v7533_v56 = vld [vmem:[%s8333_s29 + $0x404] sm:$0xf]  ;;  %v5358_v4 = vor.u32 %v7469_v54, %v5355_v55 }
  0xcb   : > { %v5611_v58 = vld [vmem:[%s8333_s29 + $0x420] sm:$0xf0] }
  0xcc   : > { %3583 = vmatpush.bf16.msra.mxu2 %v5678_v35  ;;  %v7597_v59 = vld [vmem:[%s8333_s29 + $0x604] sm:$0xf]  ;;  %3558 = vmatpush.bf16.msra.mxu0 %v5134_v49  ;;  %v5614_v6 = vor.u32 %v7533_v56, %v5611_v58 }
  0xcd   : > { %v5867_v60 = vld [vmem:[%s8333_s29 + $0x620] sm:$0xf0] }
  0xce   : > { %3596 = vmatpush.bf16.msra.mxu3 %v5934_v40  ;;  %v7717_v61 = vld [vmem:[%s8333_s29 + $0x9c4] sm:$0xf]  ;;  %3571 = vmatpush.bf16.msra.mxu1 %v5390_v52  ;;  %v5870_v10 = vor.u32 %v7597_v59, %v5867_v60 }
  0xcf   : > { %v6347_v62 = vld [vmem:[%s8333_s29 + $0x9e0] sm:$0xf0] }
  0xd0   : > { %v7781_v63 = vld [vmem:[%s8333_s29 + $0xbc4] sm:$0xf]  ;;  %3584 = vmatpush.bf16.msra.mxu2 %v5646_v53  ;;  %v6350_v11 = vor.u32 %v7717_v61, %v6347_v62  ;;  %3559 = vmatpush.bf16.msra.mxu0 %v5102_v0 }
  0xd1   : > { %v6603_v1 = vld [vmem:[%s8333_s29 + $0xbe0] sm:$0xf0] }
  0xd2   : > { %v7845_v2 = vld [vmem:[%s8333_s29 + $0xdc4] sm:$0xf]  ;;  %3597 = vmatpush.bf16.msra.mxu3 %v5902_v57  ;;  %v6606_v12 = vor.u32 %v7781_v63, %v6603_v1  ;;  %3572 = vmatpush.bf16.msra.mxu1 %v5358_v4 }
  0xd3   : > { %v6859_v3 = vld [vmem:[%s8333_s29 + $0xde0] sm:$0xf0]  ;;  %3560 = vmatmul.bf16.vlgmr.msra.gmra.mxu0 %v8453_v21 }
  0xd4   : > { %v7909_v8 = vld [vmem:[%s8333_s29 + $0xfc4] sm:$0xf]  ;;  %v6862_v13 = vor.u32 %v7845_v2, %v6859_v3  ;;  %3585 = vmatpush.bf16.msra.mxu2 %v5614_v6  ;;  %3604 = vmatpush.bf16.msrb.mxu0 %v6350_v11 }
  0xd5   : > { %v7115_v9 = vld [vmem:[%s8333_s29 + $0xfe0] sm:$0xf0]  ;;  %3573 = vmatmul.bf16.vlgmr.msra.gmra.mxu1 %v8456_v22 }
  0xd6   : > { %v7709_v14 = vld [vmem:[%s8333_s29 + $0x984] sm:$0xf]  ;;  %v7118_v17 = vor.u32 %v7909_v8, %v7115_v9  ;;  %3598 = vmatpush.bf16.msra.mxu3 %v5870_v10  ;;  %3617 = vmatpush.bf16.msrb.mxu1 %v6606_v12 }
  0xd7   : > { %v6315_v15 = vld [vmem:[%s8333_s29 + $0x9a0] sm:$0xf0]  ;;  %3586 = vmatmul.bf16.vlgmr.msra.gmra.mxu2 %v8439_v5 }
  0xd8   : > { %v7773_v16 = vld [vmem:[%s8333_s29 + $0xb84] sm:$0xf]  ;;  %v6318_v25 = vor.u32 %v7709_v14, %v6315_v15  ;;  %3630 = vmatpush.bf16.msrb.mxu2 %v6862_v13 }
  0xd9   : > { %v6571_v18 = vld [vmem:[%s8333_s29 + $0xba0] sm:$0xf0]  ;;  %3599 = vmatmul.bf16.vlgmr.msra.gmra.mxu3 %v8442_v7 }
  0xda   : > { %v7837_v19 = vld [vmem:[%s8333_s29 + $0xd84] sm:$0xf]  ;;  %v6574_v26 = vor.u32 %v7773_v16, %v6571_v18  ;;  %3643 = vmatpush.bf16.msrb.mxu3 %v7118_v17  ;;  %3605 = vmatpush.bf16.msrb.mxu0 %v6318_v25 }
  0xdb   : > { %v6827_v20 = vld [vmem:[%s8333_s29 + $0xda0] sm:$0xf0] }
  0xdc   : > { %v7901_v23 = vld [vmem:[%s8333_s29 + $0xf84] sm:$0xf]  ;;  %v6830_v27 = vor.u32 %v7837_v19, %v6827_v20  ;;  %3618 = vmatpush.bf16.msrb.mxu1 %v6574_v26 }
  0xdd   : > { %v7083_v24 = vld [vmem:[%s8333_s29 + $0xfa0] sm:$0xf0] }
  0xde   : > { %v7701_v28 = vld [vmem:[%s8333_s29 + $0x944] sm:$0xf]  ;;  %v7086_v31 = vor.u32 %v7901_v23, %v7083_v24  ;;  %3631 = vmatpush.bf16.msrb.mxu2 %v6830_v27 }
  0xdf   : > { %v6283_v29 = vld [vmem:[%s8333_s29 + $0x960] sm:$0xf0] }
  0xe0   : > { %v7765_v30 = vld [vmem:[%s8333_s29 + $0xb44] sm:$0xf]  ;;  %v6286_v37 = vor.u32 %v7701_v28, %v6283_v29  ;;  %3644 = vmatpush.bf16.msrb.mxu3 %v7086_v31 }
  0xe1   : > { %v6539_v32 = vld [vmem:[%s8333_s29 + $0xb60] sm:$0xf0] }
  0xe2   : > { %v7829_v33 = vld [vmem:[%s8333_s29 + $0xd44] sm:$0xf]  ;;  %v6542_v38 = vor.u32 %v7765_v30, %v6539_v32  ;;  %3606 = vmatpush.bf16.msrb.mxu0 %v6286_v37 }
  0xe3   : > { %v6795_v34 = vld [vmem:[%s8333_s29 + $0xd60] sm:$0xf0] }
  0xe4   : > { %v7893_v35 = vld [vmem:[%s8333_s29 + $0xf44] sm:$0xf]  ;;  %v6798_v40 = vor.u32 %v7829_v33, %v6795_v34  ;;  %3619 = vmatpush.bf16.msrb.mxu1 %v6542_v38 }
  0xe5   : > { %v7051_v36 = vld [vmem:[%s8333_s29 + $0xf60] sm:$0xf0] }
  0xe6   : > { %v7693_v41 = vld [vmem:[%s8333_s29 + $0x904] sm:$0xf]  ;;  %v7054_v47 = vor.u32 %v7893_v35, %v7051_v36  ;;  %3632 = vmatpush.bf16.msrb.mxu2 %v6798_v40 }
  0xe7   : > { %v6251_v44 = vld [vmem:[%s8333_s29 + $0x920] sm:$0xf0] }
  0xe8   : > { %v7757_v46 = vld [vmem:[%s8333_s29 + $0xb04] sm:$0xf]  ;;  %v6254_v53 = vor.u32 %v7693_v41, %v6251_v44  ;;  %3645 = vmatpush.bf16.msrb.mxu3 %v7054_v47  ;;  %v5329_v44 = vld [vmem:[%s8333_s29 + $0x1c8] sm:$0xf] }
  0xe9   : > { %v6507_v48 = vld [vmem:[%s8333_s29 + $0xb20] sm:$0xf0]  ;;  %v5585_v47 = vld [vmem:[%s8333_s29 + $0x3c8] sm:$0xf] }
  0xea   : > { %v7821_v49 = vld [vmem:[%s8333_s29 + $0xd04] sm:$0xf]  ;;  %v6510_v54 = vor.u32 %v7757_v46, %v6507_v48  ;;  %3607 = vmatpush.bf16.msrb.mxu0 %v6254_v53  ;;  %v7466_v46 = vld [vmem:[%s8333_s29 + $0x1e4] sm:$0xf0] }
  0xeb   : > { %v6763_v50 = vld [vmem:[%s8333_s29 + $0xd20] sm:$0xf0] }
  0xec   : > { %v7885_v51 = vld [vmem:[%s8333_s29 + $0xf04] sm:$0xf]  ;;  %v6766_v55 = vor.u32 %v7821_v49, %v6763_v50  ;;  %3620 = vmatpush.bf16.msrb.mxu1 %v6510_v54  ;;  %v7530_v49 = vld [vmem:[%s8333_s29 + $0x3e4] sm:$0xf0] }
  0xed   : > { %v7019_v52 = vld [vmem:[%s8333_s29 + $0xf20] sm:$0xf0]  ;;  %v5841_v50 = vld [vmem:[%s8333_s29 + $0x5c8] sm:$0xf] }
  0xee   : > { %v7685_v56 = vld [vmem:[%s8333_s29 + $0x8c4] sm:$0xf]  ;;  %v7022_v59 = vor.u32 %v7885_v51, %v7019_v52  ;;  %3633 = vmatpush.bf16.msrb.mxu2 %v6766_v55  ;;  %v7594_v51 = vld [vmem:[%s8333_s29 + $0x5e4] sm:$0xf0] }
  0xef   : > { %v6219_v57 = vld [vmem:[%s8333_s29 + $0x8e0] sm:$0xf0]  ;;  %v6097_v54 = vld [vmem:[%s8333_s29 + $0x7c8] sm:$0xf] }
  0xf0   : > { %v7749_v58 = vld [vmem:[%s8333_s29 + $0xac4] sm:$0xf]  ;;  %v6222_v1 = vor.u32 %v7685_v56, %v6219_v57  ;;  %3646 = vmatpush.bf16.msrb.mxu3 %v7022_v59  ;;  %v7658_v55 = vld [vmem:[%s8333_s29 + $0x7e4] sm:$0xf0]  ;;  %v5330_v57 = vor.u32 %v7466_v46, %v5329_v44  ;;  %v5842_v59 = vor.u32 %v7594_v51, %v5841_v50 }
  0xf1   : > { %v6475_v60 = vld [vmem:[%s8333_s29 + $0xae0] sm:$0xf0]  ;;  %v5713_v44 = vld [vmem:[%s8333_s29 + $0x4c8] sm:$0xf] }
  0xf2   : > { %v7813_v61 = vld [vmem:[%s8333_s29 + $0xcc4] sm:$0xf]  ;;  %v6478_v2 = vor.u32 %v7749_v58, %v6475_v60  ;;  %3608 = vmatpush.bf16.msrb.mxu0 %v6222_v1  ;;  %v5586_v58 = vor.u32 %v7530_v49, %v5585_v47  ;;  %v5297_v60 = vld [vmem:[%s8333_s29 + $0x188] sm:$0xf] }
  0xf3   : > { %v6731_v62 = vld [vmem:[%s8333_s29 + $0xce0] sm:$0xf0]  ;;  %v5809_v1 = vld [vmem:[%s8333_s29 + $0x588] sm:$0xf] }
  0xf4   : > { %v7877_v63 = vld [vmem:[%s8333_s29 + $0xec4] sm:$0xf]  ;;  %v6734_v3 = vor.u32 %v7813_v61, %v6731_v62  ;;  %3621 = vmatpush.bf16.msrb.mxu1 %v6478_v2  ;;  %v7458_v61 = vld [vmem:[%s8333_s29 + $0x1a4] sm:$0xf0] }
  0xf5   : > { %v6987_v0 = vld [vmem:[%s8333_s29 + $0xee0] sm:$0xf0]  ;;  %v5553_v62 = vld [vmem:[%s8333_s29 + $0x388] sm:$0xf] }
  0xf6   : > { %v7677_v4 = vld [vmem:[%s8333_s29 + $0x884] sm:$0xf]  ;;  %v6990_v9 = vor.u32 %v7877_v63, %v6987_v0  ;;  %3634 = vmatpush.bf16.msrb.mxu2 %v6734_v3  ;;  %v6098_v63 = vor.u32 %v7658_v55, %v6097_v54  ;;  %v7522_v0 = vld [vmem:[%s8333_s29 + $0x3a4] sm:$0xf0] }
  0xf7   : > { %v6187_v6 = vld [vmem:[%s8333_s29 + $0x8a0] sm:$0xf0]  ;;  %v7586_v2 = vld [vmem:[%s8333_s29 + $0x5a4] sm:$0xf0] }
  0xf8   : > { %v7741_v8 = vld [vmem:[%s8333_s29 + $0xa84] sm:$0xf]  ;;  %v6190_v15 = vor.u32 %v7677_v4, %v6187_v6  ;;  %3647 = vmatpush.bf16.msrb.mxu3 %v6990_v9  ;;  %v6065_v3 = vld [vmem:[%s8333_s29 + $0x788] sm:$0xf]  ;;  %v5298_v6 = vor.u32 %v7458_v61, %v5297_v60  ;;  %v5810_v9 = vor.u32 %v7586_v2, %v5809_v1 }
  0xf9   : > { %v6443_v10 = vld [vmem:[%s8333_s29 + $0xaa0] sm:$0xf0]  ;;  %v7650_v4 = vld [vmem:[%s8333_s29 + $0x7a4] sm:$0xf0] }
  0xfa   : > { %v7805_v11 = vld [vmem:[%s8333_s29 + $0xc84] sm:$0xf]  ;;  %v6446_v16 = vor.u32 %v7741_v8, %v6443_v10  ;;  %3609 = vmatpush.bf16.msrb.mxu0 %v6190_v15  ;;  %v5554_v8 = vor.u32 %v7522_v0, %v5553_v62  ;;  %v5265_v10 = vld [vmem:[%s8333_s29 + $0x148] sm:$0xf] }
  0xfb   : > { %v6699_v12 = vld [vmem:[%s8333_s29 + $0xca0] sm:$0xf0]  ;;  %v5777_v15 = vld [vmem:[%s8333_s29 + $0x548] sm:$0xf] }
  0xfc   : > { %v7869_v13 = vld [vmem:[%s8333_s29 + $0xe84] sm:$0xf]  ;;  %v6702_v17 = vor.u32 %v7805_v11, %v6699_v12  ;;  %3622 = vmatpush.bf16.msrb.mxu1 %v6446_v16  ;;  %v7450_v11 = vld [vmem:[%s8333_s29 + $0x164] sm:$0xf0] }
  0xfd   : > { %v6955_v14 = vld [vmem:[%s8333_s29 + $0xea0] sm:$0xf0]  ;;  %v5521_v12 = vld [vmem:[%s8333_s29 + $0x348] sm:$0xf] }
  0xfe   : > { %v7669_v18 = vld [vmem:[%s8333_s29 + $0x844] sm:$0xf]  ;;  %v6958_v23 = vor.u32 %v7869_v13, %v6955_v14  ;;  %3635 = vmatpush.bf16.msrb.mxu2 %v6702_v17  ;;  %v6066_v13 = vor.u32 %v7650_v4, %v6065_v3  ;;  %v7514_v14 = vld [vmem:[%s8333_s29 + $0x364] sm:$0xf0] }
  0xff   : > { %v6155_v19 = vld [vmem:[%s8333_s29 + $0x860] sm:$0xf0]  ;;  %v7578_v16 = vld [vmem:[%s8333_s29 + $0x564] sm:$0xf0] }
 0x100   : > { %v7733_v20 = vld [vmem:[%s8333_s29 + $0xa44] sm:$0xf]  ;;  %v6158_v29 = vor.u32 %v7669_v18, %v6155_v19  ;;  %3648 = vmatpush.bf16.msrb.mxu3 %v6958_v23  ;;  %v6033_v17 = vld [vmem:[%s8333_s29 + $0x748] sm:$0xf]  ;;  %v5266_v19 = vor.u32 %v7450_v11, %v5265_v10  ;;  %v5778_v23 = vor.u32 %v7578_v16, %v5777_v15 }
 0x101   : > { %v6411_v24 = vld [vmem:[%s8333_s29 + $0xa60] sm:$0xf0]  ;;  %v7642_v18 = vld [vmem:[%s8333_s29 + $0x764] sm:$0xf0] }
 0x102   : > { %v7797_v25 = vld [vmem:[%s8333_s29 + $0xc44] sm:$0xf]  ;;  %v6414_v32 = vor.u32 %v7733_v20, %v6411_v24  ;;  %3610 = vmatpush.bf16.msrb.mxu0 %v6158_v29  ;;  %v5522_v20 = vor.u32 %v7514_v14, %v5521_v12  ;;  %v5233_v24 = vld [vmem:[%s8333_s29 + $0x108] sm:$0xf] }
 0x103   : > { %v6667_v26 = vld [vmem:[%s8333_s29 + $0xc60] sm:$0xf0]  ;;  %v5745_v29 = vld [vmem:[%s8333_s29 + $0x508] sm:$0xf] }
 0x104   : > { %v7861_v27 = vld [vmem:[%s8333_s29 + $0xe44] sm:$0xf]  ;;  %v6670_v33 = vor.u32 %v7797_v25, %v6667_v26  ;;  %3623 = vmatpush.bf16.msrb.mxu1 %v6414_v32  ;;  %v7442_v25 = vld [vmem:[%s8333_s29 + $0x124] sm:$0xf0] }
 0x105   : > { %v6923_v28 = vld [vmem:[%s8333_s29 + $0xe60] sm:$0xf0]  ;;  %v5489_v26 = vld [vmem:[%s8333_s29 + $0x308] sm:$0xf] }
 0x106   : > { %v7661_v30 = vld [vmem:[%s8333_s29 + $0x804] sm:$0xf]  ;;  %v6926_v37 = vor.u32 %v7861_v27, %v6923_v28  ;;  %3636 = vmatpush.bf16.msrb.mxu2 %v6670_v33  ;;  %v6034_v27 = vor.u32 %v7642_v18, %v6033_v17  ;;  %v7506_v28 = vld [vmem:[%s8333_s29 + $0x324] sm:$0xf0]  ;;  %v5234_v33 = vor.u32 %v7442_v25, %v5233_v24 }
 0x107   : > { %v6123_v31 = vld [vmem:[%s8333_s29 + $0x820] sm:$0xf0]  ;;  %v7634_v32 = vld [vmem:[%s8333_s29 + $0x724] sm:$0xf0] }
 0x108   : > { %v7725_v34 = vld [vmem:[%s8333_s29 + $0xa04] sm:$0xf]  ;;  %v6126_v48 = vor.u32 %v7661_v30, %v6123_v31  ;;  %3649 = vmatpush.bf16.msrb.mxu3 %v6926_v37  ;;  %v7570_v30 = vld [vmem:[%s8333_s29 + $0x524] sm:$0xf0] }
 0x109   : > { %v6379_v35 = vld [vmem:[%s8333_s29 + $0xa20] sm:$0xf0]  ;;  %v6001_v31 = vld [vmem:[%s8333_s29 + $0x708] sm:$0xf] }
 0x10a   : > { %v7789_v36 = vld [vmem:[%s8333_s29 + $0xc04] sm:$0xf]  ;;  %v6382_v52 = vor.u32 %v7725_v34, %v6379_v35  ;;  %3611 = vmatpush.bf16.msrb.mxu0 %v6126_v48  ;;  %v5490_v34 = vor.u32 %v7506_v28, %v5489_v26  ;;  %v5746_v35 = vor.u32 %v7570_v30, %v5745_v29  ;;  %v7434_v37 = vld [vmem:[%s8333_s29 + $0xe4] sm:$0xf0] }
 0x10b   : > { %v6635_v38 = vld [vmem:[%s8333_s29 + $0xc20] sm:$0xf0]  ;;  %v7562_v46 = vld [vmem:[%s8333_s29 + $0x4e4] sm:$0xf0] }
 0x10c   : > { %v7853_v40 = vld [vmem:[%s8333_s29 + $0xe04] sm:$0xf]  ;;  %v6638_v53 = vor.u32 %v7789_v36, %v6635_v38  ;;  %3624 = vmatpush.bf16.msrb.mxu1 %v6382_v52  ;;  %v5201_v36 = vld [vmem:[%s8333_s29 + $0xc8] sm:$0xf]  ;;  %v5714_v51 = vor.u32 %v7562_v46, %v5713_v44 }
 0x10d   : > { %v6891_v41 = vld [vmem:[%s8333_s29 + $0xe20] sm:$0xf0]  ;;  %3612 = vmatmul.bf16.vlgmr.msrb.gmra.mxu0 %v8512_v42  ;;  %v5457_v38 = vld [vmem:[%s8333_s29 + $0x2c8] sm:$0xf]  ;;  %v5202_v49 = vor.u32 %v7434_v37, %v5201_v36 }
 0x10e   : > { %v6894_v56 = vor.u32 %v7853_v40, %v6891_v41  ;;  %3637 = vmatpush.bf16.msrb.mxu2 %v6638_v53  ;;  %3656 = vmatpush.bf16.msra.mxu0 %v5330_v57  ;;  %v6002_v40 = vor.u32 %v7634_v32, %v6001_v31  ;;  %v7498_v41 = vld [vmem:[%s8333_s29 + $0x2e4] sm:$0xf0] }
 0x10f   : > { %3625 = vmatmul.bf16.vlgmr.msrb.gmra.mxu1 %v8516_v45  ;;  %v5969_v47 = vld [vmem:[%s8333_s29 + $0x6c8] sm:$0xf]  ;;  %v5458_v50 = vor.u32 %v7498_v41, %v5457_v38 }
 0x110   : > { %3650 = vmatpush.bf16.msrb.mxu3 %v6894_v56  ;;  %3669 = vmatpush.bf16.msra.mxu1 %v5586_v58  ;;  %v7626_v48 = vld [vmem:[%s8333_s29 + $0x6e4] sm:$0xf0] }
 0x111   : > { %3638 = vmatmul.bf16.vlgmr.msrb.gmra.mxu2 %v8508_v39  ;;  %v5169_v52 = vld [vmem:[%s8333_s29 + $0x88] sm:$0xf]  ;;  %v5970_v55 = vor.u32 %v7626_v48, %v5969_v47 }
 0x112   : > { %3682 = vmatpush.bf16.msra.mxu2 %v5842_v59  ;;  %3657 = vmatpush.bf16.msra.mxu0 %v5298_v6  ;;  %v7426_v53 = vld [vmem:[%s8333_s29 + $0xa4] sm:$0xf0] }
 0x113   : > { %3651 = vmatmul.bf16.vlgmr.msrb.gmra.mxu3 %v8514_v43  ;;  %v5425_v54 = vld [vmem:[%s8333_s29 + $0x288] sm:$0xf]  ;;  %v5170_v61 = vor.u32 %v7426_v53, %v5169_v52 }
 0x114   : > { %3695 = vmatpush.bf16.msra.mxu3 %v6098_v63  ;;  %3670 = vmatpush.bf16.msra.mxu1 %v5554_v8  ;;  %v7490_v56 = vld [vmem:[%s8333_s29 + $0x2a4] sm:$0xf0] }
 0x115   : > { %v5681_v57 = vld [vmem:[%s8333_s29 + $0x488] sm:$0xf]  ;;  %v5426_v62 = vor.u32 %v7490_v56, %v5425_v54 }
 0x116   : > { %3683 = vmatpush.bf16.msra.mxu2 %v5810_v9  ;;  %3658 = vmatpush.bf16.msra.mxu0 %v5266_v19  ;;  %v7554_v58 = vld [vmem:[%s8333_s29 + $0x4a4] sm:$0xf0] }
 0x117   : > { %v5937_v59 = vld [vmem:[%s8333_s29 + $0x688] sm:$0xf]  ;;  %v5682_v63 = vor.u32 %v7554_v58, %v5681_v57 }
 0x118   : > { %3696 = vmatpush.bf16.msra.mxu3 %v6066_v13  ;;  %3671 = vmatpush.bf16.msra.mxu1 %v5522_v20  ;;  %v7618_v60 = vld [vmem:[%s8333_s29 + $0x6a4] sm:$0xf0] }
 0x119   : > { %v5137_v0 = vld [vmem:[%s8333_s29 + $0x48] sm:$0xf]  ;;  %v5938_v3 = vor.u32 %v7618_v60, %v5937_v59 }
 0x11a   : > { %3684 = vmatpush.bf16.msra.mxu2 %v5778_v23  ;;  %3659 = vmatpush.bf16.msra.mxu0 %v5234_v33  ;;  %v7418_v1 = vld [vmem:[%s8333_s29 + $0x64] sm:$0xf0] }
 0x11b   : > { %v5393_v2 = vld [vmem:[%s8333_s29 + $0x248] sm:$0xf]  ;;  %v5138_v11 = vor.u32 %v7418_v1, %v5137_v0 }
 0x11c   : > { %3697 = vmatpush.bf16.msra.mxu3 %v6034_v27  ;;  %3672 = vmatpush.bf16.msra.mxu1 %v5490_v34  ;;  %v7482_v4 = vld [vmem:[%s8333_s29 + $0x264] sm:$0xf0] }
 0x11d   : > { %v5649_v6 = vld [vmem:[%s8333_s29 + $0x448] sm:$0xf]  ;;  %v5394_v14 = vor.u32 %v7482_v4, %v5393_v2 }
 0x11e   : > { %3685 = vmatpush.bf16.msra.mxu2 %v5746_v35  ;;  %3660 = vmatpush.bf16.msra.mxu0 %v5202_v49  ;;  %v7546_v8 = vld [vmem:[%s8333_s29 + $0x464] sm:$0xf0] }
 0x11f   : > { %v5905_v9 = vld [vmem:[%s8333_s29 + $0x648] sm:$0xf]  ;;  %v5650_v15 = vor.u32 %v7546_v8, %v5649_v6 }
 0x120   : > { %3698 = vmatpush.bf16.msra.mxu3 %v6002_v40  ;;  %3673 = vmatpush.bf16.msra.mxu1 %v5458_v50  ;;  %v7610_v10 = vld [vmem:[%s8333_s29 + $0x664] sm:$0xf0] }
 0x121   : > { %v5105_v12 = vld [vmem:[%s8333_s29 + $0x8] sm:$0xf]  ;;  %v5906_v19 = vor.u32 %v7610_v10, %v5905_v9 }
 0x122   : > { %3686 = vmatpush.bf16.msra.mxu2 %v5714_v51  ;;  %3661 = vmatpush.bf16.msra.mxu0 %v5170_v61  ;;  %v7410_v13 = vld [vmem:[%s8333_s29 + $0x24] sm:$0xf0] }
 0x123   : > { %v5361_v16 = vld [vmem:[%s8333_s29 + $0x208] sm:$0xf]  ;;  %v5106_v28 = vor.u32 %v7410_v13, %v5105_v12 }
 0x124   : > { %3699 = vmatpush.bf16.msra.mxu3 %v5970_v55  ;;  %3674 = vmatpush.bf16.msra.mxu1 %v5426_v62  ;;  %v7474_v17 = vld [vmem:[%s8333_s29 + $0x224] sm:$0xf0] }
 0x125   : > { %v5617_v18 = vld [vmem:[%s8333_s29 + $0x408] sm:$0xf]  ;;  %v5362_v32 = vor.u32 %v7474_v17, %v5361_v16 }
 0x126   : > { %3687 = vmatpush.bf16.msra.mxu2 %v5682_v63  ;;  %v7538_v20 = vld [vmem:[%s8333_s29 + $0x424] sm:$0xf0]  ;;  %3662 = vmatpush.bf16.msra.mxu0 %v5138_v11 }
 0x127   : > { %v5873_v23 = vld [vmem:[%s8333_s29 + $0x608] sm:$0xf]  ;;  %v5618_v33 = vor.u32 %v7538_v20, %v5617_v18 }
 0x128   : > { %3700 = vmatpush.bf16.msra.mxu3 %v5938_v3  ;;  %v7602_v24 = vld [vmem:[%s8333_s29 + $0x624] sm:$0xf0]  ;;  %3675 = vmatpush.bf16.msra.mxu1 %v5394_v14 }
 0x129   : > { %v6353_v25 = vld [vmem:[%s8333_s29 + $0x9c8] sm:$0xf]  ;;  %v5874_v36 = vor.u32 %v7602_v24, %v5873_v23 }
 0x12a   : > { %v7722_v26 = vld [vmem:[%s8333_s29 + $0x9e4] sm:$0xf0]  ;;  %3688 = vmatpush.bf16.msra.mxu2 %v5650_v15  ;;  %3663 = vmatpush.bf16.msra.mxu0 %v5106_v28 }
 0x12b   : > { %v6609_v27 = vld [vmem:[%s8333_s29 + $0xbc8] sm:$0xf]  ;;  %v6354_v37 = vor.u32 %v7722_v26, %v6353_v25 }
 0x12c   : > { %v7786_v29 = vld [vmem:[%s8333_s29 + $0xbe4] sm:$0xf0]  ;;  %3701 = vmatpush.bf16.msra.mxu3 %v5906_v19  ;;  %3676 = vmatpush.bf16.msra.mxu1 %v5362_v32 }
 0x12d   : > { %v6865_v30 = vld [vmem:[%s8333_s29 + $0xdc8] sm:$0xf]  ;;  %v6610_v38 = vor.u32 %v7786_v29, %v6609_v27  ;;  %3664 = vmatmul.bf16.vlgmr.msra.gmra.mxu0 %v8453_v21 }
 0x12e   : > { %v7850_v31 = vld [vmem:[%s8333_s29 + $0xde4] sm:$0xf0]  ;;  %3689 = vmatpush.bf16.msra.mxu2 %v5618_v33  ;;  %3708 = vmatpush.bf16.msrb.mxu0 %v6354_v37 }
 0x12f   : > { %v7121_v34 = vld [vmem:[%s8333_s29 + $0xfc8] sm:$0xf]  ;;  %v6866_v40 = vor.u32 %v7850_v31, %v6865_v30  ;;  %3677 = vmatmul.bf16.vlgmr.msra.gmra.mxu1 %v8456_v22 }
 0x130   : > { %v7914_v35 = vld [vmem:[%s8333_s29 + $0xfe4] sm:$0xf0]  ;;  %3702 = vmatpush.bf16.msra.mxu3 %v5874_v36  ;;  %3721 = vmatpush.bf16.msrb.mxu1 %v6610_v38 }
 0x131   : > { %v6321_v41 = vld [vmem:[%s8333_s29 + $0x988] sm:$0xf]  ;;  %v7122_v47 = vor.u32 %v7914_v35, %v7121_v34  ;;  %3690 = vmatmul.bf16.vlgmr.msra.gmra.mxu2 %v8439_v5 }
 0x132   : > { %v7714_v44 = vld [vmem:[%s8333_s29 + $0x9a4] sm:$0xf0]  ;;  %3734 = vmatpush.bf16.msrb.mxu2 %v6866_v40 }
 0x133   : > { %v6577_v46 = vld [vmem:[%s8333_s29 + $0xb88] sm:$0xf]  ;;  %v6322_v53 = vor.u32 %v7714_v44, %v6321_v41  ;;  %3703 = vmatmul.bf16.vlgmr.msra.gmra.mxu3 %v8442_v7  ;;  %v3457_v44 = vpop.f32.mrf.mxu0 }
 0x134   : > { %v7778_v48 = vld [vmem:[%s8333_s29 + $0xba4] sm:$0xf0]  ;;  %3747 = vmatpush.bf16.msrb.mxu3 %v7122_v47  ;;  %v3470_v47 = vpop.f32.mrf.mxu1 }
 0x135   : > { %v6833_v49 = vld [vmem:[%s8333_s29 + $0xd88] sm:$0xf]  ;;  %v6578_v54 = vor.u32 %v7778_v48, %v6577_v46  ;;  %3709 = vmatpush.bf16.msrb.mxu0 %v6322_v53  ;;  %v8761_v53 = vpop.f32.mrf.mxu2 }
 0x136   : > { %v7842_v50 = vld [vmem:[%s8333_s29 + $0xda4] sm:$0xf0] }
 0x137   : > { %v7089_v51 = vld [vmem:[%s8333_s29 + $0xf88] sm:$0xf]  ;;  %v6834_v55 = vor.u32 %v7842_v50, %v6833_v49  ;;  %3722 = vmatpush.bf16.msrb.mxu1 %v6578_v54 }
 0x138   : > { %v7906_v52 = vld [vmem:[%s8333_s29 + $0xfa4] sm:$0xf0] }
 0x139   : > { %v6289_v56 = vld [vmem:[%s8333_s29 + $0x948] sm:$0xf]  ;;  %v7090_v59 = vor.u32 %v7906_v52, %v7089_v51  ;;  %3735 = vmatpush.bf16.msrb.mxu2 %v6834_v55 }
 0x13a   : > { %v7706_v57 = vld [vmem:[%s8333_s29 + $0x964] sm:$0xf0] }
 0x13b   : > { %v6545_v58 = vld [vmem:[%s8333_s29 + $0xb48] sm:$0xf]  ;;  %v6290_v1 = vor.u32 %v7706_v57, %v6289_v56  ;;  %3748 = vmatpush.bf16.msrb.mxu3 %v7090_v59 }
 0x13c   : > { %v7770_v60 = vld [vmem:[%s8333_s29 + $0xb64] sm:$0xf0] }
 0x13d   : > { %v6801_v61 = vld [vmem:[%s8333_s29 + $0xd48] sm:$0xf]  ;;  %v6546_v2 = vor.u32 %v7770_v60, %v6545_v58  ;;  %3710 = vmatpush.bf16.msrb.mxu0 %v6290_v1  ;;  %v8766_v58 = vpop.f32.mrf.mxu3 }
 0x13e   : > { %v7834_v62 = vld [vmem:[%s8333_s29 + $0xd64] sm:$0xf0] }
 0x13f   : > { %v7057_v63 = vld [vmem:[%s8333_s29 + $0xf48] sm:$0xf]  ;;  %v6802_v3 = vor.u32 %v7834_v62, %v6801_v61  ;;  %3723 = vmatpush.bf16.msrb.mxu1 %v6546_v2 }
 0x140   : > { %v7898_v0 = vld [vmem:[%s8333_s29 + $0xf64] sm:$0xf0] }
 0x141   : > { %v6257_v4 = vld [vmem:[%s8333_s29 + $0x908] sm:$0xf]  ;;  %v7058_v9 = vor.u32 %v7898_v0, %v7057_v63  ;;  %3736 = vmatpush.bf16.msrb.mxu2 %v6802_v3 }
 0x142   : > { %v7698_v6 = vld [vmem:[%s8333_s29 + $0x924] sm:$0xf0] }
 0x143   : > { %v6513_v8 = vld [vmem:[%s8333_s29 + $0xb08] sm:$0xf]  ;;  %v6258_v15 = vor.u32 %v7698_v6, %v6257_v4  ;;  %3749 = vmatpush.bf16.msrb.mxu3 %v7058_v9 }
 0x144   : > { %v7762_v10 = vld [vmem:[%s8333_s29 + $0xb24] sm:$0xf0] }
 0x145   : > { %v6769_v11 = vld [vmem:[%s8333_s29 + $0xd08] sm:$0xf]  ;;  %v6514_v16 = vor.u32 %v7762_v10, %v6513_v8  ;;  %3711 = vmatpush.bf16.msrb.mxu0 %v6258_v15 }
 0x146   : > { %v7826_v12 = vld [vmem:[%s8333_s29 + $0xd24] sm:$0xf0] }
 0x147   : > { %v7025_v13 = vld [vmem:[%s8333_s29 + $0xf08] sm:$0xf]  ;;  %v6770_v17 = vor.u32 %v7826_v12, %v6769_v11  ;;  %3724 = vmatpush.bf16.msrb.mxu1 %v6514_v16  ;;  %v7462_v11 = vld [vmem:[%s8333_s29 + $0x1cc] sm:$0xf] }
 0x148   : > { %v7890_v14 = vld [vmem:[%s8333_s29 + $0xf24] sm:$0xf0]  ;;  %v5331_v12 = vld [vmem:[%s8333_s29 + $0x1e8] sm:$0xf0] }
 0x149   : > { %v6225_v18 = vld [vmem:[%s8333_s29 + $0x8c8] sm:$0xf]  ;;  %v7026_v23 = vor.u32 %v7890_v14, %v7025_v13  ;;  %3737 = vmatpush.bf16.msrb.mxu2 %v6770_v17  ;;  %v7526_v13 = vld [vmem:[%s8333_s29 + $0x3cc] sm:$0xf]  ;;  %v3459_v14 = vpop.f32.mrf.mxu0 }
 0x14a   : > { %v7690_v19 = vld [vmem:[%s8333_s29 + $0x8e4] sm:$0xf0]  ;;  %v5587_v16 = vld [vmem:[%s8333_s29 + $0x3e8] sm:$0xf0] }
 0x14b   : > { %v6481_v20 = vld [vmem:[%s8333_s29 + $0xac8] sm:$0xf]  ;;  %v6226_v29 = vor.u32 %v7690_v19, %v6225_v18  ;;  %3750 = vmatpush.bf16.msrb.mxu3 %v7026_v23  ;;  %v7590_v17 = vld [vmem:[%s8333_s29 + $0x5cc] sm:$0xf]  ;;  %v3472_v19 = vpop.f32.mrf.mxu1 }
 0x14c   : > { %v7754_v24 = vld [vmem:[%s8333_s29 + $0xae4] sm:$0xf0]  ;;  %v5843_v18 = vld [vmem:[%s8333_s29 + $0x5e8] sm:$0xf0] }
 0x14d   : > { %v6737_v25 = vld [vmem:[%s8333_s29 + $0xcc8] sm:$0xf]  ;;  %v6482_v30 = vor.u32 %v7754_v24, %v6481_v20  ;;  %3712 = vmatpush.bf16.msrb.mxu0 %v6226_v29  ;;  %v7654_v24 = vld [vmem:[%s8333_s29 + $0x7cc] sm:$0xf]  ;;  %v3498_v29 = vpop.f32.mrf.mxu3 }
 0x14e   : > { %v7818_v26 = vld [vmem:[%s8333_s29 + $0xce4] sm:$0xf0]  ;;  %v7430_v14 = vld [vmem:[%s8333_s29 + $0xcc] sm:$0xf] }
 0x14f   : > { %v6993_v27 = vld [vmem:[%s8333_s29 + $0xec8] sm:$0xf]  ;;  %v6738_v31 = vor.u32 %v7818_v26, %v6737_v25  ;;  %3725 = vmatpush.bf16.msrb.mxu1 %v6482_v30  ;;  %v6099_v25 = vld [vmem:[%s8333_s29 + $0x7e8] sm:$0xf0]  ;;  %v3485_v26 = vpop.f32.mrf.mxu2  ;;  %v5590_v30 = vor.u32 %v7526_v13, %v5587_v16 }
 0x150   : > { %v7882_v28 = vld [vmem:[%s8333_s29 + $0xee4] sm:$0xf0]  ;;  %v7494_v16 = vld [vmem:[%s8333_s29 + $0x2cc] sm:$0xf] }
 0x151   : > { %v6193_v32 = vld [vmem:[%s8333_s29 + $0x888] sm:$0xf]  ;;  %v6994_v35 = vor.u32 %v7882_v28, %v6993_v27  ;;  %3738 = vmatpush.bf16.msrb.mxu2 %v6738_v31  ;;  %v5334_v28 = vor.u32 %v7462_v11, %v5331_v12  ;;  %v5846_v31 = vor.u32 %v7590_v17, %v5843_v18  ;;  %v3509_v11 = vpop.f32.mrf.mxu0  ;;  %v5971_v26 = vld [vmem:[%s8333_s29 + $0x6e8] sm:$0xf0] }
 0x152   : > { %v7682_v33 = vld [vmem:[%s8333_s29 + $0x8a4] sm:$0xf0] }
 0x153   : > { %v6449_v34 = vld [vmem:[%s8333_s29 + $0xa88] sm:$0xf]  ;;  %v6194_v46 = vor.u32 %v7682_v33, %v6193_v32  ;;  %3751 = vmatpush.bf16.msrb.mxu3 %v6994_v35  ;;  %v3471_v32 = vadd.f32 %v3470_v47, %v3457_v44  ;;  %v7454_v33 = vld [vmem:[%s8333_s29 + $0x18c] sm:$0xf]  ;;  %v3522_v18 = vpop.f32.mrf.mxu1 }
 0x154   : > { %v7746_v36 = vld [vmem:[%s8333_s29 + $0xaa4] sm:$0xf0]  ;;  %v7518_v35 = vld [vmem:[%s8333_s29 + $0x38c] sm:$0xf] }
 0x155   : > { %v6705_v37 = vld [vmem:[%s8333_s29 + $0xc88] sm:$0xf]  ;;  %v6450_v48 = vor.u32 %v7746_v36, %v6449_v34  ;;  %3713 = vmatpush.bf16.msrb.mxu0 %v6194_v46  ;;  %v5299_v34 = vld [vmem:[%s8333_s29 + $0x1a8] sm:$0xf0]  ;;  %v6102_v36 = vor.u32 %v7654_v24, %v6099_v25 }
 0x156   : > { %v7810_v38 = vld [vmem:[%s8333_s29 + $0xca4] sm:$0xf0]  ;;  %v6067_v46 = vld [vmem:[%s8333_s29 + $0x7a8] sm:$0xf0]  ;;  %v5302_v44 = vor.u32 %v7454_v33, %v5299_v34 }
 0x157   : > { %v6961_v40 = vld [vmem:[%s8333_s29 + $0xe88] sm:$0xf]  ;;  %v6706_v49 = vor.u32 %v7810_v38, %v6705_v37  ;;  %3726 = vmatpush.bf16.msrb.mxu1 %v6450_v48  ;;  %v5555_v37 = vld [vmem:[%s8333_s29 + $0x3a8] sm:$0xf0]  ;;  %v3535_v34 = vpop.f32.mrf.mxu2 }
 0x158   : > { %v7874_v41 = vld [vmem:[%s8333_s29 + $0xea4] sm:$0xf0]  ;;  %v7582_v38 = vld [vmem:[%s8333_s29 + $0x58c] sm:$0xf]  ;;  %v5558_v47 = vor.u32 %v7518_v35, %v5555_v37 }
 0x159   : > { %v6161_v50 = vld [vmem:[%s8333_s29 + $0x848] sm:$0xf]  ;;  %v6962_v54 = vor.u32 %v7874_v41, %v6961_v40  ;;  %3739 = vmatpush.bf16.msrb.mxu2 %v6706_v49  ;;  %v5811_v40 = vld [vmem:[%s8333_s29 + $0x5a8] sm:$0xf0]  ;;  %v3484_v49 = vadd.f32 %v8761_v53, %v3471_v32 }
 0x15a   : > { %v7674_v51 = vld [vmem:[%s8333_s29 + $0x864] sm:$0xf0]  ;;  %v7646_v41 = vld [vmem:[%s8333_s29 + $0x78c] sm:$0xf]  ;;  %v5814_v48 = vor.u32 %v7582_v38, %v5811_v40 }
 0x15b   : > { %v6417_v52 = vld [vmem:[%s8333_s29 + $0xa48] sm:$0xf]  ;;  %v6162_v61 = vor.u32 %v7674_v51, %v6161_v50  ;;  %3752 = vmatpush.bf16.msrb.mxu3 %v6962_v54  ;;  %v7446_v50 = vld [vmem:[%s8333_s29 + $0x14c] sm:$0xf]  ;;  %v6070_v54 = vor.u32 %v7646_v41, %v6067_v46  ;;  %v3548_v41 = vpop.f32.mrf.mxu3 }
 0x15c   : > { %v7738_v55 = vld [vmem:[%s8333_s29 + $0xa64] sm:$0xf0]  ;;  %v5267_v51 = vld [vmem:[%s8333_s29 + $0x168] sm:$0xf0] }
 0x15d   : > { %v6673_v56 = vld [vmem:[%s8333_s29 + $0xc48] sm:$0xf]  ;;  %v6418_v0 = vor.u32 %v7738_v55, %v6417_v52  ;;  %3714 = vmatpush.bf16.msrb.mxu0 %v6162_v61  ;;  %v7510_v52 = vld [vmem:[%s8333_s29 + $0x34c] sm:$0xf]  ;;  %v3497_v61 = vadd.f32 %v8766_v58, %v3484_v49 }
 0x15e   : > { %v7802_v57 = vld [vmem:[%s8333_s29 + $0xc64] sm:$0xf0]  ;;  %v5523_v55 = vld [vmem:[%s8333_s29 + $0x368] sm:$0xf0] }
 0x15f   : > { %v6929_v59 = vld [vmem:[%s8333_s29 + $0xe48] sm:$0xf]  ;;  %v6674_v1 = vor.u32 %v7802_v57, %v6673_v56  ;;  %3727 = vmatpush.bf16.msrb.mxu1 %v6418_v0  ;;  %v7574_v56 = vld [vmem:[%s8333_s29 + $0x54c] sm:$0xf]  ;;  %v3510_v17 = vadd.f32 %v3509_v11, %v3497_v61 }
 0x160   : > { %v7866_v60 = vld [vmem:[%s8333_s29 + $0xe64] sm:$0xf0]  ;;  %v5779_v57 = vld [vmem:[%s8333_s29 + $0x568] sm:$0xf0] }
 0x161   : > { %v6129_v62 = vld [vmem:[%s8333_s29 + $0x808] sm:$0xf]  ;;  %v6930_v6 = vor.u32 %v7866_v60, %v6929_v59  ;;  %3740 = vmatpush.bf16.msrb.mxu2 %v6674_v1  ;;  %v7638_v59 = vld [vmem:[%s8333_s29 + $0x74c] sm:$0xf]  ;;  %v5270_v60 = vor.u32 %v7446_v50, %v5267_v51  ;;  %v3511_v50 = vpop.f32.mrf.mxu0 }
 0x162   : > { %v7666_v63 = vld [vmem:[%s8333_s29 + $0x824] sm:$0xf0]  ;;  %v6035_v53 = vld [vmem:[%s8333_s29 + $0x768] sm:$0xf0] }
 0x163   : > { %v6385_v2 = vld [vmem:[%s8333_s29 + $0xa08] sm:$0xf]  ;;  %v6130_v15 = vor.u32 %v7666_v63, %v6129_v62  ;;  %3753 = vmatpush.bf16.msrb.mxu3 %v6930_v6  ;;  %v5526_v62 = vor.u32 %v7510_v52, %v5523_v55  ;;  %v5782_v63 = vor.u32 %v7574_v56, %v5779_v57  ;;  %v7438_v0 = vld [vmem:[%s8333_s29 + $0x10c] sm:$0xf]  ;;  %v3524_v57 = vpop.f32.mrf.mxu1 }
 0x164   : > { %v7730_v3 = vld [vmem:[%s8333_s29 + $0xa24] sm:$0xf0]  ;;  %v5235_v1 = vld [vmem:[%s8333_s29 + $0x128] sm:$0xf0] }
 0x165   : > { %v6641_v4 = vld [vmem:[%s8333_s29 + $0xc08] sm:$0xf]  ;;  %v6386_v20 = vor.u32 %v7730_v3, %v6385_v2  ;;  %3715 = vmatpush.bf16.msrb.mxu0 %v6130_v15  ;;  %v7502_v2 = vld [vmem:[%s8333_s29 + $0x30c] sm:$0xf]  ;;  %v6038_v3 = vor.u32 %v7638_v59, %v6035_v53  ;;  %v5238_v58 = vor.u32 %v7438_v0, %v5235_v1 }
 0x166   : > { %v7794_v8 = vld [vmem:[%s8333_s29 + $0xc24] sm:$0xf0]  ;;  %v7566_v6 = vld [vmem:[%s8333_s29 + $0x50c] sm:$0xf] }
 0x167   : > { %v6897_v9 = vld [vmem:[%s8333_s29 + $0xe08] sm:$0xf]  ;;  %v6642_v23 = vor.u32 %v7794_v8, %v6641_v4  ;;  %3728 = vmatpush.bf16.msrb.mxu1 %v6386_v20  ;;  %v5491_v4 = vld [vmem:[%s8333_s29 + $0x328] sm:$0xf0] }
 0x168   : > { %v7858_v10 = vld [vmem:[%s8333_s29 + $0xe24] sm:$0xf0]  ;;  %3716 = vmatmul.bf16.vlgmr.msrb.gmra.mxu0 %v8512_v42  ;;  %v5747_v8 = vld [vmem:[%s8333_s29 + $0x528] sm:$0xf0]  ;;  %v5494_v12 = vor.u32 %v7502_v2, %v5491_v4 }
 0x169   : > { %v6898_v27 = vor.u32 %v7858_v10, %v6897_v9  ;;  %3741 = vmatpush.bf16.msrb.mxu2 %v6642_v23  ;;  %3760 = vmatpush.bf16.msra.mxu0 %v5334_v28  ;;  %v7630_v9 = vld [vmem:[%s8333_s29 + $0x70c] sm:$0xf]  ;;  %v5750_v13 = vor.u32 %v7566_v6, %v5747_v8 }
 0x16a   : > { %3729 = vmatmul.bf16.vlgmr.msrb.gmra.mxu1 %v8516_v45  ;;  %v6003_v10 = vld [vmem:[%s8333_s29 + $0x728] sm:$0xf0] }
 0x16b   : > { %3754 = vmatpush.bf16.msrb.mxu3 %v6898_v27  ;;  %3773 = vmatpush.bf16.msra.mxu1 %v5590_v30  ;;  %v5203_v15 = vld [vmem:[%s8333_s29 + $0xe8] sm:$0xf0]  ;;  %v6006_v19 = vor.u32 %v7630_v9, %v6003_v10  ;;  %v3523_v27 = vadd.f32 %v3522_v18, %v3510_v17 }
 0x16c   : > { %3742 = vmatmul.bf16.vlgmr.msrb.gmra.mxu2 %v8508_v39  ;;  %v5459_v20 = vld [vmem:[%s8333_s29 + $0x2e8] sm:$0xf0]  ;;  %v5206_v28 = vor.u32 %v7430_v14, %v5203_v15  ;;  %v3550_v15 = vpop.f32.mrf.mxu3 }
 0x16d   : > { %3786 = vmatpush.bf16.msra.mxu2 %v5846_v31  ;;  %3761 = vmatpush.bf16.msra.mxu0 %v5302_v44  ;;  %v7558_v23 = vld [vmem:[%s8333_s29 + $0x4cc] sm:$0xf]  ;;  %v5462_v29 = vor.u32 %v7494_v16, %v5459_v20  ;;  %v3536_v40 = vadd.f32 %v3535_v34, %v3523_v27  ;;  %v8889_v15 = vpop.f32.mrf.mxu1 }
 0x16e   : > { %3755 = vmatmul.bf16.vlgmr.msrb.gmra.mxu3 %v8514_v43  ;;  %v5715_v24 = vld [vmem:[%s8333_s29 + $0x4e8] sm:$0xf0] }
 0x16f   : > { %3799 = vmatpush.bf16.msra.mxu3 %v6102_v36  ;;  %3774 = vmatpush.bf16.msra.mxu1 %v5558_v47  ;;  %v7622_v25 = vld [vmem:[%s8333_s29 + $0x6cc] sm:$0xf]  ;;  %v5718_v30 = vor.u32 %v7558_v23, %v5715_v24  ;;  %v340_v47 = vld [vmem:[#allocation2 + $0x30] sm:$0xff]  ;;  %v3549_v49 = vadd.f32 %v3548_v41, %v3536_v40 }
 0x170   : > { %v7422_v31 = vld [vmem:[%s8333_s29 + $0x8c] sm:$0xf]  ;;  %v5974_v35 = vor.u32 %v7622_v25, %v5971_v26 }
 0x171   : > { %3787 = vmatpush.bf16.msra.mxu2 %v5814_v48  ;;  %3762 = vmatpush.bf16.msra.mxu0 %v5270_v60  ;;  %v5171_v32 = vld [vmem:[%s8333_s29 + $0xa8] sm:$0xf0]  ;;  %v4280_v53 = vadd.f32 %v3549_v49, %v340_v47 }
 0x172   : > { %v7486_v33 = vld [vmem:[%s8333_s29 + $0x28c] sm:$0xf]  ;;  %v5174_v48 = vor.u32 %v7422_v31, %v5171_v32 }
 0x173   : > { %3800 = vmatpush.bf16.msra.mxu3 %v6070_v54  ;;  %3775 = vmatpush.bf16.msra.mxu1 %v5526_v62  ;;  %v5427_v36 = vld [vmem:[%s8333_s29 + $0x2a8] sm:$0xf0]  ;;  %4288 = vst [vmem:[#allocation2 + $0x30] sm:$0xff] %v4280_v53 }
 0x174   : > { %v7550_v37 = vld [vmem:[%s8333_s29 + $0x48c] sm:$0xf]  ;;  %v5430_v51 = vor.u32 %v7486_v33, %v5427_v36 }
 0x175   : > { %3788 = vmatpush.bf16.msra.mxu2 %v5782_v63  ;;  %3763 = vmatpush.bf16.msra.mxu0 %v5238_v58  ;;  %v5683_v38 = vld [vmem:[%s8333_s29 + $0x4a8] sm:$0xf0]  ;;  %v3537_v58 = vpop.f32.mrf.mxu2 }
 0x176   : > { %v7614_v46 = vld [vmem:[%s8333_s29 + $0x68c] sm:$0xf]  ;;  %v5686_v52 = vor.u32 %v7550_v37, %v5683_v38 }
 0x177   : > { %3801 = vmatpush.bf16.msra.mxu3 %v6038_v3  ;;  %3776 = vmatpush.bf16.msra.mxu1 %v5494_v12  ;;  %v5939_v44 = vld [vmem:[%s8333_s29 + $0x6a8] sm:$0xf0] }
 0x178   : > { %v7414_v54 = vld [vmem:[%s8333_s29 + $0x4c] sm:$0xf]  ;;  %v5942_v59 = vor.u32 %v7614_v46, %v5939_v44 }
 0x179   : > { %3789 = vmatpush.bf16.msra.mxu2 %v5750_v13  ;;  %3764 = vmatpush.bf16.msra.mxu0 %v5206_v28  ;;  %v5139_v55 = vld [vmem:[%s8333_s29 + $0x68] sm:$0xf0] }
 0x17a   : > { %v7478_v56 = vld [vmem:[%s8333_s29 + $0x24c] sm:$0xf]  ;;  %v5142_v1 = vor.u32 %v7414_v54, %v5139_v55 }
 0x17b   : > { %3802 = vmatpush.bf16.msra.mxu3 %v6006_v19  ;;  %3777 = vmatpush.bf16.msra.mxu1 %v5462_v29  ;;  %v5395_v60 = vld [vmem:[%s8333_s29 + $0x268] sm:$0xf0] }
 0x17c   : > { %v7542_v61 = vld [vmem:[%s8333_s29 + $0x44c] sm:$0xf]  ;;  %v5398_v4 = vor.u32 %v7478_v56, %v5395_v60 }
 0x17d   : > { %3790 = vmatpush.bf16.msra.mxu2 %v5718_v30  ;;  %v5651_v62 = vld [vmem:[%s8333_s29 + $0x468] sm:$0xf0]  ;;  %3765 = vmatpush.bf16.msra.mxu0 %v5174_v48 }
 0x17e   : > { %v7606_v63 = vld [vmem:[%s8333_s29 + $0x64c] sm:$0xf]  ;;  %v5654_v6 = vor.u32 %v7542_v61, %v5651_v62 }
 0x17f   : > { %3803 = vmatpush.bf16.msra.mxu3 %v5974_v35  ;;  %v5907_v0 = vld [vmem:[%s8333_s29 + $0x668] sm:$0xf0]  ;;  %3778 = vmatpush.bf16.msra.mxu1 %v5430_v51 }
 0x180   : > { %v7406_v2 = vld [vmem:[%s8333_s29 + $0xc] sm:$0xf]  ;;  %v5910_v11 = vor.u32 %v7606_v63, %v5907_v0 }
 0x181   : > { %v5107_v3 = vld [vmem:[%s8333_s29 + $0x28] sm:$0xf0]  ;;  %3791 = vmatpush.bf16.msra.mxu2 %v5686_v52  ;;  %3766 = vmatpush.bf16.msra.mxu0 %v5142_v1 }
 0x182   : > { %v7470_v8 = vld [vmem:[%s8333_s29 + $0x20c] sm:$0xf]  ;;  %v5110_v19 = vor.u32 %v7406_v2, %v5107_v3 }
 0x183   : > { %v5363_v9 = vld [vmem:[%s8333_s29 + $0x228] sm:$0xf0]  ;;  %3804 = vmatpush.bf16.msra.mxu3 %v5942_v59  ;;  %3779 = vmatpush.bf16.msra.mxu1 %v5398_v4 }
 0x184   : > { %v7534_v10 = vld [vmem:[%s8333_s29 + $0x40c] sm:$0xf]  ;;  %v5366_v25 = vor.u32 %v7470_v8, %v5363_v9 }
 0x185   : > { %v5619_v12 = vld [vmem:[%s8333_s29 + $0x428] sm:$0xf0]  ;;  %3792 = vmatpush.bf16.msra.mxu2 %v5654_v6  ;;  %3767 = vmatpush.bf16.msra.mxu0 %v5110_v19 }
 0x186   : > { %v7598_v13 = vld [vmem:[%s8333_s29 + $0x60c] sm:$0xf]  ;;  %v5622_v26 = vor.u32 %v7534_v10, %v5619_v12  ;;  %v8884_v10 = vpop.f32.mrf.mxu0 }
 0x187   : > { %v5875_v14 = vld [vmem:[%s8333_s29 + $0x628] sm:$0xf0]  ;;  %3805 = vmatpush.bf16.msra.mxu3 %v5910_v11  ;;  %3780 = vmatpush.bf16.msra.mxu1 %v5366_v25 }
 0x188   : > { %v7718_v16 = vld [vmem:[%s8333_s29 + $0x9cc] sm:$0xf]  ;;  %v5878_v29 = vor.u32 %v7598_v13, %v5875_v14  ;;  %3768 = vmatmul.bf16.vlgmr.msra.gmra.mxu0 %v8453_v21 }
 0x189   : > { %v6355_v17 = vld [vmem:[%s8333_s29 + $0x9e8] sm:$0xf0]  ;;  %3793 = vmatpush.bf16.msra.mxu2 %v5622_v26 }
 0x18a   : > { %v7782_v18 = vld [vmem:[%s8333_s29 + $0xbcc] sm:$0xf]  ;;  %v6358_v30 = vor.u32 %v7718_v16, %v6355_v17  ;;  %3781 = vmatmul.bf16.vlgmr.msra.gmra.mxu1 %v8456_v22 }
 0x18b   : > { %v6611_v20 = vld [vmem:[%s8333_s29 + $0xbe8] sm:$0xf0]  ;;  %3806 = vmatpush.bf16.msra.mxu3 %v5878_v29 }
 0x18c   : > { %v7846_v23 = vld [vmem:[%s8333_s29 + $0xdcc] sm:$0xf]  ;;  %v6614_v31 = vor.u32 %v7782_v18, %v6611_v20  ;;  %3812 = vmatpush.bf16.msrb.mxu0 %v6358_v30  ;;  %3794 = vmatmul.bf16.vlgmr.msra.gmra.mxu2 %v8439_v5  ;;  %v8899_v30 = vpop.f32.mrf.mxu2 }
 0x18d   : > { %v6867_v24 = vld [vmem:[%s8333_s29 + $0xde8] sm:$0xf0] }
 0x18e   : > { %v7910_v27 = vld [vmem:[%s8333_s29 + $0xfcc] sm:$0xf]  ;;  %v6870_v32 = vor.u32 %v7846_v23, %v6867_v24  ;;  %3825 = vmatpush.bf16.msrb.mxu1 %v6614_v31  ;;  %3807 = vmatmul.bf16.vlgmr.msra.gmra.mxu3 %v8442_v7 }
 0x18f   : > { %v7123_v28 = vld [vmem:[%s8333_s29 + $0xfe8] sm:$0xf0] }
 0x190   : > { %v7710_v33 = vld [vmem:[%s8333_s29 + $0x98c] sm:$0xf]  ;;  %v7126_v36 = vor.u32 %v7910_v27, %v7123_v28  ;;  %3838 = vmatpush.bf16.msrb.mxu2 %v6870_v32 }
 0x191   : > { %v6323_v34 = vld [vmem:[%s8333_s29 + $0x9a8] sm:$0xf0] }
 0x192   : > { %v7774_v35 = vld [vmem:[%s8333_s29 + $0xb8c] sm:$0xf]  ;;  %v6326_v44 = vor.u32 %v7710_v33, %v6323_v34  ;;  %3851 = vmatpush.bf16.msrb.mxu3 %v7126_v36 }
 0x193   : > { %v6579_v37 = vld [vmem:[%s8333_s29 + $0xba8] sm:$0xf0] }
 0x194   : > { %v7838_v38 = vld [vmem:[%s8333_s29 + $0xd8c] sm:$0xf]  ;;  %v6582_v47 = vor.u32 %v7774_v35, %v6579_v37  ;;  %3813 = vmatpush.bf16.msrb.mxu0 %v6326_v44  ;;  %v8904_v35 = vpop.f32.mrf.mxu3 }
 0x195   : > { %v6835_v40 = vld [vmem:[%s8333_s29 + $0xda8] sm:$0xf0] }
 0x196   : > { %v7902_v41 = vld [vmem:[%s8333_s29 + $0xf8c] sm:$0xf]  ;;  %v6838_v48 = vor.u32 %v7838_v38, %v6835_v40  ;;  %3826 = vmatpush.bf16.msrb.mxu1 %v6582_v47  ;;  %v3563_v40 = vpop.f32.mrf.mxu0 }
 0x197   : > { %v7091_v46 = vld [vmem:[%s8333_s29 + $0xfa8] sm:$0xf0] }
 0x198   : > { %v7702_v49 = vld [vmem:[%s8333_s29 + $0x94c] sm:$0xf]  ;;  %v7094_v52 = vor.u32 %v7902_v41, %v7091_v46  ;;  %3839 = vmatpush.bf16.msrb.mxu2 %v6838_v48 }
 0x199   : > { %v6291_v50 = vld [vmem:[%s8333_s29 + $0x968] sm:$0xf0] }
 0x19a   : > { %v7766_v51 = vld [vmem:[%s8333_s29 + $0xb4c] sm:$0xf]  ;;  %v6294_v53 = vor.u32 %v7702_v49, %v6291_v50  ;;  %3852 = vmatpush.bf16.msrb.mxu3 %v7094_v52  ;;  %v3576_v49 = vpop.f32.mrf.mxu1 }
 0x19b   : > { %v6547_v54 = vld [vmem:[%s8333_s29 + $0xb68] sm:$0xf0]  ;;  %v7515_v49 = vld [vmem:[%s8333_s29 + $0x36c] sm:$0xf0] }
 0x19c   : > { %v7830_v55 = vld [vmem:[%s8333_s29 + $0xd4c] sm:$0xf]  ;;  %v6550_v60 = vor.u32 %v7766_v51, %v6547_v54  ;;  %3814 = vmatpush.bf16.msrb.mxu0 %v6294_v53 }
 0x19d   : > { %v6803_v56 = vld [vmem:[%s8333_s29 + $0xd68] sm:$0xf0] }
 0x19e   : > { %v7894_v57 = vld [vmem:[%s8333_s29 + $0xf4c] sm:$0xf]  ;;  %v6806_v61 = vor.u32 %v7830_v55, %v6803_v56  ;;  %3827 = vmatpush.bf16.msrb.mxu1 %v6550_v60 }
 0x19f   : > { %v7059_v59 = vld [vmem:[%s8333_s29 + $0xf68] sm:$0xf0] }
 0x1a0   : > { %v7694_v62 = vld [vmem:[%s8333_s29 + $0x90c] sm:$0xf]  ;;  %v7062_v1 = vor.u32 %v7894_v57, %v7059_v59  ;;  %3840 = vmatpush.bf16.msrb.mxu2 %v6806_v61 }
 0x1a1   : > { %v6259_v63 = vld [vmem:[%s8333_s29 + $0x928] sm:$0xf0] }
 0x1a2   : > { %v7758_v0 = vld [vmem:[%s8333_s29 + $0xb0c] sm:$0xf]  ;;  %v6262_v9 = vor.u32 %v7694_v62, %v6259_v63  ;;  %3853 = vmatpush.bf16.msrb.mxu3 %v7062_v1  ;;  %v3589_v1 = vpop.f32.mrf.mxu2 }
 0x1a3   : > { %v6515_v2 = vld [vmem:[%s8333_s29 + $0xb28] sm:$0xf0]  ;;  %v6009_v1 = vld [vmem:[%s8333_s29 + $0x710] sm:$0xf] }
 0x1a4   : > { %v7822_v3 = vld [vmem:[%s8333_s29 + $0xd0c] sm:$0xf]  ;;  %v6518_v58 = vor.u32 %v7758_v0, %v6515_v2  ;;  %3815 = vmatpush.bf16.msrb.mxu0 %v6262_v9  ;;  %v5337_v9 = vld [vmem:[%s8333_s29 + $0x1d0] sm:$0xf] }
 0x1a5   : > { %v6771_v4 = vld [vmem:[%s8333_s29 + $0xd28] sm:$0xf0] }
 0x1a6   : > { %v7886_v6 = vld [vmem:[%s8333_s29 + $0xf0c] sm:$0xf]  ;;  %v6774_v11 = vor.u32 %v7822_v3, %v6771_v4  ;;  %3828 = vmatpush.bf16.msrb.mxu1 %v6518_v58  ;;  %v7467_v58 = vld [vmem:[%s8333_s29 + $0x1ec] sm:$0xf0] }
 0x1a7   : > { %v7027_v8 = vld [vmem:[%s8333_s29 + $0xf28] sm:$0xf0] }
 0x1a8   : > { %v7686_v12 = vld [vmem:[%s8333_s29 + $0x8cc] sm:$0xf]  ;;  %v7030_v16 = vor.u32 %v7886_v6, %v7027_v8  ;;  %3841 = vmatpush.bf16.msrb.mxu2 %v6774_v11  ;;  %v3602_v8 = vpop.f32.mrf.mxu3  ;;  %v5593_v11 = vld [vmem:[%s8333_s29 + $0x3d0] sm:$0xf] }
 0x1a9   : > { %v6227_v13 = vld [vmem:[%s8333_s29 + $0x8e8] sm:$0xf0]  ;;  %v5209_v8 = vld [vmem:[%s8333_s29 + $0xd0] sm:$0xf] }
 0x1aa   : > { %v7750_v14 = vld [vmem:[%s8333_s29 + $0xacc] sm:$0xf]  ;;  %v6230_v24 = vor.u32 %v7686_v12, %v6227_v13  ;;  %3854 = vmatpush.bf16.msrb.mxu3 %v7030_v16  ;;  %v7531_v13 = vld [vmem:[%s8333_s29 + $0x3ec] sm:$0xf0] }
 0x1ab   : > { %v6483_v17 = vld [vmem:[%s8333_s29 + $0xae8] sm:$0xf0]  ;;  %v7595_v16 = vld [vmem:[%s8333_s29 + $0x5ec] sm:$0xf0] }
 0x1ac   : > { %v7814_v18 = vld [vmem:[%s8333_s29 + $0xccc] sm:$0xf]  ;;  %v6486_v25 = vor.u32 %v7750_v14, %v6483_v17  ;;  %3816 = vmatpush.bf16.msrb.mxu0 %v6230_v24  ;;  %v5849_v14 = vld [vmem:[%s8333_s29 + $0x5d0] sm:$0xf]  ;;  %v5338_v24 = vor.u32 %v7467_v58, %v5337_v9 }
 0x1ad   : > { %v6739_v19 = vld [vmem:[%s8333_s29 + $0xce8] sm:$0xf0]  ;;  %v7435_v9 = vld [vmem:[%s8333_s29 + $0xec] sm:$0xf0] }
 0x1ae   : > { %v7878_v20 = vld [vmem:[%s8333_s29 + $0xecc] sm:$0xf]  ;;  %v6742_v26 = vor.u32 %v7814_v18, %v6739_v19  ;;  %3829 = vmatpush.bf16.msrb.mxu1 %v6486_v25  ;;  %v6105_v19 = vld [vmem:[%s8333_s29 + $0x7d0] sm:$0xf]  ;;  %v5594_v25 = vor.u32 %v7531_v13, %v5593_v11 }
 0x1af   : > { %v6995_v23 = vld [vmem:[%s8333_s29 + $0xee8] sm:$0xf0]  ;;  %v5465_v58 = vld [vmem:[%s8333_s29 + $0x2d0] sm:$0xf] }
 0x1b0   : > { %v7678_v27 = vld [vmem:[%s8333_s29 + $0x88c] sm:$0xf]  ;;  %v6998_v31 = vor.u32 %v7878_v20, %v6995_v23  ;;  %3842 = vmatpush.bf16.msrb.mxu2 %v6742_v26  ;;  %v7659_v20 = vld [vmem:[%s8333_s29 + $0x7ec] sm:$0xf0]  ;;  %v5850_v26 = vor.u32 %v7595_v16, %v5849_v14 }
 0x1b1   : > { %v6195_v28 = vld [vmem:[%s8333_s29 + $0x8a8] sm:$0xf0]  ;;  %v7499_v14 = vld [vmem:[%s8333_s29 + $0x2ec] sm:$0xf0] }
 0x1b2   : > { %v7742_v29 = vld [vmem:[%s8333_s29 + $0xa8c] sm:$0xf]  ;;  %v6198_v38 = vor.u32 %v7678_v27, %v6195_v28  ;;  %3855 = vmatpush.bf16.msrb.mxu3 %v6998_v31  ;;  %v3575_v27 = vadd.f32 %v8889_v15, %v8884_v10  ;;  %v5305_v28 = vld [vmem:[%s8333_s29 + $0x190] sm:$0xf] }
 0x1b3   : > { %v6451_v32 = vld [vmem:[%s8333_s29 + $0xaa8] sm:$0xf0]  ;;  %v5561_v31 = vld [vmem:[%s8333_s29 + $0x390] sm:$0xf] }
 0x1b4   : > { %v7806_v33 = vld [vmem:[%s8333_s29 + $0xc8c] sm:$0xf]  ;;  %v6454_v41 = vor.u32 %v7742_v29, %v6451_v32  ;;  %3817 = vmatpush.bf16.msrb.mxu0 %v6198_v38  ;;  %v7459_v29 = vld [vmem:[%s8333_s29 + $0x1ac] sm:$0xf0]  ;;  %v6106_v32 = vor.u32 %v7659_v20, %v6105_v19 }
 0x1b5   : > { %v6707_v34 = vld [vmem:[%s8333_s29 + $0xca8] sm:$0xf0]  ;;  %v7651_v38 = vld [vmem:[%s8333_s29 + $0x7ac] sm:$0xf0]  ;;  %v5306_v10 = vor.u32 %v7459_v29, %v5305_v28  ;;  %v3639_v29 = vpop.f32.mrf.mxu2 }
 0x1b6   : > { %v7870_v36 = vld [vmem:[%s8333_s29 + $0xe8c] sm:$0xf]  ;;  %v6710_v46 = vor.u32 %v7806_v33, %v6707_v34  ;;  %3830 = vmatpush.bf16.msrb.mxu1 %v6454_v41  ;;  %v7523_v33 = vld [vmem:[%s8333_s29 + $0x3ac] sm:$0xf0]  ;;  %v3588_v41 = vadd.f32 %v8899_v30, %v3575_v27 }
 0x1b7   : > { %v6963_v37 = vld [vmem:[%s8333_s29 + $0xea8] sm:$0xf0]  ;;  %v5817_v34 = vld [vmem:[%s8333_s29 + $0x590] sm:$0xf]  ;;  %v5562_v15 = vor.u32 %v7523_v33, %v5561_v31 }
 0x1b8   : > { %v7670_v44 = vld [vmem:[%s8333_s29 + $0x84c] sm:$0xf]  ;;  %v6966_v50 = vor.u32 %v7870_v36, %v6963_v37  ;;  %3843 = vmatpush.bf16.msrb.mxu2 %v6710_v46  ;;  %v7587_v36 = vld [vmem:[%s8333_s29 + $0x5ac] sm:$0xf0] }
 0x1b9   : > { %v6163_v47 = vld [vmem:[%s8333_s29 + $0x868] sm:$0xf0]  ;;  %v6073_v37 = vld [vmem:[%s8333_s29 + $0x790] sm:$0xf]  ;;  %v5818_v40 = vor.u32 %v7587_v36, %v5817_v34 }
 0x1ba   : > { %v7734_v48 = vld [vmem:[%s8333_s29 + $0xa4c] sm:$0xf]  ;;  %v6166_v57 = vor.u32 %v7670_v44, %v6163_v47  ;;  %3856 = vmatpush.bf16.msrb.mxu3 %v6966_v50  ;;  %v5273_v46 = vld [vmem:[%s8333_s29 + $0x150] sm:$0xf] }
 0x1bb   : > { %v6419_v51 = vld [vmem:[%s8333_s29 + $0xa68] sm:$0xf0]  ;;  %v7451_v44 = vld [vmem:[%s8333_s29 + $0x16c] sm:$0xf0] }
 0x1bc   : > { %v7798_v52 = vld [vmem:[%s8333_s29 + $0xc4c] sm:$0xf]  ;;  %v6422_v60 = vor.u32 %v7734_v48, %v6419_v51  ;;  %3818 = vmatpush.bf16.msrb.mxu0 %v6166_v57  ;;  %v5529_v47 = vld [vmem:[%s8333_s29 + $0x350] sm:$0xf]  ;;  %v6074_v48 = vor.u32 %v7651_v38, %v6073_v37  ;;  %v3652_v37 = vpop.f32.mrf.mxu3 }
 0x1bd   : > { %v6675_v54 = vld [vmem:[%s8333_s29 + $0xc68] sm:$0xf0]  ;;  %v5785_v50 = vld [vmem:[%s8333_s29 + $0x550] sm:$0xf] }
 0x1be   : > { %v7862_v55 = vld [vmem:[%s8333_s29 + $0xe4c] sm:$0xf]  ;;  %v6678_v61 = vor.u32 %v7798_v52, %v6675_v54  ;;  %3831 = vmatpush.bf16.msrb.mxu1 %v6422_v60  ;;  %v7579_v51 = vld [vmem:[%s8333_s29 + $0x56c] sm:$0xf0]  ;;  %v5274_v54 = vor.u32 %v7451_v44, %v5273_v46 }
 0x1bf   : > { %v6931_v56 = vld [vmem:[%s8333_s29 + $0xe68] sm:$0xf0]  ;;  %v6041_v52 = vld [vmem:[%s8333_s29 + $0x750] sm:$0xf]  ;;  %v5786_v57 = vor.u32 %v7579_v51, %v5785_v50 }
 0x1c0   : > { %v7662_v59 = vld [vmem:[%s8333_s29 + $0x80c] sm:$0xf]  ;;  %v6934_v2 = vor.u32 %v7862_v55, %v6931_v56  ;;  %3844 = vmatpush.bf16.msrb.mxu2 %v6678_v61  ;;  %v7643_v30 = vld [vmem:[%s8333_s29 + $0x76c] sm:$0xf0]  ;;  %v3601_v55 = vadd.f32 %v8904_v35, %v3588_v41  ;;  %v5530_v56 = vor.u32 %v7515_v49, %v5529_v47 }
 0x1c1   : > { %v6131_v53 = vld [vmem:[%s8333_s29 + $0x828] sm:$0xf0]  ;;  %v5497_v60 = vld [vmem:[%s8333_s29 + $0x310] sm:$0xf]  ;;  %v6042_v61 = vor.u32 %v7643_v30, %v6041_v52 }
 0x1c2   : > { %v7726_v62 = vld [vmem:[%s8333_s29 + $0xa0c] sm:$0xf]  ;;  %v6134_v12 = vor.u32 %v7662_v59, %v6131_v53  ;;  %3857 = vmatpush.bf16.msrb.mxu3 %v6934_v2  ;;  %v5241_v59 = vld [vmem:[%s8333_s29 + $0x110] sm:$0xf] }
 0x1c3   : > { %v6387_v63 = vld [vmem:[%s8333_s29 + $0xa28] sm:$0xf0]  ;;  %v7443_v53 = vld [vmem:[%s8333_s29 + $0x12c] sm:$0xf0] }
 0x1c4   : > { %v7790_v0 = vld [vmem:[%s8333_s29 + $0xc0c] sm:$0xf]  ;;  %v6390_v17 = vor.u32 %v7726_v62, %v6387_v63  ;;  %3819 = vmatpush.bf16.msrb.mxu0 %v6134_v12  ;;  %v7507_v62 = vld [vmem:[%s8333_s29 + $0x32c] sm:$0xf0]  ;;  %v5242_v35 = vor.u32 %v7443_v53, %v5241_v59  ;;  %v3626_v12 = vpop.f32.mrf.mxu1 }
 0x1c5   : > { %v6643_v3 = vld [vmem:[%s8333_s29 + $0xc28] sm:$0xf0]  ;;  %v5753_v63 = vld [vmem:[%s8333_s29 + $0x510] sm:$0xf] }
 0x1c6   : > { %v7854_v4 = vld [vmem:[%s8333_s29 + $0xe0c] sm:$0xf]  ;;  %v6646_v18 = vor.u32 %v7790_v0, %v6643_v3  ;;  %3832 = vmatpush.bf16.msrb.mxu1 %v6390_v17  ;;  %v7571_v0 = vld [vmem:[%s8333_s29 + $0x52c] sm:$0xf0]  ;;  %v3613_v3 = vpop.f32.mrf.mxu0 }
 0x1c7   : > { %v6899_v6 = vld [vmem:[%s8333_s29 + $0xe28] sm:$0xf0]  ;;  %3820 = vmatmul.bf16.vlgmr.msrb.gmra.mxu0 %v8512_v42  ;;  %v7635_v2 = vld [vmem:[%s8333_s29 + $0x72c] sm:$0xf0]  ;;  %v3614_v11 = vadd.f32 %v3613_v3, %v3601_v55 }
 0x1c8   : > { %v6902_v23 = vor.u32 %v7854_v4, %v6899_v6  ;;  %3845 = vmatpush.bf16.msrb.mxu2 %v6646_v18  ;;  %3864 = vmatpush.bf16.msra.mxu0 %v5338_v24  ;;  %v5498_v4 = vor.u32 %v7507_v62, %v5497_v60  ;;  %v5754_v6 = vor.u32 %v7571_v0, %v5753_v63  ;;  %v5721_v16 = vld [vmem:[%s8333_s29 + $0x4d0] sm:$0xf] }
 0x1c9   : > { %3833 = vmatmul.bf16.vlgmr.msrb.gmra.mxu1 %v8516_v45  ;;  %v6010_v13 = vor.u32 %v7635_v2, %v6009_v1  ;;  %v7563_v17 = vld [vmem:[%s8333_s29 + $0x4ec] sm:$0xf0]  ;;  %v3627_v20 = vadd.f32 %v3626_v12, %v3614_v11  ;;  %v5466_v24 = vor.u32 %v7499_v14, %v5465_v58 }
 0x1ca   : > { %3858 = vmatpush.bf16.msrb.mxu3 %v6902_v23  ;;  %3877 = vmatpush.bf16.msra.mxu1 %v5594_v25  ;;  %v5977_v18 = vld [vmem:[%s8333_s29 + $0x6d0] sm:$0xf]  ;;  %v5210_v23 = vor.u32 %v7435_v9, %v5209_v8  ;;  %v5722_v25 = vor.u32 %v7563_v17, %v5721_v16  ;;  %v3654_v9 = vpop.f32.mrf.mxu3 }
 0x1cb   : > { %3846 = vmatmul.bf16.vlgmr.msrb.gmra.mxu2 %v8508_v39  ;;  %v7627_v19 = vld [vmem:[%s8333_s29 + $0x6ec] sm:$0xf0]  ;;  %v3640_v36 = vadd.f32 %v3639_v29, %v3627_v20 }
 0x1cc   : > { %3890 = vmatpush.bf16.msra.mxu2 %v5850_v26  ;;  %3865 = vmatpush.bf16.msra.mxu0 %v5306_v10  ;;  %v5177_v26 = vld [vmem:[%s8333_s29 + $0x90] sm:$0xf]  ;;  %v5978_v31 = vor.u32 %v7627_v19, %v5977_v18  ;;  %v3628_v51 = vpop.f32.mrf.mxu1 }
 0x1cd   : > { %3859 = vmatmul.bf16.vlgmr.msrb.gmra.mxu3 %v8514_v43  ;;  %v7427_v27 = vld [vmem:[%s8333_s29 + $0xac] sm:$0xf0]  ;;  %v3653_v41 = vadd.f32 %v3652_v37, %v3640_v36 }
 0x1ce   : > { %3903 = vmatpush.bf16.msra.mxu3 %v6106_v32  ;;  %3878 = vmatpush.bf16.msra.mxu1 %v5562_v15  ;;  %v5433_v28 = vld [vmem:[%s8333_s29 + $0x290] sm:$0xf]  ;;  %v341_v15 = vld [vmem:[#allocation2] sm:$0xff]  ;;  %v3615_v46 = vpop.f32.mrf.mxu0 }
 0x1cf   : > { %v7491_v32 = vld [vmem:[%s8333_s29 + $0x2ac] sm:$0xf0]  ;;  %v4281_v30 = vadd.f32 %v3653_v41, %v341_v15 }
 0x1d0   : > { %3891 = vmatpush.bf16.msra.mxu2 %v5818_v40  ;;  %3866 = vmatpush.bf16.msra.mxu0 %v5274_v54  ;;  %v5689_v33 = vld [vmem:[%s8333_s29 + $0x490] sm:$0xf]  ;;  %v5178_v40 = vor.u32 %v7427_v27, %v5177_v26  ;;  %v5434_v44 = vor.u32 %v7491_v32, %v5433_v28 }
 0x1d1   : > { %v7555_v34 = vld [vmem:[%s8333_s29 + $0x4ac] sm:$0xf0]  ;;  %4289 = vst [vmem:[#allocation2] sm:$0xff] %v4281_v30 }
 0x1d2   : > { %3904 = vmatpush.bf16.msra.mxu3 %v6074_v48  ;;  %3879 = vmatpush.bf16.msra.mxu1 %v5530_v56  ;;  %v5945_v38 = vld [vmem:[%s8333_s29 + $0x690] sm:$0xf]  ;;  %v5690_v47 = vor.u32 %v7555_v34, %v5689_v33 }
 0x1d3   : > { %v7619_v10 = vld [vmem:[%s8333_s29 + $0x6ac] sm:$0xf0] }
 0x1d4   : > { %3892 = vmatpush.bf16.msra.mxu2 %v5786_v57  ;;  %3867 = vmatpush.bf16.msra.mxu0 %v5242_v35  ;;  %v5145_v48 = vld [vmem:[%s8333_s29 + $0x50] sm:$0xf]  ;;  %v5946_v52 = vor.u32 %v7619_v10, %v5945_v38  ;;  %v3641_v35 = vpop.f32.mrf.mxu2  ;;  %v9037_v9 = vpop.f32.mrf.mxu1 }
 0x1d5   : > { %v7419_v49 = vld [vmem:[%s8333_s29 + $0x6c] sm:$0xf0] }
 0x1d6   : > { %3905 = vmatpush.bf16.msra.mxu3 %v6042_v61  ;;  %3880 = vmatpush.bf16.msra.mxu1 %v5498_v4  ;;  %v5401_v50 = vld [vmem:[%s8333_s29 + $0x250] sm:$0xf]  ;;  %v5146_v53 = vor.u32 %v7419_v49, %v5145_v48 }
 0x1d7   : > { %v7483_v54 = vld [vmem:[%s8333_s29 + $0x26c] sm:$0xf0] }
 0x1d8   : > { %3893 = vmatpush.bf16.msra.mxu2 %v5754_v6  ;;  %3868 = vmatpush.bf16.msra.mxu0 %v5210_v23  ;;  %v5657_v55 = vld [vmem:[%s8333_s29 + $0x450] sm:$0xf]  ;;  %v5402_v62 = vor.u32 %v7483_v54, %v5401_v50 }
 0x1d9   : > { %v7547_v56 = vld [vmem:[%s8333_s29 + $0x46c] sm:$0xf0] }
 0x1da   : > { %3906 = vmatpush.bf16.msra.mxu3 %v6010_v13  ;;  %3881 = vmatpush.bf16.msra.mxu1 %v5466_v24  ;;  %v5913_v57 = vld [vmem:[%s8333_s29 + $0x650] sm:$0xf]  ;;  %v5658_v63 = vor.u32 %v7547_v56, %v5657_v55 }
 0x1db   : > { %v7611_v59 = vld [vmem:[%s8333_s29 + $0x66c] sm:$0xf0] }
 0x1dc   : > { %3894 = vmatpush.bf16.msra.mxu2 %v5722_v25  ;;  %3869 = vmatpush.bf16.msra.mxu0 %v5178_v40  ;;  %v5113_v60 = vld [vmem:[%s8333_s29 + $0x10] sm:$0xf]  ;;  %v5914_v3 = vor.u32 %v7611_v59, %v5913_v57 }
 0x1dd   : > { %v7411_v61 = vld [vmem:[%s8333_s29 + $0x2c] sm:$0xf0] }
 0x1de   : > { %3907 = vmatpush.bf16.msra.mxu3 %v5978_v31  ;;  %3882 = vmatpush.bf16.msra.mxu1 %v5434_v44  ;;  %v5369_v0 = vld [vmem:[%s8333_s29 + $0x210] sm:$0xf]  ;;  %v5114_v13 = vor.u32 %v7411_v61, %v5113_v60 }
 0x1df   : > { %v7475_v1 = vld [vmem:[%s8333_s29 + $0x22c] sm:$0xf0] }
 0x1e0   : > { %3895 = vmatpush.bf16.msra.mxu2 %v5690_v47  ;;  %v5625_v2 = vld [vmem:[%s8333_s29 + $0x410] sm:$0xf]  ;;  %3870 = vmatpush.bf16.msra.mxu0 %v5146_v53  ;;  %v5370_v18 = vor.u32 %v7475_v1, %v5369_v0 }
 0x1e1   : > { %v7539_v4 = vld [vmem:[%s8333_s29 + $0x42c] sm:$0xf0] }
 0x1e2   : > { %3908 = vmatpush.bf16.msra.mxu3 %v5946_v52  ;;  %v5881_v6 = vld [vmem:[%s8333_s29 + $0x610] sm:$0xf]  ;;  %3883 = vmatpush.bf16.msra.mxu1 %v5402_v62  ;;  %v5626_v19 = vor.u32 %v7539_v4, %v5625_v2  ;;  %v9032_v2 = vpop.f32.mrf.mxu0 }
 0x1e3   : > { %v7603_v8 = vld [vmem:[%s8333_s29 + $0x62c] sm:$0xf0] }
 0x1e4   : > { %v6361_v58 = vld [vmem:[%s8333_s29 + $0x9d0] sm:$0xf]  ;;  %3896 = vmatpush.bf16.msra.mxu2 %v5658_v63  ;;  %v5882_v24 = vor.u32 %v7603_v8, %v5881_v6  ;;  %3871 = vmatpush.bf16.msra.mxu0 %v5114_v13 }
 0x1e5   : > { %v7723_v11 = vld [vmem:[%s8333_s29 + $0x9ec] sm:$0xf0] }
 0x1e6   : > { %v6617_v12 = vld [vmem:[%s8333_s29 + $0xbd0] sm:$0xf]  ;;  %3909 = vmatpush.bf16.msra.mxu3 %v5914_v3  ;;  %v6362_v25 = vor.u32 %v7723_v11, %v6361_v58  ;;  %3884 = vmatpush.bf16.msra.mxu1 %v5370_v18 }
 0x1e7   : > { %v7787_v14 = vld [vmem:[%s8333_s29 + $0xbec] sm:$0xf0]  ;;  %3872 = vmatmul.bf16.vlgmr.msra.gmra.mxu0 %v8453_v21 }
 0x1e8   : > { %v6873_v16 = vld [vmem:[%s8333_s29 + $0xdd0] sm:$0xf]  ;;  %v6618_v26 = vor.u32 %v7787_v14, %v6617_v12  ;;  %3897 = vmatpush.bf16.msra.mxu2 %v5626_v19  ;;  %3916 = vmatpush.bf16.msrb.mxu0 %v6362_v25  ;;  %v9047_v25 = vpop.f32.mrf.mxu2 }
 0x1e9   : > { %v7851_v17 = vld [vmem:[%s8333_s29 + $0xdec] sm:$0xf0]  ;;  %3885 = vmatmul.bf16.vlgmr.msra.gmra.mxu1 %v8456_v22 }
 0x1ea   : > { %v7129_v20 = vld [vmem:[%s8333_s29 + $0xfd0] sm:$0xf]  ;;  %v6874_v27 = vor.u32 %v7851_v17, %v6873_v16  ;;  %3910 = vmatpush.bf16.msra.mxu3 %v5882_v24  ;;  %3929 = vmatpush.bf16.msrb.mxu1 %v6618_v26 }
 0x1eb   : > { %v7915_v23 = vld [vmem:[%s8333_s29 + $0xfec] sm:$0xf0]  ;;  %3898 = vmatmul.bf16.vlgmr.msra.gmra.mxu2 %v8439_v5 }
 0x1ec   : > { %v6329_v28 = vld [vmem:[%s8333_s29 + $0x990] sm:$0xf]  ;;  %v7130_v32 = vor.u32 %v7915_v23, %v7129_v20  ;;  %3942 = vmatpush.bf16.msrb.mxu2 %v6874_v27 }
 0x1ed   : > { %v7715_v29 = vld [vmem:[%s8333_s29 + $0x9ac] sm:$0xf0]  ;;  %3911 = vmatmul.bf16.vlgmr.msra.gmra.mxu3 %v8442_v7 }
 0x1ee   : > { %v6585_v31 = vld [vmem:[%s8333_s29 + $0xb90] sm:$0xf]  ;;  %v6330_v10 = vor.u32 %v7715_v29, %v6329_v28  ;;  %3955 = vmatpush.bf16.msrb.mxu3 %v7130_v32 }
 0x1ef   : > { %v7779_v33 = vld [vmem:[%s8333_s29 + $0xbac] sm:$0xf0] }
 0x1f0   : > { %v6841_v34 = vld [vmem:[%s8333_s29 + $0xd90] sm:$0xf]  ;;  %v6586_v15 = vor.u32 %v7779_v33, %v6585_v31  ;;  %3917 = vmatpush.bf16.msrb.mxu0 %v6330_v10  ;;  %v9052_v31 = vpop.f32.mrf.mxu3 }
 0x1f1   : > { %v7843_v36 = vld [vmem:[%s8333_s29 + $0xdac] sm:$0xf0] }
 0x1f2   : > { %v7097_v37 = vld [vmem:[%s8333_s29 + $0xf90] sm:$0xf]  ;;  %v6842_v40 = vor.u32 %v7843_v36, %v6841_v34  ;;  %3930 = vmatpush.bf16.msrb.mxu1 %v6586_v15  ;;  %v3667_v36 = vpop.f32.mrf.mxu0 }
 0x1f3   : > { %v7907_v38 = vld [vmem:[%s8333_s29 + $0xfac] sm:$0xf0] }
 0x1f4   : > { %v6297_v41 = vld [vmem:[%s8333_s29 + $0x950] sm:$0xf]  ;;  %v7098_v47 = vor.u32 %v7907_v38, %v7097_v37  ;;  %3943 = vmatpush.bf16.msrb.mxu2 %v6842_v40 }
 0x1f5   : > { %v7707_v46 = vld [vmem:[%s8333_s29 + $0x96c] sm:$0xf0] }
 0x1f6   : > { %v6553_v44 = vld [vmem:[%s8333_s29 + $0xb50] sm:$0xf]  ;;  %v6298_v30 = vor.u32 %v7707_v46, %v6297_v41  ;;  %3956 = vmatpush.bf16.msrb.mxu3 %v7098_v47  ;;  %v3680_v41 = vpop.f32.mrf.mxu1 }
 0x1f7   : > { %v7771_v48 = vld [vmem:[%s8333_s29 + $0xb6c] sm:$0xf0]  ;;  %v5531_v41 = vld [vmem:[%s8333_s29 + $0x370] sm:$0xf0] }
 0x1f8   : > { %v6809_v49 = vld [vmem:[%s8333_s29 + $0xd50] sm:$0xf]  ;;  %v6554_v54 = vor.u32 %v7771_v48, %v6553_v44  ;;  %3918 = vmatpush.bf16.msrb.mxu0 %v6298_v30 }
 0x1f9   : > { %v7835_v50 = vld [vmem:[%s8333_s29 + $0xd6c] sm:$0xf0] }
 0x1fa   : > { %v7065_v51 = vld [vmem:[%s8333_s29 + $0xf50] sm:$0xf]  ;;  %v6810_v55 = vor.u32 %v7835_v50, %v6809_v49  ;;  %3931 = vmatpush.bf16.msrb.mxu1 %v6554_v54 }
 0x1fb   : > { %v7899_v52 = vld [vmem:[%s8333_s29 + $0xf6c] sm:$0xf0] }
 0x1fc   : > { %v6265_v56 = vld [vmem:[%s8333_s29 + $0x910] sm:$0xf]  ;;  %v7066_v53 = vor.u32 %v7899_v52, %v7065_v51  ;;  %3944 = vmatpush.bf16.msrb.mxu2 %v6810_v55 }
 0x1fd   : > { %v7699_v57 = vld [vmem:[%s8333_s29 + $0x92c] sm:$0xf0] }
 0x1fe   : > { %v6521_v59 = vld [vmem:[%s8333_s29 + $0xb10] sm:$0xf]  ;;  %v6266_v1 = vor.u32 %v7699_v57, %v6265_v56  ;;  %3957 = vmatpush.bf16.msrb.mxu3 %v7066_v53  ;;  %v3693_v53 = vpop.f32.mrf.mxu2 }
 0x1ff   : > { %v7763_v60 = vld [vmem:[%s8333_s29 + $0xb2c] sm:$0xf0]  ;;  %v7631_v53 = vld [vmem:[%s8333_s29 + $0x714] sm:$0xf] }
 0x200   : > { %v6777_v61 = vld [vmem:[%s8333_s29 + $0xd10] sm:$0xf]  ;;  %v6522_v35 = vor.u32 %v7763_v60, %v6521_v59  ;;  %3919 = vmatpush.bf16.msrb.mxu0 %v6266_v1  ;;  %v7463_v1 = vld [vmem:[%s8333_s29 + $0x1d4] sm:$0xf] }
 0x201   : > { %v7827_v62 = vld [vmem:[%s8333_s29 + $0xd2c] sm:$0xf0] }
 0x202   : > { %v7033_v63 = vld [vmem:[%s8333_s29 + $0xf10] sm:$0xf]  ;;  %v6778_v3 = vor.u32 %v7827_v62, %v6777_v61  ;;  %3932 = vmatpush.bf16.msrb.mxu1 %v6522_v35  ;;  %v5339_v35 = vld [vmem:[%s8333_s29 + $0x1f0] sm:$0xf0] }
 0x203   : > { %v7891_v0 = vld [vmem:[%s8333_s29 + $0xf2c] sm:$0xf0] }
 0x204   : > { %v6233_v4 = vld [vmem:[%s8333_s29 + $0x8d0] sm:$0xf]  ;;  %v7034_v58 = vor.u32 %v7891_v0, %v7033_v63  ;;  %3945 = vmatpush.bf16.msrb.mxu2 %v6778_v3  ;;  %v3706_v0 = vpop.f32.mrf.mxu3  ;;  %v7527_v3 = vld [vmem:[%s8333_s29 + $0x3d4] sm:$0xf] }
 0x205   : > { %v7691_v6 = vld [vmem:[%s8333_s29 + $0x8ec] sm:$0xf0]  ;;  %v7431_v0 = vld [vmem:[%s8333_s29 + $0xd4] sm:$0xf] }
 0x206   : > { %v6489_v8 = vld [vmem:[%s8333_s29 + $0xad0] sm:$0xf]  ;;  %v6234_v17 = vor.u32 %v7691_v6, %v6233_v4  ;;  %3958 = vmatpush.bf16.msrb.mxu3 %v7034_v58  ;;  %v5595_v6 = vld [vmem:[%s8333_s29 + $0x3f0] sm:$0xf0] }
 0x207   : > { %v7755_v11 = vld [vmem:[%s8333_s29 + $0xaec] sm:$0xf0]  ;;  %v5851_v58 = vld [vmem:[%s8333_s29 + $0x5f0] sm:$0xf0] }
 0x208   : > { %v6745_v12 = vld [vmem:[%s8333_s29 + $0xcd0] sm:$0xf]  ;;  %v6490_v18 = vor.u32 %v7755_v11, %v6489_v8  ;;  %3920 = vmatpush.bf16.msrb.mxu0 %v6234_v17  ;;  %v7591_v8 = vld [vmem:[%s8333_s29 + $0x5d4] sm:$0xf]  ;;  %v5342_v17 = vor.u32 %v7463_v1, %v5339_v35 }
 0x209   : > { %v7819_v13 = vld [vmem:[%s8333_s29 + $0xcec] sm:$0xf0]  ;;  %v5211_v1 = vld [vmem:[%s8333_s29 + $0xf0] sm:$0xf0] }
 0x20a   : > { %v7001_v14 = vld [vmem:[%s8333_s29 + $0xed0] sm:$0xf]  ;;  %v6746_v19 = vor.u32 %v7819_v13, %v6745_v12  ;;  %3933 = vmatpush.bf16.msrb.mxu1 %v6490_v18  ;;  %v7655_v13 = vld [vmem:[%s8333_s29 + $0x7d4] sm:$0xf]  ;;  %v5598_v18 = vor.u32 %v7527_v3, %v5595_v6 }
 0x20b   : > { %v7883_v16 = vld [vmem:[%s8333_s29 + $0xeec] sm:$0xf0]  ;;  %v7495_v35 = vld [vmem:[%s8333_s29 + $0x2d4] sm:$0xf] }
 0x20c   : > { %v6201_v20 = vld [vmem:[%s8333_s29 + $0x890] sm:$0xf]  ;;  %v7002_v26 = vor.u32 %v7883_v16, %v7001_v14  ;;  %3946 = vmatpush.bf16.msrb.mxu2 %v6746_v19  ;;  %v6107_v14 = vld [vmem:[%s8333_s29 + $0x7f0] sm:$0xf0]  ;;  %v5854_v19 = vor.u32 %v7591_v8, %v5851_v58 }
 0x20d   : > { %v7683_v23 = vld [vmem:[%s8333_s29 + $0x8ac] sm:$0xf0]  ;;  %v5467_v8 = vld [vmem:[%s8333_s29 + $0x2f0] sm:$0xf0] }
 0x20e   : > { %v6457_v24 = vld [vmem:[%s8333_s29 + $0xa90] sm:$0xf]  ;;  %v6202_v34 = vor.u32 %v7683_v23, %v6201_v20  ;;  %3959 = vmatpush.bf16.msrb.mxu3 %v7002_v26  ;;  %v3679_v20 = vadd.f32 %v9037_v9, %v9032_v2  ;;  %v7455_v23 = vld [vmem:[%s8333_s29 + $0x194] sm:$0xf] }
 0x20f   : > { %v7747_v27 = vld [vmem:[%s8333_s29 + $0xaac] sm:$0xf0]  ;;  %v7519_v26 = vld [vmem:[%s8333_s29 + $0x394] sm:$0xf] }
 0x210   : > { %v6713_v28 = vld [vmem:[%s8333_s29 + $0xc90] sm:$0xf]  ;;  %v6458_v37 = vor.u32 %v7747_v27, %v6457_v24  ;;  %3921 = vmatpush.bf16.msrb.mxu0 %v6202_v34  ;;  %v5307_v24 = vld [vmem:[%s8333_s29 + $0x1b0] sm:$0xf0]  ;;  %v6110_v27 = vor.u32 %v7655_v13, %v6107_v14 }
 0x211   : > { %v7811_v29 = vld [vmem:[%s8333_s29 + $0xcac] sm:$0xf0]  ;;  %v6075_v34 = vld [vmem:[%s8333_s29 + $0x7b0] sm:$0xf0]  ;;  %v5310_v2 = vor.u32 %v7455_v23, %v5307_v24  ;;  %v3743_v24 = vpop.f32.mrf.mxu2 }
 0x212   : > { %v6969_v32 = vld [vmem:[%s8333_s29 + $0xe90] sm:$0xf]  ;;  %v6714_v38 = vor.u32 %v7811_v29, %v6713_v28  ;;  %3934 = vmatpush.bf16.msrb.mxu1 %v6458_v37  ;;  %v5563_v28 = vld [vmem:[%s8333_s29 + $0x3b0] sm:$0xf0]  ;;  %v3692_v37 = vadd.f32 %v9047_v25, %v3679_v20 }
 0x213   : > { %v7875_v33 = vld [vmem:[%s8333_s29 + $0xeac] sm:$0xf0]  ;;  %v7583_v29 = vld [vmem:[%s8333_s29 + $0x594] sm:$0xf]  ;;  %v5566_v9 = vor.u32 %v7519_v26, %v5563_v28 }
 0x214   : > { %v6169_v10 = vld [vmem:[%s8333_s29 + $0x850] sm:$0xf]  ;;  %v6970_v46 = vor.u32 %v7875_v33, %v6969_v32  ;;  %3947 = vmatpush.bf16.msrb.mxu2 %v6714_v38  ;;  %v5819_v32 = vld [vmem:[%s8333_s29 + $0x5b0] sm:$0xf0] }
 0x215   : > { %v7675_v15 = vld [vmem:[%s8333_s29 + $0x86c] sm:$0xf0]  ;;  %v7647_v33 = vld [vmem:[%s8333_s29 + $0x794] sm:$0xf]  ;;  %v5822_v36 = vor.u32 %v7583_v29, %v5819_v32 }
 0x216   : > { %v6425_v40 = vld [vmem:[%s8333_s29 + $0xa50] sm:$0xf]  ;;  %v6170_v51 = vor.u32 %v7675_v15, %v6169_v10  ;;  %3960 = vmatpush.bf16.msrb.mxu3 %v6970_v46  ;;  %v7447_v38 = vld [vmem:[%s8333_s29 + $0x154] sm:$0xf] }
 0x217   : > { %v7739_v44 = vld [vmem:[%s8333_s29 + $0xa6c] sm:$0xf0]  ;;  %v5275_v10 = vld [vmem:[%s8333_s29 + $0x170] sm:$0xf0] }
 0x218   : > { %v6681_v47 = vld [vmem:[%s8333_s29 + $0xc50] sm:$0xf]  ;;  %v6426_v54 = vor.u32 %v7739_v44, %v6425_v40  ;;  %3922 = vmatpush.bf16.msrb.mxu0 %v6170_v51  ;;  %v7511_v15 = vld [vmem:[%s8333_s29 + $0x354] sm:$0xf]  ;;  %v6078_v40 = vor.u32 %v7647_v33, %v6075_v34  ;;  %v3756_v33 = vpop.f32.mrf.mxu3 }
 0x219   : > { %v7803_v48 = vld [vmem:[%s8333_s29 + $0xc6c] sm:$0xf0]  ;;  %v7575_v46 = vld [vmem:[%s8333_s29 + $0x554] sm:$0xf] }
 0x21a   : > { %v6937_v49 = vld [vmem:[%s8333_s29 + $0xe50] sm:$0xf]  ;;  %v6682_v55 = vor.u32 %v7803_v48, %v6681_v47  ;;  %3935 = vmatpush.bf16.msrb.mxu1 %v6426_v54  ;;  %v5787_v44 = vld [vmem:[%s8333_s29 + $0x570] sm:$0xf0]  ;;  %v5278_v48 = vor.u32 %v7447_v38, %v5275_v10 }
 0x21b   : > { %v7867_v50 = vld [vmem:[%s8333_s29 + $0xe6c] sm:$0xf0]  ;;  %v7639_v47 = vld [vmem:[%s8333_s29 + $0x754] sm:$0xf]  ;;  %v5790_v51 = vor.u32 %v7575_v46, %v5787_v44 }
 0x21c   : > { %v6137_v52 = vld [vmem:[%s8333_s29 + $0x810] sm:$0xf]  ;;  %v6938_v60 = vor.u32 %v7867_v50, %v6937_v49  ;;  %3948 = vmatpush.bf16.msrb.mxu2 %v6682_v55  ;;  %v6043_v25 = vld [vmem:[%s8333_s29 + $0x770] sm:$0xf0]  ;;  %v3705_v49 = vadd.f32 %v9052_v31, %v3692_v37  ;;  %v5534_v50 = vor.u32 %v7511_v15, %v5531_v41 }
 0x21d   : > { %v7667_v30 = vld [vmem:[%s8333_s29 + $0x82c] sm:$0xf0]  ;;  %v7503_v54 = vld [vmem:[%s8333_s29 + $0x314] sm:$0xf]  ;;  %v6046_v55 = vor.u32 %v7639_v47, %v6043_v25 }
 0x21e   : > { %v6393_v56 = vld [vmem:[%s8333_s29 + $0xa10] sm:$0xf]  ;;  %v6138_v4 = vor.u32 %v7667_v30, %v6137_v52  ;;  %3961 = vmatpush.bf16.msrb.mxu3 %v6938_v60  ;;  %v7439_v52 = vld [vmem:[%s8333_s29 + $0x114] sm:$0xf] }
 0x21f   : > { %v7731_v57 = vld [vmem:[%s8333_s29 + $0xa2c] sm:$0xf0]  ;;  %v5243_v30 = vld [vmem:[%s8333_s29 + $0x130] sm:$0xf0] }
 0x220   : > { %v6649_v59 = vld [vmem:[%s8333_s29 + $0xc10] sm:$0xf]  ;;  %v6394_v11 = vor.u32 %v7731_v57, %v6393_v56  ;;  %3923 = vmatpush.bf16.msrb.mxu0 %v6138_v4  ;;  %v5499_v56 = vld [vmem:[%s8333_s29 + $0x330] sm:$0xf0]  ;;  %v5246_v31 = vor.u32 %v7439_v52, %v5243_v30  ;;  %v3730_v4 = vpop.f32.mrf.mxu1 }
 0x221   : > { %v7795_v61 = vld [vmem:[%s8333_s29 + $0xc2c] sm:$0xf0]  ;;  %v7567_v57 = vld [vmem:[%s8333_s29 + $0x514] sm:$0xf] }
 0x222   : > { %v6905_v62 = vld [vmem:[%s8333_s29 + $0xe10] sm:$0xf]  ;;  %v6650_v12 = vor.u32 %v7795_v61, %v6649_v59  ;;  %3936 = vmatpush.bf16.msrb.mxu1 %v6394_v11  ;;  %v5755_v59 = vld [vmem:[%s8333_s29 + $0x530] sm:$0xf0]  ;;  %v3717_v61 = vpop.f32.mrf.mxu0 }
 0x223   : > { %v7859_v63 = vld [vmem:[%s8333_s29 + $0xe2c] sm:$0xf0]  ;;  %3924 = vmatmul.bf16.vlgmr.msrb.gmra.mxu0 %v8512_v42  ;;  %v6011_v60 = vld [vmem:[%s8333_s29 + $0x730] sm:$0xf0]  ;;  %v3718_v3 = vadd.f32 %v3717_v61, %v3705_v49 }
 0x224   : > { %v6906_v16 = vor.u32 %v7859_v63, %v6905_v62  ;;  %3949 = vmatpush.bf16.msrb.mxu2 %v6650_v12  ;;  %3968 = vmatpush.bf16.msra.mxu0 %v5342_v17  ;;  %v5502_v62 = vor.u32 %v7503_v54, %v5499_v56  ;;  %v5758_v63 = vor.u32 %v7567_v57, %v5755_v59  ;;  %v7559_v58 = vld [vmem:[%s8333_s29 + $0x4d4] sm:$0xf] }
 0x225   : > { %3937 = vmatmul.bf16.vlgmr.msrb.gmra.mxu1 %v8516_v45  ;;  %v6014_v6 = vor.u32 %v7631_v53, %v6011_v60  ;;  %v5723_v11 = vld [vmem:[%s8333_s29 + $0x4f0] sm:$0xf0]  ;;  %v3731_v14 = vadd.f32 %v3730_v4, %v3718_v3  ;;  %v5470_v17 = vor.u32 %v7495_v35, %v5467_v8 }
 0x226   : > { %3962 = vmatpush.bf16.msrb.mxu3 %v6906_v16  ;;  %3981 = vmatpush.bf16.msra.mxu1 %v5598_v18  ;;  %v7623_v12 = vld [vmem:[%s8333_s29 + $0x6d4] sm:$0xf]  ;;  %v5214_v16 = vor.u32 %v7431_v0, %v5211_v1  ;;  %v5726_v18 = vor.u32 %v7559_v58, %v5723_v11  ;;  %v3758_v1 = vpop.f32.mrf.mxu3 }
 0x227   : > { %3950 = vmatmul.bf16.vlgmr.msrb.gmra.mxu2 %v8508_v39  ;;  %v5979_v13 = vld [vmem:[%s8333_s29 + $0x6f0] sm:$0xf0]  ;;  %v3744_v32 = vadd.f32 %v3743_v24, %v3731_v14 }
 0x228   : > { %3994 = vmatpush.bf16.msra.mxu2 %v5854_v19  ;;  %3969 = vmatpush.bf16.msra.mxu0 %v5310_v2  ;;  %v7423_v19 = vld [vmem:[%s8333_s29 + $0x94] sm:$0xf]  ;;  %v5982_v26 = vor.u32 %v7623_v12, %v5979_v13  ;;  %v3732_v44 = vpop.f32.mrf.mxu1 }
 0x229   : > { %3963 = vmatmul.bf16.vlgmr.msrb.gmra.mxu3 %v8514_v43  ;;  %v5179_v20 = vld [vmem:[%s8333_s29 + $0xb0] sm:$0xf0]  ;;  %v3757_v37 = vadd.f32 %v3756_v33, %v3744_v32 }
 0x22a   : > { %4007 = vmatpush.bf16.msra.mxu3 %v6110_v27  ;;  %3982 = vmatpush.bf16.msra.mxu1 %v5566_v9  ;;  %v7487_v23 = vld [vmem:[%s8333_s29 + $0x294] sm:$0xf]  ;;  %v342_v9 = vld [vmem:[#allocation2 + $0x18] sm:$0xff]  ;;  %v3719_v38 = vpop.f32.mrf.mxu0 }
 0x22b   : > { %v5435_v27 = vld [vmem:[%s8333_s29 + $0x2b0] sm:$0xf0]  ;;  %v4282_v25 = vadd.f32 %v3757_v37, %v342_v9 }
 0x22c   : > { %3995 = vmatpush.bf16.msra.mxu2 %v5822_v36  ;;  %3970 = vmatpush.bf16.msra.mxu0 %v5278_v48  ;;  %v7551_v28 = vld [vmem:[%s8333_s29 + $0x494] sm:$0xf]  ;;  %v5182_v36 = vor.u32 %v7423_v19, %v5179_v20  ;;  %v5438_v10 = vor.u32 %v7487_v23, %v5435_v27 }
 0x22d   : > { %v5691_v29 = vld [vmem:[%s8333_s29 + $0x4b0] sm:$0xf0]  ;;  %4290 = vst [vmem:[#allocation2 + $0x18] sm:$0xff] %v4282_v25 }
 0x22e   : > { %4008 = vmatpush.bf16.msra.mxu3 %v6078_v40  ;;  %3983 = vmatpush.bf16.msra.mxu1 %v5534_v50  ;;  %v7615_v34 = vld [vmem:[%s8333_s29 + $0x694] sm:$0xf]  ;;  %v5694_v15 = vor.u32 %v7551_v28, %v5691_v29 }
 0x22f   : > { %v5947_v2 = vld [vmem:[%s8333_s29 + $0x6b0] sm:$0xf0] }
 0x230   : > { %3996 = vmatpush.bf16.msra.mxu2 %v5790_v51  ;;  %3971 = vmatpush.bf16.msra.mxu0 %v5246_v31  ;;  %v7415_v40 = vld [vmem:[%s8333_s29 + $0x54] sm:$0xf]  ;;  %v5950_v47 = vor.u32 %v7615_v34, %v5947_v2  ;;  %v3745_v31 = vpop.f32.mrf.mxu2  ;;  %v9185_v1 = vpop.f32.mrf.mxu1 }
 0x231   : > { %v5147_v41 = vld [vmem:[%s8333_s29 + $0x70] sm:$0xf0] }
 0x232   : > { %4009 = vmatpush.bf16.msra.mxu3 %v6046_v55  ;;  %3984 = vmatpush.bf16.msra.mxu1 %v5502_v62  ;;  %v7479_v46 = vld [vmem:[%s8333_s29 + $0x254] sm:$0xf]  ;;  %v5150_v30 = vor.u32 %v7415_v40, %v5147_v41 }
 0x233   : > { %v5403_v48 = vld [vmem:[%s8333_s29 + $0x270] sm:$0xf0] }
 0x234   : > { %3997 = vmatpush.bf16.msra.mxu2 %v5758_v63  ;;  %3972 = vmatpush.bf16.msra.mxu0 %v5214_v16  ;;  %v7543_v49 = vld [vmem:[%s8333_s29 + $0x454] sm:$0xf]  ;;  %v5406_v56 = vor.u32 %v7479_v46, %v5403_v48 }
 0x235   : > { %v5659_v50 = vld [vmem:[%s8333_s29 + $0x470] sm:$0xf0] }
 0x236   : > { %4010 = vmatpush.bf16.msra.mxu3 %v6014_v6  ;;  %3985 = vmatpush.bf16.msra.mxu1 %v5470_v17  ;;  %v7607_v51 = vld [vmem:[%s8333_s29 + $0x654] sm:$0xf]  ;;  %v5662_v57 = vor.u32 %v7543_v49, %v5659_v50 }
 0x237   : > { %v5915_v52 = vld [vmem:[%s8333_s29 + $0x670] sm:$0xf0] }
 0x238   : > { %3998 = vmatpush.bf16.msra.mxu2 %v5726_v18  ;;  %3973 = vmatpush.bf16.msra.mxu0 %v5182_v36  ;;  %v7407_v54 = vld [vmem:[%s8333_s29 + $0x14] sm:$0xf]  ;;  %v5918_v61 = vor.u32 %v7607_v51, %v5915_v52 }
 0x239   : > { %v5115_v55 = vld [vmem:[%s8333_s29 + $0x30] sm:$0xf0] }
 0x23a   : > { %4011 = vmatpush.bf16.msra.mxu3 %v5982_v26  ;;  %3986 = vmatpush.bf16.msra.mxu1 %v5438_v10  ;;  %v7471_v59 = vld [vmem:[%s8333_s29 + $0x214] sm:$0xf]  ;;  %v5118_v6 = vor.u32 %v7407_v54, %v5115_v55 }
 0x23b   : > { %v5371_v53 = vld [vmem:[%s8333_s29 + $0x230] sm:$0xf0] }
 0x23c   : > { %3999 = vmatpush.bf16.msra.mxu2 %v5694_v15  ;;  %v7535_v60 = vld [vmem:[%s8333_s29 + $0x414] sm:$0xf]  ;;  %3974 = vmatpush.bf16.msra.mxu0 %v5150_v30  ;;  %v5374_v12 = vor.u32 %v7471_v59, %v5371_v53 }
 0x23d   : > { %v5627_v62 = vld [vmem:[%s8333_s29 + $0x430] sm:$0xf0] }
 0x23e   : > { %4012 = vmatpush.bf16.msra.mxu3 %v5950_v47  ;;  %v7599_v63 = vld [vmem:[%s8333_s29 + $0x614] sm:$0xf]  ;;  %3987 = vmatpush.bf16.msra.mxu1 %v5406_v56  ;;  %v5630_v13 = vor.u32 %v7535_v60, %v5627_v62  ;;  %v9180_v60 = vpop.f32.mrf.mxu0 }
 0x23f   : > { %v5883_v0 = vld [vmem:[%s8333_s29 + $0x630] sm:$0xf0] }
 0x240   : > { %v7719_v35 = vld [vmem:[%s8333_s29 + $0x9d4] sm:$0xf]  ;;  %4000 = vmatpush.bf16.msra.mxu2 %v5662_v57  ;;  %v5886_v17 = vor.u32 %v7599_v63, %v5883_v0  ;;  %3975 = vmatpush.bf16.msra.mxu0 %v5118_v6 }
 0x241   : > { %v6363_v3 = vld [vmem:[%s8333_s29 + $0x9f0] sm:$0xf0] }
 0x242   : > { %v7783_v4 = vld [vmem:[%s8333_s29 + $0xbd4] sm:$0xf]  ;;  %4013 = vmatpush.bf16.msra.mxu3 %v5918_v61  ;;  %v6366_v18 = vor.u32 %v7719_v35, %v6363_v3  ;;  %3988 = vmatpush.bf16.msra.mxu1 %v5374_v12 }
 0x243   : > { %v6619_v8 = vld [vmem:[%s8333_s29 + $0xbf0] sm:$0xf0]  ;;  %3976 = vmatmul.bf16.vlgmr.msra.gmra.mxu0 %v8453_v21 }
 0x244   : > { %v7847_v58 = vld [vmem:[%s8333_s29 + $0xdd4] sm:$0xf]  ;;  %v6622_v19 = vor.u32 %v7783_v4, %v6619_v8  ;;  %4001 = vmatpush.bf16.msra.mxu2 %v5630_v13  ;;  %4020 = vmatpush.bf16.msrb.mxu0 %v6366_v18  ;;  %v9195_v18 = vpop.f32.mrf.mxu2 }
 0x245   : > { %v6875_v11 = vld [vmem:[%s8333_s29 + $0xdf0] sm:$0xf0]  ;;  %3989 = vmatmul.bf16.vlgmr.msra.gmra.mxu1 %v8456_v22 }
 0x246   : > { %v7911_v14 = vld [vmem:[%s8333_s29 + $0xfd4] sm:$0xf]  ;;  %v6878_v20 = vor.u32 %v7847_v58, %v6875_v11  ;;  %4014 = vmatpush.bf16.msra.mxu3 %v5886_v17  ;;  %4033 = vmatpush.bf16.msrb.mxu1 %v6622_v19 }
 0x247   : > { %v7131_v16 = vld [vmem:[%s8333_s29 + $0xff0] sm:$0xf0]  ;;  %4002 = vmatmul.bf16.vlgmr.msra.gmra.mxu2 %v8439_v5 }
 0x248   : > { %v7711_v23 = vld [vmem:[%s8333_s29 + $0x994] sm:$0xf]  ;;  %v7134_v27 = vor.u32 %v7911_v14, %v7131_v16  ;;  %4046 = vmatpush.bf16.msrb.mxu2 %v6878_v20 }
 0x249   : > { %v6331_v24 = vld [vmem:[%s8333_s29 + $0x9b0] sm:$0xf0]  ;;  %4015 = vmatmul.bf16.vlgmr.msra.gmra.mxu3 %v8442_v7 }
 0x24a   : > { %v7775_v26 = vld [vmem:[%s8333_s29 + $0xb94] sm:$0xf]  ;;  %v6334_v2 = vor.u32 %v7711_v23, %v6331_v24  ;;  %4059 = vmatpush.bf16.msrb.mxu3 %v7134_v27 }
 0x24b   : > { %v6587_v28 = vld [vmem:[%s8333_s29 + $0xbb0] sm:$0xf0] }
 0x24c   : > { %v7839_v29 = vld [vmem:[%s8333_s29 + $0xd94] sm:$0xf]  ;;  %v6590_v9 = vor.u32 %v7775_v26, %v6587_v28  ;;  %4021 = vmatpush.bf16.msrb.mxu0 %v6334_v2  ;;  %v9200_v26 = vpop.f32.mrf.mxu3 }
 0x24d   : > { %v6843_v32 = vld [vmem:[%s8333_s29 + $0xdb0] sm:$0xf0] }
 0x24e   : > { %v7903_v33 = vld [vmem:[%s8333_s29 + $0xf94] sm:$0xf]  ;;  %v6846_v36 = vor.u32 %v7839_v29, %v6843_v32  ;;  %4034 = vmatpush.bf16.msrb.mxu1 %v6590_v9  ;;  %v3771_v32 = vpop.f32.mrf.mxu0 }
 0x24f   : > { %v7099_v34 = vld [vmem:[%s8333_s29 + $0xfb0] sm:$0xf0] }
 0x250   : > { %v7703_v37 = vld [vmem:[%s8333_s29 + $0x954] sm:$0xf]  ;;  %v7102_v15 = vor.u32 %v7903_v33, %v7099_v34  ;;  %4047 = vmatpush.bf16.msrb.mxu2 %v6846_v36 }
 0x251   : > { %v6299_v38 = vld [vmem:[%s8333_s29 + $0x970] sm:$0xf0] }
 0x252   : > { %v7767_v10 = vld [vmem:[%s8333_s29 + $0xb54] sm:$0xf]  ;;  %v6302_v25 = vor.u32 %v7703_v37, %v6299_v38  ;;  %4060 = vmatpush.bf16.msrb.mxu3 %v7102_v15  ;;  %v3784_v37 = vpop.f32.mrf.mxu1 }
 0x253   : > { %v6555_v40 = vld [vmem:[%s8333_s29 + $0xb70] sm:$0xf0]  ;;  %v7516_v37 = vld [vmem:[%s8333_s29 + $0x374] sm:$0xf0] }
 0x254   : > { %v7831_v41 = vld [vmem:[%s8333_s29 + $0xd54] sm:$0xf]  ;;  %v6558_v48 = vor.u32 %v7767_v10, %v6555_v40  ;;  %4022 = vmatpush.bf16.msrb.mxu0 %v6302_v25 }
 0x255   : > { %v6811_v46 = vld [vmem:[%s8333_s29 + $0xd70] sm:$0xf0] }
 0x256   : > { %v7895_v44 = vld [vmem:[%s8333_s29 + $0xf54] sm:$0xf]  ;;  %v6814_v49 = vor.u32 %v7831_v41, %v6811_v46  ;;  %4035 = vmatpush.bf16.msrb.mxu1 %v6558_v48 }
 0x257   : > { %v7067_v47 = vld [vmem:[%s8333_s29 + $0xf70] sm:$0xf0] }
 0x258   : > { %v7695_v50 = vld [vmem:[%s8333_s29 + $0x914] sm:$0xf]  ;;  %v7070_v30 = vor.u32 %v7895_v44, %v7067_v47  ;;  %4048 = vmatpush.bf16.msrb.mxu2 %v6814_v49 }
 0x259   : > { %v6267_v51 = vld [vmem:[%s8333_s29 + $0x930] sm:$0xf0] }
 0x25a   : > { %v7759_v52 = vld [vmem:[%s8333_s29 + $0xb14] sm:$0xf]  ;;  %v6270_v53 = vor.u32 %v7695_v50, %v6267_v51  ;;  %4061 = vmatpush.bf16.msrb.mxu3 %v7070_v30  ;;  %v3797_v30 = vpop.f32.mrf.mxu2 }
 0x25b   : > { %v6523_v54 = vld [vmem:[%s8333_s29 + $0xb30] sm:$0xf0]  ;;  %v6017_v30 = vld [vmem:[%s8333_s29 + $0x718] sm:$0xf] }
 0x25c   : > { %v7823_v55 = vld [vmem:[%s8333_s29 + $0xd14] sm:$0xf]  ;;  %v6526_v31 = vor.u32 %v7759_v52, %v6523_v54  ;;  %4023 = vmatpush.bf16.msrb.mxu0 %v6270_v53  ;;  %v5345_v53 = vld [vmem:[%s8333_s29 + $0x1d8] sm:$0xf] }
 0x25d   : > { %v6779_v56 = vld [vmem:[%s8333_s29 + $0xd30] sm:$0xf0] }
 0x25e   : > { %v7887_v57 = vld [vmem:[%s8333_s29 + $0xf14] sm:$0xf]  ;;  %v6782_v61 = vor.u32 %v7823_v55, %v6779_v56  ;;  %4036 = vmatpush.bf16.msrb.mxu1 %v6526_v31  ;;  %v7468_v31 = vld [vmem:[%s8333_s29 + $0x1f4] sm:$0xf0] }
 0x25f   : > { %v7035_v59 = vld [vmem:[%s8333_s29 + $0xf30] sm:$0xf0] }
 0x260   : > { %v7687_v62 = vld [vmem:[%s8333_s29 + $0x8d4] sm:$0xf]  ;;  %v7038_v35 = vor.u32 %v7887_v57, %v7035_v59  ;;  %4049 = vmatpush.bf16.msrb.mxu2 %v6782_v61  ;;  %v3810_v59 = vpop.f32.mrf.mxu3  ;;  %v5601_v61 = vld [vmem:[%s8333_s29 + $0x3d8] sm:$0xf] }
 0x261   : > { %v6235_v63 = vld [vmem:[%s8333_s29 + $0x8f0] sm:$0xf0]  ;;  %v5217_v59 = vld [vmem:[%s8333_s29 + $0xd8] sm:$0xf] }
 0x262   : > { %v7751_v0 = vld [vmem:[%s8333_s29 + $0xad4] sm:$0xf]  ;;  %v6238_v11 = vor.u32 %v7687_v62, %v6235_v63  ;;  %4062 = vmatpush.bf16.msrb.mxu3 %v7038_v35  ;;  %v7532_v63 = vld [vmem:[%s8333_s29 + $0x3f4] sm:$0xf0] }
 0x263   : > { %v6491_v3 = vld [vmem:[%s8333_s29 + $0xaf0] sm:$0xf0]  ;;  %v7596_v35 = vld [vmem:[%s8333_s29 + $0x5f4] sm:$0xf0] }
 0x264   : > { %v7815_v4 = vld [vmem:[%s8333_s29 + $0xcd4] sm:$0xf]  ;;  %v6494_v12 = vor.u32 %v7751_v0, %v6491_v3  ;;  %4024 = vmatpush.bf16.msrb.mxu0 %v6238_v11  ;;  %v5857_v0 = vld [vmem:[%s8333_s29 + $0x5d8] sm:$0xf]  ;;  %v5346_v11 = vor.u32 %v7468_v31, %v5345_v53 }
 0x265   : > { %v6747_v6 = vld [vmem:[%s8333_s29 + $0xcf0] sm:$0xf0]  ;;  %v7436_v53 = vld [vmem:[%s8333_s29 + $0xf4] sm:$0xf0] }
 0x266   : > { %v7879_v8 = vld [vmem:[%s8333_s29 + $0xed4] sm:$0xf]  ;;  %v6750_v13 = vor.u32 %v7815_v4, %v6747_v6  ;;  %4037 = vmatpush.bf16.msrb.mxu1 %v6494_v12  ;;  %v6113_v6 = vld [vmem:[%s8333_s29 + $0x7d8] sm:$0xf]  ;;  %v5602_v12 = vor.u32 %v7532_v63, %v5601_v61 }
 0x267   : > { %v7003_v58 = vld [vmem:[%s8333_s29 + $0xef0] sm:$0xf0]  ;;  %v5473_v31 = vld [vmem:[%s8333_s29 + $0x2d8] sm:$0xf] }
 0x268   : > { %v7679_v14 = vld [vmem:[%s8333_s29 + $0x894] sm:$0xf]  ;;  %v7006_v19 = vor.u32 %v7879_v8, %v7003_v58  ;;  %4050 = vmatpush.bf16.msrb.mxu2 %v6750_v13  ;;  %v7660_v8 = vld [vmem:[%s8333_s29 + $0x7f4] sm:$0xf0]  ;;  %v5858_v13 = vor.u32 %v7596_v35, %v5857_v0 }
 0x269   : > { %v6203_v16 = vld [vmem:[%s8333_s29 + $0x8b0] sm:$0xf0]  ;;  %v7500_v0 = vld [vmem:[%s8333_s29 + $0x2f4] sm:$0xf0] }
 0x26a   : > { %v7743_v17 = vld [vmem:[%s8333_s29 + $0xa94] sm:$0xf]  ;;  %v6206_v29 = vor.u32 %v7679_v14, %v6203_v16  ;;  %4063 = vmatpush.bf16.msrb.mxu3 %v7006_v19  ;;  %v3783_v14 = vadd.f32 %v9185_v1, %v9180_v60  ;;  %v5313_v16 = vld [vmem:[%s8333_s29 + $0x198] sm:$0xf] }
 0x26b   : > { %v6459_v20 = vld [vmem:[%s8333_s29 + $0xab0] sm:$0xf0]  ;;  %v5569_v19 = vld [vmem:[%s8333_s29 + $0x398] sm:$0xf] }
 0x26c   : > { %v7807_v23 = vld [vmem:[%s8333_s29 + $0xc94] sm:$0xf]  ;;  %v6462_v33 = vor.u32 %v7743_v17, %v6459_v20  ;;  %4025 = vmatpush.bf16.msrb.mxu0 %v6206_v29  ;;  %v7460_v17 = vld [vmem:[%s8333_s29 + $0x1b4] sm:$0xf0]  ;;  %v6114_v20 = vor.u32 %v7660_v8, %v6113_v6 }
 0x26d   : > { %v6715_v24 = vld [vmem:[%s8333_s29 + $0xcb0] sm:$0xf0]  ;;  %v7652_v29 = vld [vmem:[%s8333_s29 + $0x7b4] sm:$0xf0]  ;;  %v5314_v60 = vor.u32 %v7460_v17, %v5313_v16  ;;  %v3847_v17 = vpop.f32.mrf.mxu2 }
 0x26e   : > { %v7871_v27 = vld [vmem:[%s8333_s29 + $0xe94] sm:$0xf]  ;;  %v6718_v34 = vor.u32 %v7807_v23, %v6715_v24  ;;  %4038 = vmatpush.bf16.msrb.mxu1 %v6462_v33  ;;  %v7524_v23 = vld [vmem:[%s8333_s29 + $0x3b4] sm:$0xf0]  ;;  %v3796_v33 = vadd.f32 %v9195_v18, %v3783_v14 }
 0x26f   : > { %v6971_v28 = vld [vmem:[%s8333_s29 + $0xeb0] sm:$0xf0]  ;;  %v5825_v24 = vld [vmem:[%s8333_s29 + $0x598] sm:$0xf]  ;;  %v5570_v1 = vor.u32 %v7524_v23, %v5569_v19 }
 0x270   : > { %v7671_v2 = vld [vmem:[%s8333_s29 + $0x854] sm:$0xf]  ;;  %v6974_v38 = vor.u32 %v7871_v27, %v6971_v28  ;;  %4051 = vmatpush.bf16.msrb.mxu2 %v6718_v34  ;;  %v7588_v27 = vld [vmem:[%s8333_s29 + $0x5b4] sm:$0xf0] }
 0x271   : > { %v6171_v9 = vld [vmem:[%s8333_s29 + $0x870] sm:$0xf0]  ;;  %v6081_v28 = vld [vmem:[%s8333_s29 + $0x798] sm:$0xf]  ;;  %v5826_v32 = vor.u32 %v7588_v27, %v5825_v24 }
 0x272   : > { %v7735_v36 = vld [vmem:[%s8333_s29 + $0xa54] sm:$0xf]  ;;  %v6174_v44 = vor.u32 %v7671_v2, %v6171_v9  ;;  %4064 = vmatpush.bf16.msrb.mxu3 %v6974_v38  ;;  %v5281_v34 = vld [vmem:[%s8333_s29 + $0x158] sm:$0xf] }
 0x273   : > { %v6427_v10 = vld [vmem:[%s8333_s29 + $0xa70] sm:$0xf0]  ;;  %v7452_v2 = vld [vmem:[%s8333_s29 + $0x174] sm:$0xf0] }
 0x274   : > { %v7799_v15 = vld [vmem:[%s8333_s29 + $0xc54] sm:$0xf]  ;;  %v6430_v48 = vor.u32 %v7735_v36, %v6427_v10  ;;  %4026 = vmatpush.bf16.msrb.mxu0 %v6174_v44  ;;  %v5537_v9 = vld [vmem:[%s8333_s29 + $0x358] sm:$0xf]  ;;  %v6082_v36 = vor.u32 %v7652_v29, %v6081_v28  ;;  %v3860_v28 = vpop.f32.mrf.mxu3 }
 0x275   : > { %v6683_v40 = vld [vmem:[%s8333_s29 + $0xc70] sm:$0xf0]  ;;  %v5793_v38 = vld [vmem:[%s8333_s29 + $0x558] sm:$0xf] }
 0x276   : > { %v7863_v41 = vld [vmem:[%s8333_s29 + $0xe54] sm:$0xf]  ;;  %v6686_v49 = vor.u32 %v7799_v15, %v6683_v40  ;;  %4039 = vmatpush.bf16.msrb.mxu1 %v6430_v48  ;;  %v7580_v10 = vld [vmem:[%s8333_s29 + $0x574] sm:$0xf0]  ;;  %v5282_v40 = vor.u32 %v7452_v2, %v5281_v34 }
 0x277   : > { %v6939_v46 = vld [vmem:[%s8333_s29 + $0xe70] sm:$0xf0]  ;;  %v6049_v15 = vld [vmem:[%s8333_s29 + $0x758] sm:$0xf]  ;;  %v5794_v44 = vor.u32 %v7580_v10, %v5793_v38 }
 0x278   : > { %v7663_v47 = vld [vmem:[%s8333_s29 + $0x814] sm:$0xf]  ;;  %v6942_v54 = vor.u32 %v7863_v41, %v6939_v46  ;;  %4052 = vmatpush.bf16.msrb.mxu2 %v6686_v49  ;;  %v7644_v18 = vld [vmem:[%s8333_s29 + $0x774] sm:$0xf0]  ;;  %v3809_v41 = vadd.f32 %v9200_v26, %v3796_v33  ;;  %v5538_v46 = vor.u32 %v7516_v37, %v5537_v9 }
 0x279   : > { %v6139_v25 = vld [vmem:[%s8333_s29 + $0x830] sm:$0xf0]  ;;  %v5505_v48 = vld [vmem:[%s8333_s29 + $0x318] sm:$0xf]  ;;  %v6050_v49 = vor.u32 %v7644_v18, %v6049_v15 }
 0x27a   : > { %v7727_v50 = vld [vmem:[%s8333_s29 + $0xa14] sm:$0xf]  ;;  %v6142_v62 = vor.u32 %v7663_v47, %v6139_v25  ;;  %4065 = vmatpush.bf16.msrb.mxu3 %v6942_v54  ;;  %v5249_v47 = vld [vmem:[%s8333_s29 + $0x118] sm:$0xf] }
 0x27b   : > { %v6395_v51 = vld [vmem:[%s8333_s29 + $0xa30] sm:$0xf0]  ;;  %v7444_v25 = vld [vmem:[%s8333_s29 + $0x134] sm:$0xf0] }
 0x27c   : > { %v7791_v52 = vld [vmem:[%s8333_s29 + $0xc14] sm:$0xf]  ;;  %v6398_v3 = vor.u32 %v7727_v50, %v6395_v51  ;;  %4027 = vmatpush.bf16.msrb.mxu0 %v6142_v62  ;;  %v7508_v50 = vld [vmem:[%s8333_s29 + $0x334] sm:$0xf0]  ;;  %v5250_v26 = vor.u32 %v7444_v25, %v5249_v47  ;;  %v3834_v62 = vpop.f32.mrf.mxu1 }
 0x27d   : > { %v6651_v55 = vld [vmem:[%s8333_s29 + $0xc30] sm:$0xf0]  ;;  %v5761_v51 = vld [vmem:[%s8333_s29 + $0x518] sm:$0xf] }
 0x27e   : > { %v7855_v56 = vld [vmem:[%s8333_s29 + $0xe14] sm:$0xf]  ;;  %v6654_v4 = vor.u32 %v7791_v52, %v6651_v55  ;;  %4040 = vmatpush.bf16.msrb.mxu1 %v6398_v3  ;;  %v7572_v52 = vld [vmem:[%s8333_s29 + $0x534] sm:$0xf0]  ;;  %v3821_v55 = vpop.f32.mrf.mxu0 }
 0x27f   : > { %v6907_v57 = vld [vmem:[%s8333_s29 + $0xe30] sm:$0xf0]  ;;  %4028 = vmatmul.bf16.vlgmr.msrb.gmra.mxu0 %v8512_v42  ;;  %v7636_v54 = vld [vmem:[%s8333_s29 + $0x734] sm:$0xf0]  ;;  %v3822_v61 = vadd.f32 %v3821_v55, %v3809_v41 }
 0x280   : > { %v6910_v58 = vor.u32 %v7855_v56, %v6907_v57  ;;  %4053 = vmatpush.bf16.msrb.mxu2 %v6654_v4  ;;  %4072 = vmatpush.bf16.msra.mxu0 %v5346_v11  ;;  %v5506_v56 = vor.u32 %v7508_v50, %v5505_v48  ;;  %v5762_v57 = vor.u32 %v7572_v52, %v5761_v51  ;;  %v5729_v35 = vld [vmem:[%s8333_s29 + $0x4d8] sm:$0xf] }
 0x281   : > { %4041 = vmatmul.bf16.vlgmr.msrb.gmra.mxu1 %v8516_v45  ;;  %v6018_v63 = vor.u32 %v7636_v54, %v6017_v30  ;;  %v7564_v3 = vld [vmem:[%s8333_s29 + $0x4f4] sm:$0xf0]  ;;  %v3835_v8 = vadd.f32 %v3834_v62, %v3822_v61  ;;  %v5474_v11 = vor.u32 %v7500_v0, %v5473_v31 }
 0x282   : > { %4066 = vmatpush.bf16.msrb.mxu3 %v6910_v58  ;;  %4085 = vmatpush.bf16.msra.mxu1 %v5602_v12  ;;  %v5985_v4 = vld [vmem:[%s8333_s29 + $0x6d8] sm:$0xf]  ;;  %v5218_v58 = vor.u32 %v7436_v53, %v5217_v59  ;;  %v5730_v12 = vor.u32 %v7564_v3, %v5729_v35  ;;  %v3862_v53 = vpop.f32.mrf.mxu3 }
 0x283   : > { %4054 = vmatmul.bf16.vlgmr.msrb.gmra.mxu2 %v8508_v39  ;;  %v7628_v6 = vld [vmem:[%s8333_s29 + $0x6f4] sm:$0xf0]  ;;  %v3848_v27 = vadd.f32 %v3847_v17, %v3835_v8 }
 0x284   : > { %4098 = vmatpush.bf16.msra.mxu2 %v5858_v13  ;;  %4073 = vmatpush.bf16.msra.mxu0 %v5314_v60  ;;  %v5185_v13 = vld [vmem:[%s8333_s29 + $0x98] sm:$0xf]  ;;  %v5986_v19 = vor.u32 %v7628_v6, %v5985_v4  ;;  %v3836_v10 = vpop.f32.mrf.mxu1 }
 0x285   : > { %4067 = vmatmul.bf16.vlgmr.msrb.gmra.mxu3 %v8514_v43  ;;  %v7428_v14 = vld [vmem:[%s8333_s29 + $0xb4] sm:$0xf0]  ;;  %v3861_v33 = vadd.f32 %v3860_v28, %v3848_v27 }
 0x286   : > { %4111 = vmatpush.bf16.msra.mxu3 %v6114_v20  ;;  %4086 = vmatpush.bf16.msra.mxu1 %v5570_v1  ;;  %v5441_v16 = vld [vmem:[%s8333_s29 + $0x298] sm:$0xf]  ;;  %v343_v1 = vld [vmem:[#allocation2 + $0x10] sm:$0xff]  ;;  %v3823_v34 = vpop.f32.mrf.mxu0 }
 0x287   : > { %v7492_v20 = vld [vmem:[%s8333_s29 + $0x2b4] sm:$0xf0]  ;;  %v4283_v18 = vadd.f32 %v3861_v33, %v343_v1 }
 0x288   : > { %4099 = vmatpush.bf16.msra.mxu2 %v5826_v32  ;;  %4074 = vmatpush.bf16.msra.mxu0 %v5282_v40  ;;  %v5697_v23 = vld [vmem:[%s8333_s29 + $0x498] sm:$0xf]  ;;  %v5186_v32 = vor.u32 %v7428_v14, %v5185_v13  ;;  %v5442_v2 = vor.u32 %v7492_v20, %v5441_v16 }
 0x289   : > { %v7556_v24 = vld [vmem:[%s8333_s29 + $0x4b4] sm:$0xf0]  ;;  %4291 = vst [vmem:[#allocation2 + $0x10] sm:$0xff] %v4283_v18 }
 0x28a   : > { %4112 = vmatpush.bf16.msra.mxu3 %v6082_v36  ;;  %4087 = vmatpush.bf16.msra.mxu1 %v5538_v46  ;;  %v5953_v29 = vld [vmem:[%s8333_s29 + $0x698] sm:$0xf]  ;;  %v5698_v9 = vor.u32 %v7556_v24, %v5697_v23 }
 0x28b   : > { %v7620_v60 = vld [vmem:[%s8333_s29 + $0x6b4] sm:$0xf0] }
 0x28c   : > { %4100 = vmatpush.bf16.msra.mxu2 %v5794_v44  ;;  %4075 = vmatpush.bf16.msra.mxu0 %v5250_v26  ;;  %v5153_v36 = vld [vmem:[%s8333_s29 + $0x58] sm:$0xf]  ;;  %v5954_v15 = vor.u32 %v7620_v60, %v5953_v29  ;;  %v3849_v26 = vpop.f32.mrf.mxu2  ;;  %v9333_v53 = vpop.f32.mrf.mxu1 }
 0x28d   : > { %v7420_v37 = vld [vmem:[%s8333_s29 + $0x74] sm:$0xf0] }
 0x28e   : > { %4113 = vmatpush.bf16.msra.mxu3 %v6050_v49  ;;  %4088 = vmatpush.bf16.msra.mxu1 %v5506_v56  ;;  %v5409_v38 = vld [vmem:[%s8333_s29 + $0x258] sm:$0xf]  ;;  %v5154_v25 = vor.u32 %v7420_v37, %v5153_v36 }
 0x28f   : > { %v7484_v40 = vld [vmem:[%s8333_s29 + $0x274] sm:$0xf0] }
 0x290   : > { %4101 = vmatpush.bf16.msra.mxu2 %v5762_v57  ;;  %4076 = vmatpush.bf16.msra.mxu0 %v5218_v58  ;;  %v5665_v41 = vld [vmem:[%s8333_s29 + $0x458] sm:$0xf]  ;;  %v5410_v50 = vor.u32 %v7484_v40, %v5409_v38 }
 0x291   : > { %v7548_v46 = vld [vmem:[%s8333_s29 + $0x474] sm:$0xf0] }
 0x292   : > { %4114 = vmatpush.bf16.msra.mxu3 %v6018_v63  ;;  %4089 = vmatpush.bf16.msra.mxu1 %v5474_v11  ;;  %v5921_v44 = vld [vmem:[%s8333_s29 + $0x658] sm:$0xf]  ;;  %v5666_v51 = vor.u32 %v7548_v46, %v5665_v41 }
 0x293   : > { %v7612_v47 = vld [vmem:[%s8333_s29 + $0x674] sm:$0xf0] }
 0x294   : > { %4102 = vmatpush.bf16.msra.mxu2 %v5730_v12  ;;  %4077 = vmatpush.bf16.msra.mxu0 %v5186_v32  ;;  %v5121_v48 = vld [vmem:[%s8333_s29 + $0x18] sm:$0xf]  ;;  %v5922_v55 = vor.u32 %v7612_v47, %v5921_v44 }
 0x295   : > { %v7412_v49 = vld [vmem:[%s8333_s29 + $0x34] sm:$0xf0] }
 0x296   : > { %4115 = vmatpush.bf16.msra.mxu3 %v5986_v19  ;;  %4090 = vmatpush.bf16.msra.mxu1 %v5442_v2  ;;  %v5377_v52 = vld [vmem:[%s8333_s29 + $0x218] sm:$0xf]  ;;  %v5122_v63 = vor.u32 %v7412_v49, %v5121_v48 }
 0x297   : > { %v7476_v30 = vld [vmem:[%s8333_s29 + $0x234] sm:$0xf0] }
 0x298   : > { %4103 = vmatpush.bf16.msra.mxu2 %v5698_v9  ;;  %v5633_v54 = vld [vmem:[%s8333_s29 + $0x418] sm:$0xf]  ;;  %4078 = vmatpush.bf16.msra.mxu0 %v5154_v25  ;;  %v5378_v4 = vor.u32 %v7476_v30, %v5377_v52 }
 0x299   : > { %v7540_v56 = vld [vmem:[%s8333_s29 + $0x434] sm:$0xf0] }
 0x29a   : > { %4116 = vmatpush.bf16.msra.mxu3 %v5954_v15  ;;  %v5889_v57 = vld [vmem:[%s8333_s29 + $0x618] sm:$0xf]  ;;  %4091 = vmatpush.bf16.msra.mxu1 %v5410_v50  ;;  %v5634_v6 = vor.u32 %v7540_v56, %v5633_v54  ;;  %v9328_v54 = vpop.f32.mrf.mxu0 }
 0x29b   : > { %v7604_v59 = vld [vmem:[%s8333_s29 + $0x634] sm:$0xf0] }
 0x29c   : > { %v6369_v31 = vld [vmem:[%s8333_s29 + $0x9d8] sm:$0xf]  ;;  %4104 = vmatpush.bf16.msra.mxu2 %v5666_v51  ;;  %v5890_v11 = vor.u32 %v7604_v59, %v5889_v57  ;;  %4079 = vmatpush.bf16.msra.mxu0 %v5122_v63 }
 0x29d   : > { %v7724_v61 = vld [vmem:[%s8333_s29 + $0x9f4] sm:$0xf0] }
 0x29e   : > { %v6625_v62 = vld [vmem:[%s8333_s29 + $0xbd8] sm:$0xf]  ;;  %4117 = vmatpush.bf16.msra.mxu3 %v5922_v55  ;;  %v6370_v12 = vor.u32 %v7724_v61, %v6369_v31  ;;  %4092 = vmatpush.bf16.msra.mxu1 %v5378_v4 }
 0x29f   : > { %v7788_v0 = vld [vmem:[%s8333_s29 + $0xbf4] sm:$0xf0]  ;;  %4080 = vmatmul.bf16.vlgmr.msra.gmra.mxu0 %v8453_v21 }
 0x2a0   : > { %v6881_v35 = vld [vmem:[%s8333_s29 + $0xdd8] sm:$0xf]  ;;  %v6626_v13 = vor.u32 %v7788_v0, %v6625_v62  ;;  %4105 = vmatpush.bf16.msra.mxu2 %v5634_v6  ;;  %4124 = vmatpush.bf16.msrb.mxu0 %v6370_v12  ;;  %v9343_v12 = vpop.f32.mrf.mxu2 }
 0x2a1   : > { %v7852_v3 = vld [vmem:[%s8333_s29 + $0xdf4] sm:$0xf0]  ;;  %4093 = vmatmul.bf16.vlgmr.msra.gmra.mxu1 %v8456_v22 }
 0x2a2   : > { %v7137_v8 = vld [vmem:[%s8333_s29 + $0xfd8] sm:$0xf]  ;;  %v6882_v14 = vor.u32 %v7852_v3, %v6881_v35  ;;  %4118 = vmatpush.bf16.msra.mxu3 %v5890_v11  ;;  %4137 = vmatpush.bf16.msrb.mxu1 %v6626_v13 }
 0x2a3   : > { %v7916_v58 = vld [vmem:[%s8333_s29 + $0xff4] sm:$0xf0]  ;;  %4106 = vmatmul.bf16.vlgmr.msra.gmra.mxu2 %v8439_v5 }
 0x2a4   : > { %v6337_v16 = vld [vmem:[%s8333_s29 + $0x998] sm:$0xf]  ;;  %v7138_v20 = vor.u32 %v7916_v58, %v7137_v8  ;;  %4150 = vmatpush.bf16.msrb.mxu2 %v6882_v14 }
 0x2a5   : > { %v7716_v17 = vld [vmem:[%s8333_s29 + $0x9b4] sm:$0xf0]  ;;  %4119 = vmatmul.bf16.vlgmr.msra.gmra.mxu3 %v8442_v7 }
 0x2a6   : > { %v6593_v19 = vld [vmem:[%s8333_s29 + $0xb98] sm:$0xf]  ;;  %v6338_v60 = vor.u32 %v7716_v17, %v6337_v16  ;;  %4163 = vmatpush.bf16.msrb.mxu3 %v7138_v20 }
 0x2a7   : > { %v7780_v23 = vld [vmem:[%s8333_s29 + $0xbb4] sm:$0xf0] }
 0x2a8   : > { %v6849_v24 = vld [vmem:[%s8333_s29 + $0xd98] sm:$0xf]  ;;  %v6594_v1 = vor.u32 %v7780_v23, %v6593_v19  ;;  %4125 = vmatpush.bf16.msrb.mxu0 %v6338_v60  ;;  %v9348_v19 = vpop.f32.mrf.mxu3 }
 0x2a9   : > { %v7844_v27 = vld [vmem:[%s8333_s29 + $0xdb4] sm:$0xf0] }
 0x2aa   : > { %v7105_v28 = vld [vmem:[%s8333_s29 + $0xf98] sm:$0xf]  ;;  %v6850_v32 = vor.u32 %v7844_v27, %v6849_v24  ;;  %4138 = vmatpush.bf16.msrb.mxu1 %v6594_v1  ;;  %v3875_v27 = vpop.f32.mrf.mxu0 }
 0x2ab   : > { %v7908_v29 = vld [vmem:[%s8333_s29 + $0xfb4] sm:$0xf0] }
 0x2ac   : > { %v6305_v33 = vld [vmem:[%s8333_s29 + $0x958] sm:$0xf]  ;;  %v7106_v9 = vor.u32 %v7908_v29, %v7105_v28  ;;  %4151 = vmatpush.bf16.msrb.mxu2 %v6850_v32 }
 0x2ad   : > { %v7708_v34 = vld [vmem:[%s8333_s29 + $0x974] sm:$0xf0] }
 0x2ae   : > { %v6561_v2 = vld [vmem:[%s8333_s29 + $0xb58] sm:$0xf]  ;;  %v6306_v18 = vor.u32 %v7708_v34, %v6305_v33  ;;  %4164 = vmatpush.bf16.msrb.mxu3 %v7106_v9  ;;  %v3888_v33 = vpop.f32.mrf.mxu1 }
 0x2af   : > { %v7772_v36 = vld [vmem:[%s8333_s29 + $0xb74] sm:$0xf0]  ;;  %v5539_v33 = vld [vmem:[%s8333_s29 + $0x378] sm:$0xf0] }
 0x2b0   : > { %v6817_v37 = vld [vmem:[%s8333_s29 + $0xd58] sm:$0xf]  ;;  %v6562_v40 = vor.u32 %v7772_v36, %v6561_v2  ;;  %4126 = vmatpush.bf16.msrb.mxu0 %v6306_v18 }
 0x2b1   : > { %v7836_v38 = vld [vmem:[%s8333_s29 + $0xd74] sm:$0xf0] }
 0x2b2   : > { %v7073_v10 = vld [vmem:[%s8333_s29 + $0xf58] sm:$0xf]  ;;  %v6818_v41 = vor.u32 %v7836_v38, %v6817_v37  ;;  %4139 = vmatpush.bf16.msrb.mxu1 %v6562_v40 }
 0x2b3   : > { %v7900_v15 = vld [vmem:[%s8333_s29 + $0xf74] sm:$0xf0] }
 0x2b4   : > { %v6273_v46 = vld [vmem:[%s8333_s29 + $0x918] sm:$0xf]  ;;  %v7074_v25 = vor.u32 %v7900_v15, %v7073_v10  ;;  %4152 = vmatpush.bf16.msrb.mxu2 %v6818_v41 }
 0x2b5   : > { %v7700_v44 = vld [vmem:[%s8333_s29 + $0x934] sm:$0xf0] }
 0x2b6   : > { %v6529_v47 = vld [vmem:[%s8333_s29 + $0xb18] sm:$0xf]  ;;  %v6274_v30 = vor.u32 %v7700_v44, %v6273_v46  ;;  %4165 = vmatpush.bf16.msrb.mxu3 %v7074_v25  ;;  %v3901_v25 = vpop.f32.mrf.mxu2 }
 0x2b7   : > { %v7764_v48 = vld [vmem:[%s8333_s29 + $0xb34] sm:$0xf0]  ;;  %v7632_v25 = vld [vmem:[%s8333_s29 + $0x71c] sm:$0xf] }
 0x2b8   : > { %v6785_v49 = vld [vmem:[%s8333_s29 + $0xd18] sm:$0xf]  ;;  %v6530_v26 = vor.u32 %v7764_v48, %v6529_v47  ;;  %4127 = vmatpush.bf16.msrb.mxu0 %v6274_v30  ;;  %v7464_v30 = vld [vmem:[%s8333_s29 + $0x1dc] sm:$0xf] }
 0x2b9   : > { %v7828_v50 = vld [vmem:[%s8333_s29 + $0xd34] sm:$0xf0] }
 0x2ba   : > { %v7041_v51 = vld [vmem:[%s8333_s29 + $0xf18] sm:$0xf]  ;;  %v6786_v55 = vor.u32 %v7828_v50, %v6785_v49  ;;  %4140 = vmatpush.bf16.msrb.mxu1 %v6530_v26  ;;  %v5347_v26 = vld [vmem:[%s8333_s29 + $0x1f8] sm:$0xf0] }
 0x2bb   : > { %v7892_v52 = vld [vmem:[%s8333_s29 + $0xf34] sm:$0xf0] }
 0x2bc   : > { %v6241_v56 = vld [vmem:[%s8333_s29 + $0x8d8] sm:$0xf]  ;;  %v7042_v31 = vor.u32 %v7892_v52, %v7041_v51  ;;  %4153 = vmatpush.bf16.msrb.mxu2 %v6786_v55  ;;  %v3914_v52 = vpop.f32.mrf.mxu3  ;;  %v7528_v55 = vld [vmem:[%s8333_s29 + $0x3dc] sm:$0xf] }
 0x2bd   : > { %v7692_v57 = vld [vmem:[%s8333_s29 + $0x8f4] sm:$0xf0]  ;;  %v7432_v52 = vld [vmem:[%s8333_s29 + $0xdc] sm:$0xf] }
 0x2be   : > { %v6497_v59 = vld [vmem:[%s8333_s29 + $0xad8] sm:$0xf]  ;;  %v6242_v3 = vor.u32 %v7692_v57, %v6241_v56  ;;  %4166 = vmatpush.bf16.msrb.mxu3 %v7042_v31  ;;  %v5603_v57 = vld [vmem:[%s8333_s29 + $0x3f8] sm:$0xf0] }
 0x2bf   : > { %v7756_v61 = vld [vmem:[%s8333_s29 + $0xaf4] sm:$0xf0]  ;;  %v5859_v31 = vld [vmem:[%s8333_s29 + $0x5f8] sm:$0xf0] }
 0x2c0   : > { %v6753_v62 = vld [vmem:[%s8333_s29 + $0xcd8] sm:$0xf]  ;;  %v6498_v4 = vor.u32 %v7756_v61, %v6497_v59  ;;  %4128 = vmatpush.bf16.msrb.mxu0 %v6242_v3  ;;  %v7592_v59 = vld [vmem:[%s8333_s29 + $0x5dc] sm:$0xf]  ;;  %v5350_v3 = vor.u32 %v7464_v30, %v5347_v26 }
 0x2c1   : > { %v7820_v63 = vld [vmem:[%s8333_s29 + $0xcf4] sm:$0xf0]  ;;  %v5219_v30 = vld [vmem:[%s8333_s29 + $0xf8] sm:$0xf0] }
 0x2c2   : > { %v7009_v0 = vld [vmem:[%s8333_s29 + $0xed8] sm:$0xf]  ;;  %v6754_v6 = vor.u32 %v7820_v63, %v6753_v62  ;;  %4141 = vmatpush.bf16.msrb.mxu1 %v6498_v4  ;;  %v7656_v63 = vld [vmem:[%s8333_s29 + $0x7dc] sm:$0xf]  ;;  %v5606_v4 = vor.u32 %v7528_v55, %v5603_v57 }
 0x2c3   : > { %v7884_v35 = vld [vmem:[%s8333_s29 + $0xef4] sm:$0xf0]  ;;  %v7496_v26 = vld [vmem:[%s8333_s29 + $0x2dc] sm:$0xf] }
 0x2c4   : > { %v6209_v8 = vld [vmem:[%s8333_s29 + $0x898] sm:$0xf]  ;;  %v7010_v13 = vor.u32 %v7884_v35, %v7009_v0  ;;  %4154 = vmatpush.bf16.msrb.mxu2 %v6754_v6  ;;  %v6115_v0 = vld [vmem:[%s8333_s29 + $0x7f8] sm:$0xf0]  ;;  %v5862_v6 = vor.u32 %v7592_v59, %v5859_v31 }
 0x2c5   : > { %v7684_v58 = vld [vmem:[%s8333_s29 + $0x8b4] sm:$0xf0]  ;;  %v5475_v59 = vld [vmem:[%s8333_s29 + $0x2f8] sm:$0xf0] }
 0x2c6   : > { %v6465_v11 = vld [vmem:[%s8333_s29 + $0xa98] sm:$0xf]  ;;  %v6210_v24 = vor.u32 %v7684_v58, %v6209_v8  ;;  %4167 = vmatpush.bf16.msrb.mxu3 %v7010_v13  ;;  %v3887_v8 = vadd.f32 %v9333_v53, %v9328_v54  ;;  %v7456_v58 = vld [vmem:[%s8333_s29 + $0x19c] sm:$0xf] }
 0x2c7   : > { %v7748_v14 = vld [vmem:[%s8333_s29 + $0xab4] sm:$0xf0]  ;;  %v7520_v13 = vld [vmem:[%s8333_s29 + $0x39c] sm:$0xf] }
 0x2c8   : > { %v6721_v16 = vld [vmem:[%s8333_s29 + $0xc98] sm:$0xf]  ;;  %v6466_v28 = vor.u32 %v7748_v14, %v6465_v11  ;;  %4129 = vmatpush.bf16.msrb.mxu0 %v6210_v24  ;;  %v5315_v11 = vld [vmem:[%s8333_s29 + $0x1b8] sm:$0xf0]  ;;  %v6118_v14 = vor.u32 %v7656_v63, %v6115_v0 }
 0x2c9   : > { %v7812_v17 = vld [vmem:[%s8333_s29 + $0xcb4] sm:$0xf0]  ;;  %v6083_v24 = vld [vmem:[%s8333_s29 + $0x7b8] sm:$0xf0]  ;;  %v5318_v54 = vor.u32 %v7456_v58, %v5315_v11  ;;  %v3951_v11 = vpop.f32.mrf.mxu2 }
 0x2ca   : > { %v6977_v20 = vld [vmem:[%s8333_s29 + $0xe98] sm:$0xf]  ;;  %v6722_v29 = vor.u32 %v7812_v17, %v6721_v16  ;;  %4142 = vmatpush.bf16.msrb.mxu1 %v6466_v28  ;;  %v5571_v16 = vld [vmem:[%s8333_s29 + $0x3b8] sm:$0xf0]  ;;  %v3900_v28 = vadd.f32 %v9343_v12, %v3887_v8 }
 0x2cb   : > { %v7876_v23 = vld [vmem:[%s8333_s29 + $0xeb4] sm:$0xf0]  ;;  %v7584_v17 = vld [vmem:[%s8333_s29 + $0x59c] sm:$0xf]  ;;  %v5574_v53 = vor.u32 %v7520_v13, %v5571_v16 }
 0x2cc   : > { %v6177_v60 = vld [vmem:[%s8333_s29 + $0x858] sm:$0xf]  ;;  %v6978_v34 = vor.u32 %v7876_v23, %v6977_v20  ;;  %4155 = vmatpush.bf16.msrb.mxu2 %v6722_v29  ;;  %v5827_v20 = vld [vmem:[%s8333_s29 + $0x5b8] sm:$0xf0] }
 0x2cd   : > { %v7676_v1 = vld [vmem:[%s8333_s29 + $0x874] sm:$0xf0]  ;;  %v7648_v23 = vld [vmem:[%s8333_s29 + $0x79c] sm:$0xf]  ;;  %v5830_v27 = vor.u32 %v7584_v17, %v5827_v20 }
 0x2ce   : > { %v6433_v32 = vld [vmem:[%s8333_s29 + $0xa58] sm:$0xf]  ;;  %v6178_v10 = vor.u32 %v7676_v1, %v6177_v60  ;;  %4168 = vmatpush.bf16.msrb.mxu3 %v6978_v34  ;;  %v7448_v29 = vld [vmem:[%s8333_s29 + $0x15c] sm:$0xf] }
 0x2cf   : > { %v7740_v2 = vld [vmem:[%s8333_s29 + $0xa74] sm:$0xf0]  ;;  %v5283_v60 = vld [vmem:[%s8333_s29 + $0x178] sm:$0xf0] }
 0x2d0   : > { %v6689_v9 = vld [vmem:[%s8333_s29 + $0xc58] sm:$0xf]  ;;  %v6434_v40 = vor.u32 %v7740_v2, %v6433_v32  ;;  %4130 = vmatpush.bf16.msrb.mxu0 %v6178_v10  ;;  %v7512_v1 = vld [vmem:[%s8333_s29 + $0x35c] sm:$0xf]  ;;  %v6086_v32 = vor.u32 %v7648_v23, %v6083_v24  ;;  %v3964_v23 = vpop.f32.mrf.mxu3 }
 0x2d1   : > { %v7804_v36 = vld [vmem:[%s8333_s29 + $0xc74] sm:$0xf0]  ;;  %v7576_v34 = vld [vmem:[%s8333_s29 + $0x55c] sm:$0xf] }
 0x2d2   : > { %v6945_v37 = vld [vmem:[%s8333_s29 + $0xe58] sm:$0xf]  ;;  %v6690_v41 = vor.u32 %v7804_v36, %v6689_v9  ;;  %4143 = vmatpush.bf16.msrb.mxu1 %v6434_v40  ;;  %v5795_v2 = vld [vmem:[%s8333_s29 + $0x578] sm:$0xf0]  ;;  %v5286_v36 = vor.u32 %v7448_v29, %v5283_v60 }
 0x2d3   : > { %v7868_v38 = vld [vmem:[%s8333_s29 + $0xe74] sm:$0xf0]  ;;  %v7640_v9 = vld [vmem:[%s8333_s29 + $0x75c] sm:$0xf]  ;;  %v5798_v10 = vor.u32 %v7576_v34, %v5795_v2 }
 0x2d4   : > { %v6145_v15 = vld [vmem:[%s8333_s29 + $0x818] sm:$0xf]  ;;  %v6946_v48 = vor.u32 %v7868_v38, %v6945_v37  ;;  %4156 = vmatpush.bf16.msrb.mxu2 %v6690_v41  ;;  %v6051_v12 = vld [vmem:[%s8333_s29 + $0x778] sm:$0xf0]  ;;  %v3913_v37 = vadd.f32 %v9348_v19, %v3900_v28  ;;  %v5542_v38 = vor.u32 %v7512_v1, %v5539_v33 }
 0x2d5   : > { %v7668_v18 = vld [vmem:[%s8333_s29 + $0x834] sm:$0xf0]  ;;  %v7504_v40 = vld [vmem:[%s8333_s29 + $0x31c] sm:$0xf]  ;;  %v6054_v41 = vor.u32 %v7640_v9, %v6051_v12 }
 0x2d6   : > { %v6401_v46 = vld [vmem:[%s8333_s29 + $0xa18] sm:$0xf]  ;;  %v6146_v56 = vor.u32 %v7668_v18, %v6145_v15  ;;  %4169 = vmatpush.bf16.msrb.mxu3 %v6946_v48  ;;  %v7440_v15 = vld [vmem:[%s8333_s29 + $0x11c] sm:$0xf] }
 0x2d7   : > { %v7732_v44 = vld [vmem:[%s8333_s29 + $0xa34] sm:$0xf0]  ;;  %v5251_v18 = vld [vmem:[%s8333_s29 + $0x138] sm:$0xf0] }
 0x2d8   : > { %v6657_v47 = vld [vmem:[%s8333_s29 + $0xc18] sm:$0xf]  ;;  %v6402_v61 = vor.u32 %v7732_v44, %v6401_v46  ;;  %4131 = vmatpush.bf16.msrb.mxu0 %v6146_v56  ;;  %v5507_v46 = vld [vmem:[%s8333_s29 + $0x338] sm:$0xf0]  ;;  %v5254_v19 = vor.u32 %v7440_v15, %v5251_v18  ;;  %v3938_v56 = vpop.f32.mrf.mxu1 }
 0x2d9   : > { %v7796_v49 = vld [vmem:[%s8333_s29 + $0xc34] sm:$0xf0]  ;;  %v7568_v44 = vld [vmem:[%s8333_s29 + $0x51c] sm:$0xf] }
 0x2da   : > { %v6913_v50 = vld [vmem:[%s8333_s29 + $0xe18] sm:$0xf]  ;;  %v6658_v62 = vor.u32 %v7796_v49, %v6657_v47  ;;  %4144 = vmatpush.bf16.msrb.mxu1 %v6402_v61  ;;  %v5763_v47 = vld [vmem:[%s8333_s29 + $0x538] sm:$0xf0]  ;;  %v3925_v49 = vpop.f32.mrf.mxu0 }
 0x2db   : > { %v7860_v51 = vld [vmem:[%s8333_s29 + $0xe34] sm:$0xf0]  ;;  %4132 = vmatmul.bf16.vlgmr.msrb.gmra.mxu0 %v8512_v42  ;;  %v6019_v48 = vld [vmem:[%s8333_s29 + $0x738] sm:$0xf0]  ;;  %v3926_v55 = vadd.f32 %v3925_v49, %v3913_v37 }
 0x2dc   : > { %v6914_v35 = vor.u32 %v7860_v51, %v6913_v50  ;;  %4157 = vmatpush.bf16.msrb.mxu2 %v6658_v62  ;;  %4176 = vmatpush.bf16.msra.mxu0 %v5350_v3  ;;  %v5510_v50 = vor.u32 %v7504_v40, %v5507_v46  ;;  %v5766_v51 = vor.u32 %v7568_v44, %v5763_v47  ;;  %v7560_v31 = vld [vmem:[%s8333_s29 + $0x4dc] sm:$0xf] }
 0x2dd   : > { %4145 = vmatmul.bf16.vlgmr.msrb.gmra.mxu1 %v8516_v45  ;;  %v6022_v57 = vor.u32 %v7632_v25, %v6019_v48  ;;  %v5731_v61 = vld [vmem:[%s8333_s29 + $0x4f8] sm:$0xf0]  ;;  %v3939_v0 = vadd.f32 %v3938_v56, %v3926_v55  ;;  %v5478_v3 = vor.u32 %v7496_v26, %v5475_v59 }
 0x2de   : > { %4170 = vmatpush.bf16.msrb.mxu3 %v6914_v35  ;;  %4189 = vmatpush.bf16.msra.mxu1 %v5606_v4  ;;  %v7624_v62 = vld [vmem:[%s8333_s29 + $0x6dc] sm:$0xf]  ;;  %v5222_v35 = vor.u32 %v7432_v52, %v5219_v30  ;;  %v5734_v4 = vor.u32 %v7560_v31, %v5731_v61  ;;  %v3966_v30 = vpop.f32.mrf.mxu3 }
 0x2df   : > { %4158 = vmatmul.bf16.vlgmr.msrb.gmra.mxu2 %v8508_v39  ;;  %v5987_v63 = vld [vmem:[%s8333_s29 + $0x6f8] sm:$0xf0]  ;;  %v3952_v20 = vadd.f32 %v3951_v11, %v3939_v0 }
 0x2e0   : > { %4202 = vmatpush.bf16.msra.mxu2 %v5862_v6  ;;  %4177 = vmatpush.bf16.msra.mxu0 %v5318_v54  ;;  %v7424_v6 = vld [vmem:[%s8333_s29 + $0x9c] sm:$0xf]  ;;  %v5990_v13 = vor.u32 %v7624_v62, %v5987_v63  ;;  %v3940_v2 = vpop.f32.mrf.mxu1 }
 0x2e1   : > { %4171 = vmatmul.bf16.vlgmr.msrb.gmra.mxu3 %v8514_v43  ;;  %v5187_v8 = vld [vmem:[%s8333_s29 + $0xb8] sm:$0xf0]  ;;  %v3965_v28 = vadd.f32 %v3964_v23, %v3952_v20 }
 0x2e2   : > { %4215 = vmatpush.bf16.msra.mxu3 %v6118_v14  ;;  %4190 = vmatpush.bf16.msra.mxu1 %v5574_v53  ;;  %v7488_v58 = vld [vmem:[%s8333_s29 + $0x29c] sm:$0xf]  ;;  %v344_v53 = vld [vmem:[#allocation2 + $0x8] sm:$0xff]  ;;  %v3927_v29 = vpop.f32.mrf.mxu0 }
 0x2e3   : > { %v5443_v14 = vld [vmem:[%s8333_s29 + $0x2b8] sm:$0xf0]  ;;  %v4284_v12 = vadd.f32 %v3965_v28, %v344_v53 }
 0x2e4   : > { %4203 = vmatpush.bf16.msra.mxu2 %v5830_v27  ;;  %4178 = vmatpush.bf16.msra.mxu0 %v5286_v36  ;;  %v7552_v16 = vld [vmem:[%s8333_s29 + $0x49c] sm:$0xf]  ;;  %v5190_v27 = vor.u32 %v7424_v6, %v5187_v8  ;;  %v5446_v60 = vor.u32 %v7488_v58, %v5443_v14 }
 0x2e5   : > { %v5699_v17 = vld [vmem:[%s8333_s29 + $0x4b8] sm:$0xf0]  ;;  %4292 = vst [vmem:[#allocation2 + $0x8] sm:$0xff] %v4284_v12 }
 0x2e6   : > { %4216 = vmatpush.bf16.msra.mxu3 %v6086_v32  ;;  %4191 = vmatpush.bf16.msra.mxu1 %v5542_v38  ;;  %v7616_v24 = vld [vmem:[%s8333_s29 + $0x69c] sm:$0xf]  ;;  %v5702_v1 = vor.u32 %v7552_v16, %v5699_v17 }
 0x2e7   : > { %v5955_v54 = vld [vmem:[%s8333_s29 + $0x6b8] sm:$0xf0] }
 0x2e8   : > { %4204 = vmatpush.bf16.msra.mxu2 %v5798_v10  ;;  %4179 = vmatpush.bf16.msra.mxu0 %v5254_v19  ;;  %v7416_v32 = vld [vmem:[%s8333_s29 + $0x5c] sm:$0xf]  ;;  %v5958_v9 = vor.u32 %v7616_v24, %v5955_v54  ;;  %v3953_v19 = vpop.f32.mrf.mxu2 }
 0x2e9   : > { %v5155_v33 = vld [vmem:[%s8333_s29 + $0x78] sm:$0xf0] }
 0x2ea   : > { %4217 = vmatpush.bf16.msra.mxu3 %v6054_v41  ;;  %4192 = vmatpush.bf16.msra.mxu1 %v5510_v50  ;;  %v7480_v34 = vld [vmem:[%s8333_s29 + $0x25c] sm:$0xf]  ;;  %v5158_v18 = vor.u32 %v7416_v32, %v5155_v33 }
 0x2eb   : > { %v5411_v36 = vld [vmem:[%s8333_s29 + $0x278] sm:$0xf0] }
 0x2ec   : > { %4205 = vmatpush.bf16.msra.mxu2 %v5766_v51  ;;  %4180 = vmatpush.bf16.msra.mxu0 %v5222_v35  ;;  %v7544_v37 = vld [vmem:[%s8333_s29 + $0x45c] sm:$0xf]  ;;  %v5414_v46 = vor.u32 %v7480_v34, %v5411_v36 }
 0x2ed   : > { %v5667_v38 = vld [vmem:[%s8333_s29 + $0x478] sm:$0xf0] }
 0x2ee   : > { %4218 = vmatpush.bf16.msra.mxu3 %v6022_v57  ;;  %4193 = vmatpush.bf16.msra.mxu1 %v5478_v3  ;;  %v7608_v10 = vld [vmem:[%s8333_s29 + $0x65c] sm:$0xf]  ;;  %v5670_v44 = vor.u32 %v7544_v37, %v5667_v38 }
 0x2ef   : > { %v5923_v15 = vld [vmem:[%s8333_s29 + $0x678] sm:$0xf0] }
 0x2f0   : > { %4206 = vmatpush.bf16.msra.mxu2 %v5734_v4  ;;  %4181 = vmatpush.bf16.msra.mxu0 %v5190_v27  ;;  %v7408_v40 = vld [vmem:[%s8333_s29 + $0x1c] sm:$0xf]  ;;  %v5926_v49 = vor.u32 %v7608_v10, %v5923_v15 }
 0x2f1   : > { %v5123_v41 = vld [vmem:[%s8333_s29 + $0x38] sm:$0xf0] }
 0x2f2   : > { %4219 = vmatpush.bf16.msra.mxu3 %v5990_v13  ;;  %4194 = vmatpush.bf16.msra.mxu1 %v5446_v60  ;;  %v7472_v47 = vld [vmem:[%s8333_s29 + $0x21c] sm:$0xf]  ;;  %v5126_v57 = vor.u32 %v7408_v40, %v5123_v41 }
 0x2f3   : > { %v5379_v25 = vld [vmem:[%s8333_s29 + $0x238] sm:$0xf0] }
 0x2f4   : > { %4207 = vmatpush.bf16.msra.mxu2 %v5702_v1  ;;  %v7536_v48 = vld [vmem:[%s8333_s29 + $0x41c] sm:$0xf]  ;;  %4182 = vmatpush.bf16.msra.mxu0 %v5158_v18  ;;  %v5382_v62 = vor.u32 %v7472_v47, %v5379_v25 }
 0x2f5   : > { %v5635_v50 = vld [vmem:[%s8333_s29 + $0x438] sm:$0xf0] }
 0x2f6   : > { %4220 = vmatpush.bf16.msra.mxu3 %v5958_v9  ;;  %v7600_v51 = vld [vmem:[%s8333_s29 + $0x61c] sm:$0xf]  ;;  %4195 = vmatpush.bf16.msra.mxu1 %v5414_v46  ;;  %v5638_v63 = vor.u32 %v7536_v48, %v5635_v50  ;;  %v9476_v46 = vpop.f32.mrf.mxu0 }
 0x2f7   : > { %v5891_v52 = vld [vmem:[%s8333_s29 + $0x638] sm:$0xf0] }
 0x2f8   : > { %v7720_v26 = vld [vmem:[%s8333_s29 + $0x9dc] sm:$0xf]  ;;  %4208 = vmatpush.bf16.msra.mxu2 %v5670_v44  ;;  %v5894_v3 = vor.u32 %v7600_v51, %v5891_v52  ;;  %4183 = vmatpush.bf16.msra.mxu0 %v5126_v57 }
 0x2f9   : > { %v6371_v55 = vld [vmem:[%s8333_s29 + $0x9f8] sm:$0xf0] }
 0x2fa   : > { %v7784_v56 = vld [vmem:[%s8333_s29 + $0xbdc] sm:$0xf]  ;;  %4221 = vmatpush.bf16.msra.mxu3 %v5926_v49  ;;  %v6374_v4 = vor.u32 %v7720_v26, %v6371_v55  ;;  %4196 = vmatpush.bf16.msra.mxu1 %v5382_v62  ;;  %v9481_v49 = vpop.f32.mrf.mxu1 }
 0x2fb   : > { %v6627_v59 = vld [vmem:[%s8333_s29 + $0xbf8] sm:$0xf0]  ;;  %4184 = vmatmul.bf16.vlgmr.msra.gmra.mxu0 %v8453_v21 }
 0x2fc   : > { %v7848_v31 = vld [vmem:[%s8333_s29 + $0xddc] sm:$0xf]  ;;  %v6630_v6 = vor.u32 %v7784_v56, %v6627_v59  ;;  %4209 = vmatpush.bf16.msra.mxu2 %v5638_v63  ;;  %4228 = vmatpush.bf16.msrb.mxu0 %v6374_v4  ;;  %v4003_v63 = vpop.f32.mrf.mxu2 }
 0x2fd   : > { %v6883_v61 = vld [vmem:[%s8333_s29 + $0xdf8] sm:$0xf0]  ;;  %4197 = vmatmul.bf16.vlgmr.msra.gmra.mxu1 %v8456_v22 }
 0x2fe   : > { %v7912_v0 = vld [vmem:[%s8333_s29 + $0xfdc] sm:$0xf]  ;;  %v6886_v8 = vor.u32 %v7848_v31, %v6883_v61  ;;  %4222 = vmatpush.bf16.msra.mxu3 %v5894_v3  ;;  %4241 = vmatpush.bf16.msrb.mxu1 %v6630_v6  ;;  %v4016_v6 = vpop.f32.mrf.mxu3 }
 0x2ff   : > { %v7139_v35 = vld [vmem:[%s8333_s29 + $0xff8] sm:$0xf0]  ;;  %4210 = vmatmul.bf16.vlgmr.msra.gmra.mxu2 %v8439_v5 }
 0x300   : > { %v7712_v58 = vld [vmem:[%s8333_s29 + $0x99c] sm:$0xf]  ;;  %v7142_v14 = vor.u32 %v7912_v0, %v7139_v35  ;;  %4254 = vmatpush.bf16.msrb.mxu2 %v6886_v8 }
 0x301   : > { %v6339_v11 = vld [vmem:[%s8333_s29 + $0x9b8] sm:$0xf0]  ;;  %4223 = vmatmul.bf16.vlgmr.msra.gmra.mxu3 %v8442_v7 }
 0x302   : > { %v7776_v13 = vld [vmem:[%s8333_s29 + $0xb9c] sm:$0xf]  ;;  %v6342_v54 = vor.u32 %v7712_v58, %v6339_v11  ;;  %4267 = vmatpush.bf16.msrb.mxu3 %v7142_v14 }
 0x303   : > { %v6595_v16 = vld [vmem:[%s8333_s29 + $0xbb8] sm:$0xf0] }
 0x304   : > { %v7840_v17 = vld [vmem:[%s8333_s29 + $0xd9c] sm:$0xf]  ;;  %v6598_v53 = vor.u32 %v7776_v13, %v6595_v16  ;;  %4229 = vmatpush.bf16.msrb.mxu0 %v6342_v54  ;;  %v3979_v13 = vpop.f32.mrf.mxu0 }
 0x305   : > { %v6851_v20 = vld [vmem:[%s8333_s29 + $0xdb8] sm:$0xf0] }
 0x306   : > { %v7904_v23 = vld [vmem:[%s8333_s29 + $0xf9c] sm:$0xf]  ;;  %v6854_v27 = vor.u32 %v7840_v17, %v6851_v20  ;;  %4242 = vmatpush.bf16.msrb.mxu1 %v6598_v53 }
 0x307   : > { %v7107_v24 = vld [vmem:[%s8333_s29 + $0xfb8] sm:$0xf0] }
 0x308   : > { %v7704_v28 = vld [vmem:[%s8333_s29 + $0x95c] sm:$0xf]  ;;  %v7110_v1 = vor.u32 %v7904_v23, %v7107_v24  ;;  %4255 = vmatpush.bf16.msrb.mxu2 %v6854_v27  ;;  %v3992_v24 = vpop.f32.mrf.mxu1 }
 0x309   : > { %v6307_v29 = vld [vmem:[%s8333_s29 + $0x978] sm:$0xf0] }
 0x30a   : > { %v7768_v60 = vld [vmem:[%s8333_s29 + $0xb5c] sm:$0xf]  ;;  %v6310_v12 = vor.u32 %v7704_v28, %v6307_v29  ;;  %4268 = vmatpush.bf16.msrb.mxu3 %v7110_v1 }
 0x30b   : > { %v6563_v32 = vld [vmem:[%s8333_s29 + $0xb78] sm:$0xf0] }
 0x30c   : > { %v7832_v33 = vld [vmem:[%s8333_s29 + $0xd5c] sm:$0xf]  ;;  %v6566_v5 = vor.u32 %v7768_v60, %v6563_v32  ;;  %4230 = vmatpush.bf16.msrb.mxu0 %v6310_v12  ;;  %v4005_v12 = vpop.f32.mrf.mxu2 }
 0x30d   : > { %v6819_v34 = vld [vmem:[%s8333_s29 + $0xd78] sm:$0xf0] }
 0x30e   : > { %v7896_v2 = vld [vmem:[%s8333_s29 + $0xf5c] sm:$0xf]  ;;  %v6822_v36 = vor.u32 %v7832_v33, %v6819_v34  ;;  %4243 = vmatpush.bf16.msrb.mxu1 %v6566_v5 }
 0x30f   : > { %v7075_v9 = vld [vmem:[%s8333_s29 + $0xf78] sm:$0xf0] }
 0x310   : > { %v7696_v37 = vld [vmem:[%s8333_s29 + $0x91c] sm:$0xf]  ;;  %v7078_v10 = vor.u32 %v7896_v2, %v7075_v9  ;;  %4256 = vmatpush.bf16.msrb.mxu2 %v6822_v36 }
 0x311   : > { %v6275_v38 = vld [vmem:[%s8333_s29 + $0x938] sm:$0xf0] }
 0x312   : > { %v7760_v7 = vld [vmem:[%s8333_s29 + $0xb1c] sm:$0xf]  ;;  %v6278_v22 = vor.u32 %v7696_v37, %v6275_v38  ;;  %4269 = vmatpush.bf16.msrb.mxu3 %v7078_v10 }
 0x313   : > { %v6531_v15 = vld [vmem:[%s8333_s29 + $0xb38] sm:$0xf0] }
 0x314   : > { %v7824_v21 = vld [vmem:[%s8333_s29 + $0xd1c] sm:$0xf]  ;;  %v6534_v44 = vor.u32 %v7760_v7, %v6531_v15  ;;  %4231 = vmatpush.bf16.msrb.mxu0 %v6278_v22  ;;  %v4018_v7 = vpop.f32.mrf.mxu3  ;;  %v3991_v22 = vadd.f32 %v9481_v49, %v9476_v46 }
 0x315   : > { %v6787_v18 = vld [vmem:[%s8333_s29 + $0xd38] sm:$0xf0] }
 0x316   : > { %v7888_v40 = vld [vmem:[%s8333_s29 + $0xf1c] sm:$0xf]  ;;  %v6790_v47 = vor.u32 %v7824_v21, %v6787_v18  ;;  %4244 = vmatpush.bf16.msrb.mxu1 %v6534_v44  ;;  %v4004_v44 = vadd.f32 %v4003_v63, %v3991_v22 }
 0x317   : > { %v7043_v41 = vld [vmem:[%s8333_s29 + $0xf38] sm:$0xf0] }
 0x318   : > { %v7688_v25 = vld [vmem:[%s8333_s29 + $0x8dc] sm:$0xf]  ;;  %v7046_v50 = vor.u32 %v7888_v40, %v7043_v41  ;;  %4257 = vmatpush.bf16.msrb.mxu2 %v6790_v47  ;;  %v4017_v47 = vadd.f32 %v4016_v6, %v4004_v44 }
 0x319   : > { %v6243_v48 = vld [vmem:[%s8333_s29 + $0x8f8] sm:$0xf0] }
 0x31a   : > { %v7752_v19 = vld [vmem:[%s8333_s29 + $0xadc] sm:$0xf]  ;;  %v6246_v56 = vor.u32 %v7688_v25, %v6243_v48  ;;  %4270 = vmatpush.bf16.msrb.mxu3 %v7046_v50  ;;  %v4029_v25 = vpop.f32.mrf.mxu0 }
 0x31b   : > { %v6499_v51 = vld [vmem:[%s8333_s29 + $0xaf8] sm:$0xf0]  ;;  %v4030_v48 = vadd.f32 %v4029_v25, %v4017_v47 }
 0x31c   : > { %v7816_v52 = vld [vmem:[%s8333_s29 + $0xcdc] sm:$0xf]  ;;  %v6502_v57 = vor.u32 %v7752_v19, %v6499_v51  ;;  %4232 = vmatpush.bf16.msrb.mxu0 %v6246_v56  ;;  %v4042_v19 = vpop.f32.mrf.mxu1  ;;  %v4055_v51 = vpop.f32.mrf.mxu2 }
 0x31d   : > { %v6755_v30 = vld [vmem:[%s8333_s29 + $0xcf8] sm:$0xf0]  ;;  %v4043_v50 = vadd.f32 %v4042_v19, %v4030_v48  ;;  %v4068_v49 = vpop.f32.mrf.mxu3 }
 0x31e   : > { %v7880_v26 = vld [vmem:[%s8333_s29 + $0xedc] sm:$0xf]  ;;  %v6758_v59 = vor.u32 %v7816_v52, %v6755_v30  ;;  %4245 = vmatpush.bf16.msrb.mxu1 %v6502_v57  ;;  %v345_v52 = vld [vmem:[#allocation2 + $0x20] sm:$0xff] }
 0x31f   : > { %v7011_v55 = vld [vmem:[%s8333_s29 + $0xef8] sm:$0xf0]  ;;  %v4056_v46 = vadd.f32 %v4055_v51, %v4043_v50 }
 0x320   : > { %v7680_v31 = vld [vmem:[%s8333_s29 + $0x89c] sm:$0xf]  ;;  %v7014_v0 = vor.u32 %v7880_v26, %v7011_v55  ;;  %4258 = vmatpush.bf16.msrb.mxu2 %v6758_v59 }
 0x321   : > { %v6211_v61 = vld [vmem:[%s8333_s29 + $0x8b8] sm:$0xf0]  ;;  %v4069_v30 = vadd.f32 %v4068_v49, %v4056_v46 }
 0x322   : > { %v7744_v62 = vld [vmem:[%s8333_s29 + $0xa9c] sm:$0xf]  ;;  %v6214_v11 = vor.u32 %v7680_v31, %v6211_v61  ;;  %4271 = vmatpush.bf16.msrb.mxu3 %v7014_v0  ;;  %v4031_v26 = vpop.f32.mrf.mxu0 }
 0x323   : > { %v6467_v35 = vld [vmem:[%s8333_s29 + $0xab8] sm:$0xf0] }
 0x324   : > { %v7808_v3 = vld [vmem:[%s8333_s29 + $0xc9c] sm:$0xf]  ;;  %v6470_v14 = vor.u32 %v7744_v62, %v6467_v35  ;;  %4233 = vmatpush.bf16.msrb.mxu0 %v6214_v11  ;;  %v4044_v55 = vpop.f32.mrf.mxu1  ;;  %v4057_v56 = vpop.f32.mrf.mxu2 }
 0x325   : > { %v6723_v4 = vld [vmem:[%s8333_s29 + $0xcb8] sm:$0xf0] }
 0x326   : > { %v7872_v8 = vld [vmem:[%s8333_s29 + $0xe9c] sm:$0xf]  ;;  %v6726_v16 = vor.u32 %v7808_v3, %v6723_v4  ;;  %4246 = vmatpush.bf16.msrb.mxu1 %v6470_v14 }
 0x327   : > { %v6979_v58 = vld [vmem:[%s8333_s29 + $0xeb8] sm:$0xf0] }
 0x328   : > { %v7672_v17 = vld [vmem:[%s8333_s29 + $0x85c] sm:$0xf]  ;;  %v6982_v54 = vor.u32 %v7872_v8, %v6979_v58  ;;  %4259 = vmatpush.bf16.msrb.mxu2 %v6726_v16  ;;  %v346_v16 = vld [vmem:[#allocation2 + $0x28] sm:$0xff] }
 0x329   : > { %v6179_v20 = vld [vmem:[%s8333_s29 + $0x878] sm:$0xf0] }
 0x32a   : > { %v7736_v23 = vld [vmem:[%s8333_s29 + $0xa5c] sm:$0xf]  ;;  %v6182_v1 = vor.u32 %v7672_v17, %v6179_v20  ;;  %4272 = vmatpush.bf16.msrb.mxu3 %v6982_v54  ;;  %v4081_v57 = vpop.f32.mrf.mxu0 }
 0x32b   : > { %v6435_v53 = vld [vmem:[%s8333_s29 + $0xa78] sm:$0xf0] }
 0x32c   : > { %v7800_v27 = vld [vmem:[%s8333_s29 + $0xc5c] sm:$0xf]  ;;  %v6438_v32 = vor.u32 %v7736_v23, %v6435_v53  ;;  %4234 = vmatpush.bf16.msrb.mxu0 %v6182_v1  ;;  %v4107_v59 = vpop.f32.mrf.mxu2 }
 0x32d   : > { %v6691_v28 = vld [vmem:[%s8333_s29 + $0xc78] sm:$0xf0] }
 0x32e   : > { %v7864_v29 = vld [vmem:[%s8333_s29 + $0xe5c] sm:$0xf]  ;;  %v6694_v33 = vor.u32 %v7800_v27, %v6691_v28  ;;  %4247 = vmatpush.bf16.msrb.mxu1 %v6438_v32 }
 0x32f   : > { %v6947_v60 = vld [vmem:[%s8333_s29 + $0xe78] sm:$0xf0] }
 0x330   : > { %v7664_v34 = vld [vmem:[%s8333_s29 + $0x81c] sm:$0xf]  ;;  %v6950_v5 = vor.u32 %v7864_v29, %v6947_v60  ;;  %4260 = vmatpush.bf16.msrb.mxu2 %v6694_v33 }
 0x331   : > { %v6147_v2 = vld [vmem:[%s8333_s29 + $0x838] sm:$0xf0] }
 0x332   : > { %v7728_v9 = vld [vmem:[%s8333_s29 + $0xa1c] sm:$0xf]  ;;  %v6150_v21 = vor.u32 %v7664_v34, %v6147_v2  ;;  %4273 = vmatpush.bf16.msrb.mxu3 %v6950_v5  ;;  %v4083_v31 = vpop.f32.mrf.mxu0 }
 0x333   : > { %v6403_v36 = vld [vmem:[%s8333_s29 + $0xa38] sm:$0xf0] }
 0x334   : > { %v7792_v37 = vld [vmem:[%s8333_s29 + $0xc1c] sm:$0xf]  ;;  %v6406_v18 = vor.u32 %v7728_v9, %v6403_v36  ;;  %4235 = vmatpush.bf16.msrb.mxu0 %v6150_v21  ;;  %v4109_v62 = vpop.f32.mrf.mxu2 }
 0x335   : > { %v6659_v38 = vld [vmem:[%s8333_s29 + $0xc38] sm:$0xf0] }
 0x336   : > { %v7856_v10 = vld [vmem:[%s8333_s29 + $0xe1c] sm:$0xf]  ;;  %v6662_v40 = vor.u32 %v7792_v37, %v6659_v38  ;;  %4248 = vmatpush.bf16.msrb.mxu1 %v6406_v18 }
 0x337   : > { %v6915_v15 = vld [vmem:[%s8333_s29 + $0xe38] sm:$0xf0]  ;;  %4236 = vmatmul.bf16.vlgmr.msrb.gmra.mxu0 %v8512_v42  ;;  %v4285_v42 = vadd.f32 %v4069_v30, %v345_v52 }
 0x338   : > { %v6918_v41 = vor.u32 %v7856_v10, %v6915_v15  ;;  %4261 = vmatpush.bf16.msrb.mxu2 %v6662_v40  ;;  %v347_v18 = vld [vmem:[#allocation2 + $0x38] sm:$0xff] }
 0x339   : > { %4249 = vmatmul.bf16.vlgmr.msrb.gmra.mxu1 %v8516_v45  ;;  %4293 = vst [vmem:[#allocation2 + $0x20] sm:$0xff] %v4285_v42  ;;  %v4070_v45 = vpop.f32.mrf.mxu3 }
 0x33a   : > { %4274 = vmatpush.bf16.msrb.mxu3 %v6918_v41 }
 0x33b   : > { %4262 = vmatmul.bf16.vlgmr.msrb.gmra.mxu2 %v8508_v39  ;;  %v4094_v39 = vpop.f32.mrf.mxu1 }
 0x33c   : > { %v4095_v0 = vadd.f32 %v4094_v39, %v4081_v57 }
 0x33d   : > { %4275 = vmatmul.bf16.vlgmr.msrb.gmra.mxu3 %v8514_v43 }
 0x33e   : > { %v4108_v35 = vadd.f32 %v4107_v59, %v4095_v0 }
 0x341   : > { %v4120_v43 = vpop.f32.mrf.mxu3 }
 0x342   : > { %v4121_v3 = vadd.f32 %v4120_v43, %v4108_v35 }
 0x343   : > { %v4096_v61 = vpop.f32.mrf.mxu1 }
 0x349   : > { %v4122_v63 = vpop.f32.mrf.mxu3 }
 0x358   : > { %v4133_v4 = vpop.f32.mrf.mxu0 }
 0x359   : > { %v4134_v6 = vadd.f32 %v4133_v4, %v4121_v3 }
 0x35a   : > { %v4146_v8 = vpop.f32.mrf.mxu1 }
 0x35b   : > { %v4147_v58 = vadd.f32 %v4146_v8, %v4134_v6 }
 0x360   : > { %v4135_v20 = vpop.f32.mrf.mxu0 }
 0x362   : > { %v4159_v11 = vpop.f32.mrf.mxu2  ;;  %v4148_v23 = vpop.f32.mrf.mxu1 }
 0x363   : > { %v4160_v13 = vadd.f32 %v4159_v11, %v4147_v58 }
 0x364   : > { %v4172_v14 = vpop.f32.mrf.mxu3 }
 0x365   : > { %v4173_v17 = vadd.f32 %v4172_v14, %v4160_v13 }
 0x367   : > { %v4286_v24 = vadd.f32 %v4173_v17, %v346_v16 }
 0x369   : > { %4294 = vst [vmem:[#allocation2 + $0x28] sm:$0xff] %v4286_v24 }
 0x36a   : > { %v4161_v54 = vpop.f32.mrf.mxu2 }
 0x36c   : > { %v4174_v53 = vpop.f32.mrf.mxu3 }
 0x378   : > { %v4185_v27 = vpop.f32.mrf.mxu0 }
 0x37a   : > { %v4198_v28 = vpop.f32.mrf.mxu1 }
 0x37b   : > { %v4199_v2 = vadd.f32 %v4198_v28, %v4185_v27 }
 0x380   : > { %v4187_v1 = vpop.f32.mrf.mxu0 }
 0x382   : > { %v4211_v29 = vpop.f32.mrf.mxu2  ;;  %v4200_v32 = vpop.f32.mrf.mxu1 }
 0x383   : > { %v4212_v9 = vadd.f32 %v4211_v29, %v4199_v2 }
 0x384   : > { %v4224_v60 = vpop.f32.mrf.mxu3 }
 0x385   : > { %v4225_v12 = vadd.f32 %v4224_v60, %v4212_v9 }
 0x38a   : > { %v4213_v33 = vpop.f32.mrf.mxu2 }
 0x38c   : > { %v4226_v34 = vpop.f32.mrf.mxu3 }
 0x3b4   : > { %v4237_v5 = vpop.f32.mrf.mxu0 }
 0x3b5   : > { %v4238_v37 = vadd.f32 %v4237_v5, %v4225_v12 }
 0x3b6   : > { %v4250_v36 = vpop.f32.mrf.mxu1 }
 0x3b7   : > { %v4251_v38 = vadd.f32 %v4250_v36, %v4238_v37 }
 0x3bc   : > { %v4239_v21 = vpop.f32.mrf.mxu0 }
 0x3be   : > { %v4263_v7 = vpop.f32.mrf.mxu2  ;;  %v4252_v40 = vpop.f32.mrf.mxu1 }
 0x3bf   : > { %v4264_v10 = vadd.f32 %v4263_v7, %v4251_v38 }
 0x3c0   : > { %v4276_v15 = vpop.f32.mrf.mxu3 }
 0x3c1   : > { %v4277_v41 = vadd.f32 %v4276_v15, %v4264_v10 }
 0x3c3   : > { %v4287_v22 = vadd.f32 %v4277_v41, %v347_v18 }
 0x3c4   : > { %4299 = sbr.rel (%p7143_p3) target bundleno = 1176 (0x498), region = 60 }
 0x3c5   : > { %4295 = vst [vmem:[#allocation2 + $0x38] sm:$0xff] %v4287_v22 }
 0x3c6   : > { %v4265_v44 = vpop.f32.mrf.mxu2 }
 0x3c8   : > { %v4278_v47 = vpop.f32.mrf.mxu3 }
 0x3c9   : > { %v7924_v25 = vld [vmem:[%s9745_s3 + $0x38] sm:$0xff]  ;;  %v7923_v51 = vld [vmem:[%s9745_s3 + $0x30] sm:$0xff]  ;;  %v7922_v30 = vld [vmem:[%s9745_s3 + $0x28] sm:$0xff]  ;;  %vm4970_vm0 = vcmask 80896  }
 0x3ca   : > { %v7932_v48 = vld [vmem:[%s9745_s3 + $0x78] sm:$0xff]  ;;  %4866 = vmatpush.bf16.msra.mxu0 %v7924_v25  ;;  %v7931_v46 = vld [vmem:[%s9745_s3 + $0x70] sm:$0xff]  ;;  %v7930_v26 = vld [vmem:[%s9745_s3 + $0x68] sm:$0xff] }
 0x3cb   : > { %v7940_v19 = vld [vmem:[%s9745_s3 + $0xb8] sm:$0xff]  ;;  %4879 = vmatpush.bf16.msra.mxu1 %v7932_v48  ;;  %v7939_v49 = vld [vmem:[%s9745_s3 + $0xb0] sm:$0xff]  ;;  %v7938_v55 = vld [vmem:[%s9745_s3 + $0xa8] sm:$0xff] }
 0x3cc   : > { %v7948_v50 = vld [vmem:[%s9745_s3 + $0xf8] sm:$0xff]  ;;  %4892 = vmatpush.bf16.msra.mxu2 %v7940_v19  ;;  %v7947_v52 = vld [vmem:[%s9745_s3 + $0xf0] sm:$0xff]  ;;  %v7946_v42 = vld [vmem:[%s9745_s3 + $0xe8] sm:$0xff] }
 0x3cd   : > { %4905 = vmatpush.bf16.msra.mxu3 %v7948_v50  ;;  %v7921_v56 = vld [vmem:[%s9745_s3 + $0x20] sm:$0xff]  ;;  %v7920_v59 = vld [vmem:[%s9745_s3 + $0x18] sm:$0xff]  ;;  %v7919_v63 = vld [vmem:[%s9745_s3 + $0x10] sm:$0xff] }
 0x3ce   : > { %4867 = vmatpush.bf16.msra.mxu0 %v7923_v51  ;;  %v7929_v45 = vld [vmem:[%s9745_s3 + $0x60] sm:$0xff]  ;;  %v7928_v43 = vld [vmem:[%s9745_s3 + $0x58] sm:$0xff]  ;;  %v7927_v0 = vld [vmem:[%s9745_s3 + $0x50] sm:$0xff] }
 0x3cf   : > { %4880 = vmatpush.bf16.msra.mxu1 %v7931_v46  ;;  %v7937_v57 = vld [vmem:[%s9745_s3 + $0xa0] sm:$0xff]  ;;  %v7936_v31 = vld [vmem:[%s9745_s3 + $0x98] sm:$0xff]  ;;  %v7935_v35 = vld [vmem:[%s9745_s3 + $0x90] sm:$0xff] }
 0x3d0   : > { %4893 = vmatpush.bf16.msra.mxu2 %v7939_v49  ;;  %v7945_v39 = vld [vmem:[%s9745_s3 + $0xe0] sm:$0xff]  ;;  %v7944_v61 = vld [vmem:[%s9745_s3 + $0xd8] sm:$0xff]  ;;  %v7943_v6 = vld [vmem:[%s9745_s3 + $0xd0] sm:$0xff] }
 0x3d1   : > { %4906 = vmatpush.bf16.msra.mxu3 %v7947_v52  ;;  %v9579_v62 = vld [vmem:[#allocation5] sm:$0xff]  ;;  %v4302_v8 = vld [vmem:[#allocation2 + $0x18] sm:$0xff]  ;;  %v4303_v58 = vld [vmem:[#allocation2 + $0x10] sm:$0xff] }
 0x3d2   : > { %4868 = vmatpush.bf16.msra.mxu0 %v7922_v30  ;;  %v4312_v3 = vperm.slane %v9579_v62, 2  ;;  %v4313_v4 = vperm.slane %v9579_v62, 3  ;;  %v4310_v11 = vperm.slane %v9579_v62, 0  ;;  %v4311_v13 = vperm.slane %v9579_v62, 1  ;;  %v4300_v14 = vld [vmem:[#allocation2 + $0x30] sm:$0xff]  ;;  %v4301_v16 = vld [vmem:[#allocation2] sm:$0xff] }
 0x3d3   : > { %4881 = vmatpush.bf16.msra.mxu1 %v7930_v26  ;;  %v7918_v17 = vld [vmem:[%s9745_s3 + $0x8] sm:$0xff]  ;;  %v7917_v29 = vld [vmem:[%s9745_s3] sm:$0xff]  ;;  %v7956_v12 = vld [vmem:[%s9745_s3 + $0x138] sm:$0xff] }
 0x3d4   : > { %4894 = vmatpush.bf16.msra.mxu2 %v7938_v55  ;;  %v7926_v20 = vld [vmem:[%s9745_s3 + $0x48] sm:$0xff]  ;;  %v4328_v23 = vadd.f32 %v4312_v3, %v4302_v8  ;;  %v4329_v24 = vadd.f32 %v4313_v4, %v4303_v58  ;;  %v4326_v27 = vadd.f32 %v4310_v11, %v4300_v14  ;;  %v4327_v28 = vadd.f32 %v4311_v13, %v4301_v16  ;;  %v7925_v60 = vld [vmem:[%s9745_s3 + $0x40] sm:$0xff]  ;;  %v7964_v5 = vld [vmem:[%s9745_s3 + $0x178] sm:$0xff] }
 0x3d5   : > { %4907 = vmatpush.bf16.msra.mxu3 %v7946_v42  ;;  %v7934_v54 = vld [vmem:[%s9745_s3 + $0x88] sm:$0xff]  ;;  %v7933_v33 = vld [vmem:[%s9745_s3 + $0x80] sm:$0xff]  ;;  %v7972_v36 = vld [vmem:[%s9745_s3 + $0x1b8] sm:$0xff]  ;;  %v4314_v42 = vperm.slane %v9579_v62, 4 }
 0x3d6   : > { %4869 = vmatpush.bf16.msra.mxu0 %v7921_v56  ;;  %v7942_v53 = vld [vmem:[%s9745_s3 + $0xc8] sm:$0xff]  ;;  %v4336_v1 = vmax.f32 %v4328_v23, 0.0  ;;  %v4337_v32 = vmax.f32 %v4329_v24, 0.0  ;;  %v7941_v34 = vld [vmem:[%s9745_s3 + $0xc0] sm:$0xff]  ;;  %v4334_v2 = vmax.f32 %v4326_v27, 0.0  ;;  %v4335_v9 = vmax.f32 %v4327_v28, 0.0 }
 0x3d7   : > { %4882 = vmatpush.bf16.msra.mxu1 %v7929_v45  ;;  %v7980_v37 = vld [vmem:[%s9745_s3 + $0x1f8] sm:$0xff]  ;;  %v7955_v21 = vld [vmem:[%s9745_s3 + $0x130] sm:$0xff]  ;;  %v7954_v22 = vld [vmem:[%s9745_s3 + $0x128] sm:$0xff]  ;;  %v4315_v56 = vperm.slane %v9579_v62, 5 }
 0x3d8   : > { %4895 = vmatpush.bf16.msra.mxu2 %v7937_v57  ;;  %v4344_v38 = vpack.c.bf16 %v4336_v1, %v4336_v1  ;;  %v4345_v7 = vpack.c.bf16 %v4337_v32, %v4337_v32  ;;  %v4342_v10 = vpack.c.bf16 %v4334_v2, %v4334_v2  ;;  %v4343_v15 = vpack.c.bf16 %v4335_v9, %v4335_v9  ;;  %v7963_v18 = vld [vmem:[%s9745_s3 + $0x170] sm:$0xff]  ;;  %v7962_v44 = vld [vmem:[%s9745_s3 + $0x168] sm:$0xff]  ;;  %v7953_v48 = vld [vmem:[%s9745_s3 + $0x120] sm:$0xff] }
 0x3d9   : > { %4908 = vmatpush.bf16.msra.mxu3 %v7945_v39  ;;  %v7971_v40 = vld [vmem:[%s9745_s3 + $0x1b0] sm:$0xff]  ;;  %v7970_v47 = vld [vmem:[%s9745_s3 + $0x1a8] sm:$0xff]  ;;  %v7961_v19 = vld [vmem:[%s9745_s3 + $0x160] sm:$0xff] }
 0x3da   : > { %4870 = vmatpush.bf16.msra.mxu0 %v7920_v59  ;;  %v7979_v41 = vld [vmem:[%s9745_s3 + $0x1f0] sm:$0xff]  ;;  %v7978_v25 = vld [vmem:[%s9745_s3 + $0x1e8] sm:$0xff]  ;;  %v7969_v50 = vld [vmem:[%s9745_s3 + $0x1a0] sm:$0xff]  ;;  %v4316_v59 = vperm.slane %v9579_v62, 6 }
 0x3db   : > { %4883 = vmatpush.bf16.msra.mxu1 %v7928_v43  ;;  %v7977_v51 = vld [vmem:[%s9745_s3 + $0x1e0] sm:$0xff]  ;;  %v7952_v46 = vld [vmem:[%s9745_s3 + $0x118] sm:$0xff]  ;;  %v7951_v26 = vld [vmem:[%s9745_s3 + $0x110] sm:$0xff]  ;;  %v4317_v43 = vperm.slane %v9579_v62, 7 }
 0x3dc   : > { %4896 = vmatpush.bf16.msra.mxu2 %v7936_v31  ;;  %v7960_v49 = vld [vmem:[%s9745_s3 + $0x158] sm:$0xff]  ;;  %v7959_v55 = vld [vmem:[%s9745_s3 + $0x150] sm:$0xff]  ;;  %v4304_v57 = vld [vmem:[#allocation2 + $0x8] sm:$0xff] }
 0x3dd   : > { %4909 = vmatpush.bf16.msra.mxu3 %v7944_v61  ;;  %v7968_v52 = vld [vmem:[%s9745_s3 + $0x198] sm:$0xff]  ;;  %v7967_v45 = vld [vmem:[%s9745_s3 + $0x190] sm:$0xff]  ;;  %v4305_v39 = vld [vmem:[#allocation2 + $0x20] sm:$0xff] }
 0x3de   : > { %4871 = vmatpush.bf16.msra.mxu0 %v7919_v63  ;;  %v7976_v30 = vld [vmem:[%s9745_s3 + $0x1d8] sm:$0xff]  ;;  %v7975_v31 = vld [vmem:[%s9745_s3 + $0x1d0] sm:$0xff]  ;;  %v4306_v61 = vld [vmem:[#allocation2 + $0x28] sm:$0xff] }
 0x3df   : > { %4884 = vmatpush.bf16.msra.mxu1 %v7927_v0  ;;  %v4307_v63 = vld [vmem:[#allocation2 + $0x38] sm:$0xff]  ;;  %v4330_v0 = vadd.f32 %v4314_v42, %v4304_v57  ;;  %v7950_v3 = vld [vmem:[%s9745_s3 + $0x108] sm:$0xff]  ;;  %v4332_v4 = vadd.f32 %v4316_v59, %v4306_v61  ;;  %v7949_v14 = vld [vmem:[%s9745_s3 + $0x100] sm:$0xff] }
 0x3e0   : > { %4897 = vmatpush.bf16.msra.mxu2 %v7935_v35  ;;  %v4331_v35 = vadd.f32 %v4315_v56, %v4305_v39  ;;  %v7958_v62 = vld [vmem:[%s9745_s3 + $0x148] sm:$0xff]  ;;  %v7957_v16 = vld [vmem:[%s9745_s3 + $0x140] sm:$0xff] }
 0x3e1   : > { %4910 = vmatpush.bf16.msra.mxu3 %v7943_v6  ;;  %v4333_v6 = vadd.f32 %v4317_v43, %v4307_v63  ;;  %v7966_v8 = vld [vmem:[%s9745_s3 + $0x188] sm:$0xff]  ;;  %v4338_v11 = vmax.f32 %v4330_v0, 0.0  ;;  %v7965_v23 = vld [vmem:[%s9745_s3 + $0x180] sm:$0xff] }
 0x3e2   : > { %4872 = vmatpush.bf16.msra.mxu0 %v7918_v17  ;;  %v7974_v58 = vld [vmem:[%s9745_s3 + $0x1c8] sm:$0xff]  ;;  %v4339_v13 = vmax.f32 %v4331_v35, 0.0  ;;  %v4340_v17 = vmax.f32 %v4332_v4, 0.0  ;;  %v7973_v24 = vld [vmem:[%s9745_s3 + $0x1c0] sm:$0xff] }
 0x3e3   : > { %4885 = vmatpush.bf16.msra.mxu1 %v7926_v20  ;;  %v4341_v20 = vmax.f32 %v4333_v6, 0.0  ;;  %v8060_v2 = vld [vmem:[#allocation7] ss:$0 sm:$0xff] }
 0x3e4   : > { %4898 = vmatpush.bf16.msra.mxu2 %v7934_v54  ;;  %v4346_v54 = vpack.c.bf16 %v4338_v11, %v4338_v11  ;;  %v4348_v27 = vpack.c.bf16 %v4340_v17, %v4340_v17 }
 0x3e5   : > { %4911 = vmatpush.bf16.msra.mxu3 %v7942_v53  ;;  %v4347_v53 = vpack.c.bf16 %v4339_v13, %v4339_v13  ;;  %v4349_v28 = vpack.c.bf16 %v4341_v20, %v4341_v20 }
 0x3e6   : > { %4873 = vmatpush.bf16.msra.mxu0 %v7917_v29 }
 0x3e7   : > { %4886 = vmatpush.bf16.msra.mxu1 %v7925_v60 }
 0x3e8   : > { %4899 = vmatpush.bf16.msra.mxu2 %v7933_v33 }
 0x3e9   : > { %4912 = vmatpush.bf16.msra.mxu3 %v7941_v34  ;;  %4874 = vmatmul.bf16.vlgmr.msra.gmra.mxu0 %v4342_v10 }
 0x3ea   : > { %4918 = vmatpush.bf16.msrb.mxu0 %v7956_v12  ;;  %4887 = vmatmul.bf16.vlgmr.msra.gmra.mxu1 %v4343_v15 }
 0x3eb   : > { %4931 = vmatpush.bf16.msrb.mxu1 %v7964_v5  ;;  %4900 = vmatmul.bf16.vlgmr.msra.gmra.mxu2 %v4344_v38 }
 0x3ec   : > { %4944 = vmatpush.bf16.msrb.mxu2 %v7972_v36  ;;  %4913 = vmatmul.bf16.vlgmr.msra.gmra.mxu3 %v4345_v7 }
 0x3ed   : > { %4957 = vmatpush.bf16.msrb.mxu3 %v7980_v37 }
 0x3ee   : > { %4919 = vmatpush.bf16.msrb.mxu0 %v7955_v21 }
 0x3ef   : > { %4932 = vmatpush.bf16.msrb.mxu1 %v7963_v18 }
 0x3f0   : > { %4945 = vmatpush.bf16.msrb.mxu2 %v7971_v40 }
 0x3f1   : > { %4958 = vmatpush.bf16.msrb.mxu3 %v7979_v41 }
 0x3f2   : > { %4920 = vmatpush.bf16.msrb.mxu0 %v7954_v22 }
 0x3f3   : > { %4933 = vmatpush.bf16.msrb.mxu1 %v7962_v44 }
 0x3f4   : > { %4946 = vmatpush.bf16.msrb.mxu2 %v7970_v47 }
 0x3f5   : > { %4959 = vmatpush.bf16.msrb.mxu3 %v7978_v25 }
 0x3f6   : > { %4921 = vmatpush.bf16.msrb.mxu0 %v7953_v48 }
 0x3f7   : > { %4934 = vmatpush.bf16.msrb.mxu1 %v7961_v19 }
 0x3f8   : > { %4947 = vmatpush.bf16.msrb.mxu2 %v7969_v50 }
 0x3f9   : > { %4960 = vmatpush.bf16.msrb.mxu3 %v7977_v51 }
 0x3fa   : > { %4922 = vmatpush.bf16.msrb.mxu0 %v7952_v46 }
 0x3fb   : > { %4935 = vmatpush.bf16.msrb.mxu1 %v7960_v49 }
 0x3fc   : > { %4948 = vmatpush.bf16.msrb.mxu2 %v7968_v52 }
 0x3fd   : > { %4961 = vmatpush.bf16.msrb.mxu3 %v7976_v30 }
 0x3fe   : > { %4923 = vmatpush.bf16.msrb.mxu0 %v7951_v26 }
 0x3ff   : > { %4936 = vmatpush.bf16.msrb.mxu1 %v7959_v55 }
 0x400   : > { %4949 = vmatpush.bf16.msrb.mxu2 %v7967_v45 }
 0x401   : > { %4962 = vmatpush.bf16.msrb.mxu3 %v7975_v31 }
 0x402   : > { %4924 = vmatpush.bf16.msrb.mxu0 %v7950_v3 }
 0x403   : > { %4937 = vmatpush.bf16.msrb.mxu1 %v7958_v62 }
 0x404   : > { %4950 = vmatpush.bf16.msrb.mxu2 %v7966_v8 }
 0x405   : > { %4963 = vmatpush.bf16.msrb.mxu3 %v7974_v58 }
 0x406   : > { %4925 = vmatpush.bf16.msrb.mxu0 %v7949_v14 }
 0x407   : > { %4938 = vmatpush.bf16.msrb.mxu1 %v7957_v16 }
 0x408   : > { %4951 = vmatpush.bf16.msrb.mxu2 %v7965_v23 }
 0x409   : > { %4964 = vmatpush.bf16.msrb.mxu3 %v7973_v24  ;;  %4926 = vmatmul.bf16.vlgmr.msrb.gmra.mxu0 %v4346_v54 }
 0x40a   : > { %4939 = vmatmul.bf16.vlgmr.msrb.gmra.mxu1 %v4347_v53 }
 0x40b   : > { %4952 = vmatmul.bf16.vlgmr.msrb.gmra.mxu2 %v4348_v27 }
 0x40c   : > { %4965 = vmatmul.bf16.vlgmr.msrb.gmra.mxu3 %v4349_v28 }
 0x466   : > { %v4875_v29 = vpop.f32.mrf.mxu0 }
 0x467   : > { %v4888_v60 = vpop.f32.mrf.mxu1  ;;  %v4876_v5 = vadd.f32 %v8060_v2, %v4875_v29 }
 0x469   : > { %v4889_v36 = vadd.f32 %v4888_v60, %v4876_v5 }
 0x46e   : > { %v4901_v1 = vpop.f32.mrf.mxu2  ;;  %v4877_v33 = vpop.f32.mrf.mxu0 }
 0x46f   : > { %v4914_v32 = vpop.f32.mrf.mxu3  ;;  %v4890_v34 = vpop.f32.mrf.mxu1  ;;  %v4902_v37 = vadd.f32 %v4901_v1, %v4889_v36 }
 0x471   : > { %v4915_v38 = vadd.f32 %v4914_v32, %v4902_v37 }
 0x476   : > { %v4903_v9 = vpop.f32.mrf.mxu2 }
 0x477   : > { %v4916_v12 = vpop.f32.mrf.mxu3 }
 0x486   : > { %v4927_v7 = vpop.f32.mrf.mxu0 }
 0x487   : > { %v4940_v10 = vpop.f32.mrf.mxu1  ;;  %v4928_v15 = vadd.f32 %v4927_v7, %v4915_v38 }
 0x489   : > { %v4941_v21 = vadd.f32 %v4940_v10, %v4928_v15 }
 0x48e   : > { %v4953_v18 = vpop.f32.mrf.mxu2  ;;  %v4929_v22 = vpop.f32.mrf.mxu0 }
 0x48f   : > { %v4966_v40 = vpop.f32.mrf.mxu3  ;;  %v4954_v41 = vadd.f32 %v4953_v18, %v4941_v21  ;;  %v4942_v44 = vpop.f32.mrf.mxu1 }
 0x491   : > { %v4967_v47 = vadd.f32 %v4966_v40, %v4954_v41 }
 0x493   : > { %4971 = vst.msk [vmem:[%s9747_s5] sm:$0xff] %vm4970_vm0, %v4967_v47 }
 0x496   : > { %v4955_v25 = vpop.f32.mrf.mxu2 }
 0x497   : > { %v4968_v48 = vpop.f32.mrf.mxu3 }
 0x498 PF: > { %s19_s23 = sadd.s32 1, %s8205_s23   ;;  %s9753_s18 = smov %s8189_s19 }
 0x499   : > { %p16_p4 = scmp.ge.s32.totalorder %s19_s23, 5   ;;  %s9754_s19 = smov %s8193_s20 }
 0x49a   : > { %s9755_s20 = smov %s8326_s11  ;;  %s9756_s21 = smov %s8201_s22 }
 0x49b   : > { %s9757_s22 = smov %s9759_s17  ;;  %18 = sbr.rel (!%p16_p4) target bundleno = 5 (0x5), region = 99 }
 0x4a0   :  { %4991 = vsyncpa [#allocation4], 1 }
 0x4a1   :  { %4993 = vsyncpa [#allocation4 + $0x1], 1 }
 0x4a2   :  { %4994 = vsyncpa [#allocation6], 1 }

</bundles_post_ra>
